<compile_context>
chip_gen: v6e
topology: v6e:2x2x1
jax: 0.10.0
libtpu: 0.0.40
codegen_flags: <defaults>
</compile_context>

<pallas_src>
import math

import jax
import jax.numpy as jnp
from jax.experimental import pallas as pl
from jax.experimental.pallas import tpu as pltpu

EPS = 1e-5
_MXU_MIN_K = 8     # contractions below this stay on the VPU (a handful of MACs)
_PADL = 8          # sublane-aligned left border of the shared depthwise halo scratch


# ------------------------------ kernel helpers -------------------------------

def _pointwise(xs, wp, bp, relu):
    """1x1 conv (+bias, +ReLU) on in-VMEM tiles.

    `xs` is a list of (H, W, Ci) tiles whose channels are stacked in the row order
    of `wp` -- this is how the GhostOne channel-concat is consumed without ever
    materializing it.  Contractions >= _MXU_MIN_K run as one f32 MXU matmul on a
    (H*W, Ci) view (minor dim unchanged -> relayout-free reshape); tiny ones stay
    on the VPU as a few broadcast-MACs.
    """
    H, W, _ = xs[0].shape
    cout = wp.shape[-1]
    acc = jnp.zeros((H * W, cout), jnp.float32) + bp              # bp: (1, cout)
    row = 0
    for x in xs:
        c = int(x.shape[-1])
        x2d = x.reshape(H * W, c)
        if c >= _MXU_MIN_K:
            acc = acc + jnp.dot(x2d, wp[row:row + c, :],
                                preferred_element_type=jnp.float32)
        else:
            for ci in range(c):
                acc = acc + x2d[:, ci:ci + 1] * wp[row + ci].reshape(1, cout)
        row += c
    acc = acc.reshape(H, W, cout)
    if relu:
        acc = jnp.maximum(acc, 0.0)
    return acc


def _depthwise3x3(x, wd, bd, pad_ref, relu):
    """3x3 depthwise conv, stride 1, pad 1, fully in VMEM.

    `pad_ref` is a zero-bordered halo scratch shared by both depthwise stages
    (border strips are zeroed once per grid step in the kernel body).  x is stored
    at rows [1:H+1] and sublane-aligned columns [_PADL:_PADL+W].  Only the three
    column-shifted planes are read (dx=+-1 are the only unaligned sublane reads);
    the dy shifts are cheap whole-slab slices on the leading axis.
    """
    H, W, C = x.shape
    pad_ref[1:H + 1, _PADL:_PADL + W, :C] = x                     # aligned interior store

    acc = jnp.zeros((H, W, C), jnp.float32) + bd.reshape(1, 1, C)
    for kx in range(3):
        col = pad_ref[:, _PADL + kx - 1:_PADL + kx - 1 + W, :C]   # (H+2, W, C)
        for ky in range(3):
            tap = wd[ky * 3 + kx].reshape(1, 1, C)
            acc = acc + col[ky:ky + H] * tap
    if relu:
        acc = jnp.maximum(acc, 0.0)
    return acc


def _ghost_bottleneck_kernel(x_ref,
                             wp1_ref, bp1_ref, wd1_ref, bd1_ref,
                             wp2_ref, bp2_ref, wd2_ref, bd2_ref,
                             o_ref, pad_ref):
    x = x_ref[0]                                                  # (H, W, Cin)
    H, W, _ = x.shape
    Hp2, PW, Cm = pad_ref.shape

    # Zero only the halo border strips the taps actually read (top/bottom row +
    # the two border columns).  The interior is fully overwritten each stage and
    # unread columns may stay garbage.  Done every step so it stays correct under
    # "parallel" megacore splitting of the grid.
    zr = jnp.zeros((1, PW, Cm), jnp.float32)
    pad_ref[0:1, :, :] = zr
    pad_ref[H + 1:H + 2, :, :] = zr
    zc = jnp.zeros((Hp2, 1, Cm), jnp.float32)
    pad_ref[:, _PADL - 1:_PADL, :] = zc
    pad_ref[:, _PADL + W:_PADL + W + 1, :] = zc

    # ---- GhostOneModule(in -> hidden), ReLU ----
    x1 = _pointwise([x], wp1_ref[...], bp1_ref[...], relu=True)
    x2 = _depthwise3x3(x1, wd1_ref[...], bd1_ref[...], pad_ref, relu=True)

    # ---- GhostOneModule(hidden -> out), linear ----
    # concat(x1, x2) is consumed implicitly: wp2 rows [0:C1] act on x1, rows
    # [C1:2*C1] act on x2, so the concatenated tensor never materializes.
    z1 = _pointwise([x1, x2], wp2_ref[...], bp2_ref[...], relu=False)
    z2 = _depthwise3x3(z1, wd2_ref[...], bd2_ref[...], pad_ref, relu=False)

    # torch.cat([z1, z2], channel) done in-kernel, then folded so the store is
    # lane-dense: last axis = W * 2*C2 (= 128 here) instead of 2*C2 (= 8).
    y = jnp.concatenate([z1, z2], axis=-1)                        # (H, W, 2*C2)
    o_ref[0] = y.reshape(H, W * y.shape[-1])


# ------------------------------ public wrapper --------------------------------

def ghost_one_bottleneck(x_nchw, params, *, stride=1):
    """Pallas forward. Takes/returns NCHW to match the PyTorch module interface."""
    # TODO(synk): stride==2 path (extra linear stride-2 depthwise MobileOneBlock)
    # is not implemented; this instantiation uses stride=1.
    assert stride == 1
    wp1, bp1 = params["g1_primary"]
    wd1, bd1 = params["g1_cheap"]
    wp2, bp2 = params["g2_primary"]
    wd2, bd2 = params["g2_cheap"]
    C1 = wp1.shape[1]
    C2 = wp2.shape[1]
    Cmax = max(C1, C2)
    N, Cin, H, W = x_nchw.shape
    x = jnp.transpose(x_nchw, (0, 2, 3, 1))                        # NCHW -> NHWC

    out = pl.pallas_call(
        _ghost_bottleneck_kernel,
        out_shape=jax.ShapeDtypeStruct((N, H, W * 2 * C2), jnp.float32),
        grid=(N,),
        in_specs=[
            pl.BlockSpec((1, H, W, Cin), lambda n: (n, 0, 0, 0)),
            pl.BlockSpec((Cin, C1), lambda n: (0, 0)),
            pl.BlockSpec((1, C1), lambda n: (0, 0)),
            pl.BlockSpec((9, C1), lambda n: (0, 0)),
            pl.BlockSpec((1, C1), lambda n: (0, 0)),
            pl.BlockSpec((2 * C1, C2), lambda n: (0, 0)),
            pl.BlockSpec((1, C2), lambda n: (0, 0)),
            pl.BlockSpec((9, C2), lambda n: (0, 0)),
            pl.BlockSpec((1, C2), lambda n: (0, 0)),
        ],
        out_specs=pl.BlockSpec((1, H, W * 2 * C2), lambda n: (n, 0, 0)),
        scratch_shapes=[
            # one halo scratch shared by both depthwise stages
            pltpu.VMEM((H + 2, _PADL + W + 1, Cmax), jnp.float32),
        ],
        compiler_params=pltpu.CompilerParams(
            dimension_semantics=("parallel",),
            vmem_limit_bytes=32 * 1024 * 1024),
    )(x,
      wp1, bp1.reshape(1, C1), wd1.reshape(9, C1), bd1.reshape(1, C1),
      wp2, bp2.reshape(1, C2), wd2.reshape(9, C2), bd2.reshape(1, C2))

    # Free row-major split of the folded lane axis, then the interface transpose.
    y = out.reshape(N, H, W, 2 * C2)
    return jnp.transpose(y, (0, 3, 1, 2))                          # NHWC -> NCHW


# ----------------------- parameter init + branch fusion -----------------------

def _init_bn(key, c):
    k1, k2, k3, k4 = jax.random.split(key, 4)
    return {
        "gamma": 1.0 + 0.1 * jax.random.normal(k1, (c,), jnp.float32),
        "beta": 0.1 * jax.random.normal(k2, (c,), jnp.float32),
        "mean": 0.1 * jax.random.normal(k3, (c,), jnp.float32),
        "var": 0.9 + 0.2 * jax.random.uniform(k4, (c,), jnp.float32),
    }


def _init_conv_bn(key, cout, cin_per_group, k):
    kw, kb = jax.random.split(key)
    fan_in = cin_per_group * k * k
    bound = 1.0 / math.sqrt(fan_in)
    w = jax.random.uniform(kw, (cout, cin_per_group, k, k), jnp.float32,
                           -bound, bound)
    bn = _init_bn(kb, cout)
    return {"w": w, **bn}


def _fuse_conv_bn(p):
    t = p["gamma"] / jnp.sqrt(p["var"] + EPS)
    return p["w"] * t[:, None, None, None], p["beta"] - p["mean"] * t


def _build_pointwise_block(key, cin, cout):
    """MobileOneBlock(k=1, groups=1): rbr_conv(1x1+BN) [+ BN skip if cin==cout]."""
    kc, ks = jax.random.split(key)
    conv = _init_conv_bn(kc, cout, cin, 1)
    kf, bf = _fuse_conv_bn(conv)             # (cout, cin, 1, 1)
    Wm = kf[:, :, 0, 0]                      # (cout, cin)
    b = bf
    if cin == cout:
        bn = _init_bn(ks, cout)
        t = bn["gamma"] / jnp.sqrt(bn["var"] + EPS)
        Wm = Wm + jnp.diag(t)
        b = b + bn["beta"] - bn["mean"] * t
    return Wm.T, b                           # (cin, cout), (cout,)


def _build_depthwise_block(key, c):
    """MobileOneBlock(k=3, groups=C): dw3x3+BN, dw1x1(scale)+BN, BN skip."""
    kc, ksc, ksk = jax.random.split(key, 3)
    conv = _init_conv_bn(kc, c, 1, 3)        # (C,1,3,3)
    scale = _init_conv_bn(ksc, c, 1, 1)      # (C,1,1,1)
    skip = _init_bn(ksk, c)

    kf, bf = _fuse_conv_bn(conv)
    Wd = jnp.transpose(kf[:, 0], (1, 2, 0))  # (3,3,C)
    b = bf

    kfs, bfs = _fuse_conv_bn(scale)
    Wd = Wd.at[1, 1, :].add(kfs[:, 0, 0, 0])
    b = b + bfs

    t = skip["gamma"] / jnp.sqrt(skip["var"] + EPS)
    Wd = Wd.at[1, 1, :].add(t)
    b = b + skip["beta"] - skip["mean"] * t
    return Wd, b                             # (3,3,C), (C,)


def make_params(key, in_c, hidden_c, out_c):
    h1 = math.ceil(hidden_c / 2)
    o1 = math.ceil(out_c / 2)
    k0, k1, k2, k3 = jax.random.split(key, 4)
    return {
        "g1_primary": _build_pointwise_block(k0, in_c, h1),
        "g1_cheap": _build_depthwise_block(k1, h1),
        "g2_primary": _build_pointwise_block(k2, hidden_c, o1),
        "g2_cheap": _build_depthwise_block(k3, o1),
    }


# ----------------------------- pure-JAX reference ------------------------------

def _ref_pointwise(x_nhwc, w, b, relu):
    y = jnp.einsum("nhwc,cd->nhwd", x_nhwc, w,
                   precision=jax.lax.Precision.HIGHEST) + b
    return jnp.maximum(y, 0.0) if relu else y


def _ref_depthwise(x_nhwc, wd, b, relu):
    C = x_nhwc.shape[-1]
    x_nchw = jnp.transpose(x_nhwc, (0, 3, 1, 2))
    w = jnp.transpose(wd, (2, 0, 1))[:, None]   # (C,1,3,3)
    y = jax.lax.conv_general_dilated(
        x_nchw, w, window_strides=(1, 1), padding=((1, 1), (1, 1)),
        dimension_numbers=("NCHW", "OIHW", "NCHW"), feature_group_count=C,
        precision=jax.lax.Precision.HIGHEST)
    y = jnp.transpose(y, (0, 2, 3, 1)) + b
    return jnp.maximum(y, 0.0) if relu else y


def ghost_one_bottleneck_ref(x_nchw, params):
    x = jnp.transpose(x_nchw, (0, 2, 3, 1))

    def gm(xin, prim, cheap, relu):
        x1 = _ref_pointwise(xin, prim[0], prim[1], relu)
        x2 = _ref_depthwise(x1, cheap[0], cheap[1], relu)
        return jnp.concatenate([x1, x2], axis=-1)

    y = gm(x, params["g1_primary"], params["g1_cheap"], True)
    y = gm(y, params["g2_primary"], params["g2_cheap"], False)
    return jnp.transpose(y, (0, 3, 1, 2))


# ------------------------------------ main -------------------------------------

if __name__ == "__main__":
    key = jax.random.PRNGKey(0)
    kx, kp = jax.random.split(key)

    N, Cin, H, W = 2, 4, 16, 16
    hidden_c, Cout, stride = 32, 8, 1

    x = jax.random.normal(kx, (N, Cin, H, W), jnp.float32)
    params = make_params(kp, Cin, hidden_c, Cout)

    fwd = jax.jit(lambda xx: ghost_one_bottleneck(xx, params, stride=stride))
    y = jax.block_until_ready(fwd(x))

    y_ref = jax.block_until_ready(ghost_one_bottleneck_ref(x, params))

    assert y.shape == (N, Cout, H, W), y.shape
    max_err = float(jnp.max(jnp.abs(y - y_ref)))
    # Tolerance leaves headroom for MXU f32 pass precision vs the HIGHEST-precision
    # reference (the kernel keeps everything f32; no bf16 casts).
    assert jnp.allclose(y, y_ref, atol=1e-2, rtol=1e-2), max_err
    print("KERNEL_OK")
</pallas_src>

<mosaic_0001>
module attributes {stable_mosaic.version = 11 : i64} {
  func.func @_ghost_bottleneck_kernel(%arg0: i32, %arg1: memref<1x16x16x4xf32, #tpu.memory_space<vmem>>, %arg2: memref<4x16xf32, #tpu.memory_space<vmem>>, %arg3: memref<1x16xf32, #tpu.memory_space<vmem>>, %arg4: memref<9x16xf32, #tpu.memory_space<vmem>>, %arg5: memref<1x16xf32, #tpu.memory_space<vmem>>, %arg6: memref<32x4xf32, #tpu.memory_space<vmem>>, %arg7: memref<1x4xf32, #tpu.memory_space<vmem>>, %arg8: memref<9x4xf32, #tpu.memory_space<vmem>>, %arg9: memref<1x4xf32, #tpu.memory_space<vmem>>, %arg10: memref<1x16x128xf32, #tpu.memory_space<vmem>>, %arg11: memref<18x25x16xf32, #tpu.memory_space<vmem>>) attributes {dimension_semantics = [#tpu.dimension_semantics<parallel>], iteration_bounds = array<i64: 2>, scalar_prefetch = 0 : i64, scratch_operands = 1 : i64, tpu.core_type = #tpu.core_type<tc>, window_params = [{transform_indices = @transform_0, window_bounds = array<i64: 1, 16, 16, 4>}, {pipeline_mode = #tpu.pipeline_mode<synchronous>, transform_indices = @transform_1, window_bounds = array<i64: 4, 16>}, {pipeline_mode = #tpu.pipeline_mode<synchronous>, transform_indices = @transform_2, window_bounds = array<i64: 1, 16>}, {pipeline_mode = #tpu.pipeline_mode<synchronous>, transform_indices = @transform_3, window_bounds = array<i64: 9, 16>}, {pipeline_mode = #tpu.pipeline_mode<synchronous>, transform_indices = @transform_4, window_bounds = array<i64: 1, 16>}, {pipeline_mode = #tpu.pipeline_mode<synchronous>, transform_indices = @transform_5, window_bounds = array<i64: 32, 4>}, {pipeline_mode = #tpu.pipeline_mode<synchronous>, transform_indices = @transform_6, window_bounds = array<i64: 1, 4>}, {pipeline_mode = #tpu.pipeline_mode<synchronous>, transform_indices = @transform_7, window_bounds = array<i64: 9, 4>}, {pipeline_mode = #tpu.pipeline_mode<synchronous>, transform_indices = @transform_8, window_bounds = array<i64: 1, 4>}, {transform_indices = @transform_9, window_bounds = array<i64: 1, 16, 128>}]} {
    %c0 = arith.constant 0 : index
    %c0_0 = arith.constant 0 : index
    %c0_1 = arith.constant 0 : index
    %c0_2 = arith.constant 0 : index
    %0 = vector.load %arg1[%c0, %c0_0, %c0_1, %c0_2] : memref<1x16x16x4xf32, #tpu.memory_space<vmem>>, vector<1x16x16x4xf32>
    %1 = vector.shape_cast %0 : vector<1x16x16x4xf32> to vector<16x16x4xf32>
    %cst = arith.constant 0.000000e+00 : f32
    %2 = vector.broadcast %cst : f32 to vector<1x25x16xf32>
    %c0_3 = arith.constant 0 : index
    %c0_4 = arith.constant 0 : index
    %c0_5 = arith.constant 0 : index
    %3 = vector.load %arg11[%c0_3, %c0_4, %c0_5] : memref<18x25x16xf32, #tpu.memory_space<vmem>>, vector<1x25x16xf32>
    tpu.vector_store %arg11[%c0_3, %c0_4, %c0_5], %2 {strides = array<i32>} : memref<18x25x16xf32, #tpu.memory_space<vmem>>, vector<1x25x16xf32>,
    %c17 = arith.constant 17 : index
    %c0_6 = arith.constant 0 : index
    %c0_7 = arith.constant 0 : index
    %4 = vector.load %arg11[%c17, %c0_6, %c0_7] : memref<18x25x16xf32, #tpu.memory_space<vmem>>, vector<1x25x16xf32>
    tpu.vector_store %arg11[%c17, %c0_6, %c0_7], %2 {strides = array<i32>} : memref<18x25x16xf32, #tpu.memory_space<vmem>>, vector<1x25x16xf32>,
    %cst_8 = arith.constant 0.000000e+00 : f32
    %5 = vector.broadcast %cst_8 : f32 to vector<18x1x16xf32>
    %c0_9 = arith.constant 0 : index
    %c7 = arith.constant 7 : index
    %c0_10 = arith.constant 0 : index
    %6 = vector.load %arg11[%c0_9, %c7, %c0_10] : memref<18x25x16xf32, #tpu.memory_space<vmem>>, vector<18x1x16xf32>
    tpu.vector_store %arg11[%c0_9, %c7, %c0_10], %5 {strides = array<i32>} : memref<18x25x16xf32, #tpu.memory_space<vmem>>, vector<18x1x16xf32>,
    %c0_11 = arith.constant 0 : index
    %c24 = arith.constant 24 : index
    %c0_12 = arith.constant 0 : index
    %7 = vector.load %arg11[%c0_11, %c24, %c0_12] : memref<18x25x16xf32, #tpu.memory_space<vmem>>, vector<18x1x16xf32>
    tpu.vector_store %arg11[%c0_11, %c24, %c0_12], %5 {strides = array<i32>} : memref<18x25x16xf32, #tpu.memory_space<vmem>>, vector<18x1x16xf32>,
    %c0_13 = arith.constant 0 : index
    %c0_14 = arith.constant 0 : index
    %8 = vector.load %arg2[%c0_13, %c0_14] : memref<4x16xf32, #tpu.memory_space<vmem>>, vector<4x16xf32>
    %c0_15 = arith.constant 0 : index
    %c0_16 = arith.constant 0 : index
    %9 = vector.load %arg3[%c0_15, %c0_16] : memref<1x16xf32, #tpu.memory_space<vmem>>, vector<1x16xf32>
    %cst_17 = arith.constant 0.000000e+00 : f32
    %10 = vector.broadcast %cst_17 : f32 to vector<256x16xf32>
    %11 = vector.broadcast %9 : vector<1x16xf32> to vector<256x16xf32>
    %12 = arith.addf %10, %11 : vector<256x16xf32>
    %13 = vector.shape_cast %1 : vector<16x16x4xf32> to vector<256x4xf32>
    %14 = vector.extract_strided_slice %13 {offsets = [0, 0], sizes = [256, 1], strides = [1, 1]} : vector<256x4xf32> to vector<256x1xf32>
    %15 = vector.extract_strided_slice %8 {offsets = [0, 0], sizes = [1, 16], strides = [1, 1]} : vector<4x16xf32> to vector<1x16xf32>
    %16 = vector.shape_cast %15 : vector<1x16xf32> to vector<16xf32>
    %17 = vector.shape_cast %16 : vector<16xf32> to vector<1x16xf32>
    %18 = vector.broadcast %14 : vector<256x1xf32> to vector<256x16xf32>
    %19 = vector.broadcast %17 : vector<1x16xf32> to vector<256x16xf32>
    %20 = arith.mulf %18, %19 : vector<256x16xf32>
    %21 = arith.addf %12, %20 : vector<256x16xf32>
    %22 = vector.extract_strided_slice %13 {offsets = [0, 1], sizes = [256, 1], strides = [1, 1]} : vector<256x4xf32> to vector<256x1xf32>
    %23 = vector.extract_strided_slice %8 {offsets = [1, 0], sizes = [1, 16], strides = [1, 1]} : vector<4x16xf32> to vector<1x16xf32>
    %24 = vector.shape_cast %23 : vector<1x16xf32> to vector<16xf32>
    %25 = vector.shape_cast %24 : vector<16xf32> to vector<1x16xf32>
    %26 = vector.broadcast %22 : vector<256x1xf32> to vector<256x16xf32>
    %27 = vector.broadcast %25 : vector<1x16xf32> to vector<256x16xf32>
    %28 = arith.mulf %26, %27 : vector<256x16xf32>
    %29 = arith.addf %21, %28 : vector<256x16xf32>
    %30 = vector.extract_strided_slice %13 {offsets = [0, 2], sizes = [256, 1], strides = [1, 1]} : vector<256x4xf32> to vector<256x1xf32>
    %31 = vector.extract_strided_slice %8 {offsets = [2, 0], sizes = [1, 16], strides = [1, 1]} : vector<4x16xf32> to vector<1x16xf32>
    %32 = vector.shape_cast %31 : vector<1x16xf32> to vector<16xf32>
    %33 = vector.shape_cast %32 : vector<16xf32> to vector<1x16xf32>
    %34 = vector.broadcast %30 : vector<256x1xf32> to vector<256x16xf32>
    %35 = vector.broadcast %33 : vector<1x16xf32> to vector<256x16xf32>
    %36 = arith.mulf %34, %35 : vector<256x16xf32>
    %37 = arith.addf %29, %36 : vector<256x16xf32>
    %38 = vector.extract_strided_slice %13 {offsets = [0, 3], sizes = [256, 1], strides = [1, 1]} : vector<256x4xf32> to vector<256x1xf32>
    %39 = vector.extract_strided_slice %8 {offsets = [3, 0], sizes = [1, 16], strides = [1, 1]} : vector<4x16xf32> to vector<1x16xf32>
    %40 = vector.shape_cast %39 : vector<1x16xf32> to vector<16xf32>
    %41 = vector.shape_cast %40 : vector<16xf32> to vector<1x16xf32>
    %42 = vector.broadcast %38 : vector<256x1xf32> to vector<256x16xf32>
    %43 = vector.broadcast %41 : vector<1x16xf32> to vector<256x16xf32>
    %44 = arith.mulf %42, %43 : vector<256x16xf32>
    %45 = arith.addf %37, %44 : vector<256x16xf32>
    %46 = vector.shape_cast %45 : vector<256x16xf32> to vector<16x16x16xf32>
    %cst_18 = arith.constant 0.000000e+00 : f32
    %47 = vector.broadcast %cst_18 : f32 to vector<16x16x16xf32>
    %48 = arith.maximumf %46, %47 : vector<16x16x16xf32>
    %c0_19 = arith.constant 0 : index
    %c0_20 = arith.constant 0 : index
    %49 = vector.load %arg4[%c0_19, %c0_20] : memref<9x16xf32, #tpu.memory_space<vmem>>, vector<9x16xf32>
    %c0_21 = arith.constant 0 : index
    %c0_22 = arith.constant 0 : index
    %50 = vector.load %arg5[%c0_21, %c0_22] : memref<1x16xf32, #tpu.memory_space<vmem>>, vector<1x16xf32>
    %c1 = arith.constant 1 : index
    %c8 = arith.constant 8 : index
    %c0_23 = arith.constant 0 : index
    %51 = vector.load %arg11[%c1, %c8, %c0_23] : memref<18x25x16xf32, #tpu.memory_space<vmem>>, vector<16x16x16xf32>
    tpu.vector_store %arg11[%c1, %c8, %c0_23], %48 {strides = array<i32>} : memref<18x25x16xf32, #tpu.memory_space<vmem>>, vector<16x16x16xf32>,
    %cst_24 = arith.constant 0.000000e+00 : f32
    %52 = vector.broadcast %cst_24 : f32 to vector<16x16x16xf32>
    %53 = vector.shape_cast %50 : vector<1x16xf32> to vector<1x1x16xf32>
    %54 = vector.broadcast %53 : vector<1x1x16xf32> to vector<16x16x16xf32>
    %55 = arith.addf %52, %54 : vector<16x16x16xf32>
    %c0_25 = arith.constant 0 : index
    %c7_26 = arith.constant 7 : index
    %c0_27 = arith.constant 0 : index
    %56 = vector.load %arg11[%c0_25, %c7_26, %c0_27] : memref<18x25x16xf32, #tpu.memory_space<vmem>>, vector<18x16x16xf32>
    %57 = vector.extract_strided_slice %49 {offsets = [0, 0], sizes = [1, 16], strides = [1, 1]} : vector<9x16xf32> to vector<1x16xf32>
    %58 = vector.shape_cast %57 : vector<1x16xf32> to vector<16xf32>
    %59 = vector.shape_cast %58 : vector<16xf32> to vector<1x1x16xf32>
    %60 = vector.extract_strided_slice %56 {offsets = [0, 0, 0], sizes = [16, 16, 16], strides = [1, 1, 1]} : vector<18x16x16xf32> to vector<16x16x16xf32>
    %61 = vector.broadcast %59 : vector<1x1x16xf32> to vector<16x16x16xf32>
    %62 = arith.mulf %60, %61 : vector<16x16x16xf32>
    %63 = arith.addf %55, %62 : vector<16x16x16xf32>
    %64 = vector.extract_strided_slice %49 {offsets = [3, 0], sizes = [1, 16], strides = [1, 1]} : vector<9x16xf32> to vector<1x16xf32>
    %65 = vector.shape_cast %64 : vector<1x16xf32> to vector<16xf32>
    %66 = vector.shape_cast %65 : vector<16xf32> to vector<1x1x16xf32>
    %67 = vector.extract_strided_slice %56 {offsets = [1, 0, 0], sizes = [16, 16, 16], strides = [1, 1, 1]} : vector<18x16x16xf32> to vector<16x16x16xf32>
    %68 = vector.broadcast %66 : vector<1x1x16xf32> to vector<16x16x16xf32>
    %69 = arith.mulf %67, %68 : vector<16x16x16xf32>
    %70 = arith.addf %63, %69 : vector<16x16x16xf32>
    %71 = vector.extract_strided_slice %49 {offsets = [6, 0], sizes = [1, 16], strides = [1, 1]} : vector<9x16xf32> to vector<1x16xf32>
    %72 = vector.shape_cast %71 : vector<1x16xf32> to vector<16xf32>
    %73 = vector.shape_cast %72 : vector<16xf32> to vector<1x1x16xf32>
    %74 = vector.extract_strided_slice %56 {offsets = [2, 0, 0], sizes = [16, 16, 16], strides = [1, 1, 1]} : vector<18x16x16xf32> to vector<16x16x16xf32>
    %75 = vector.broadcast %73 : vector<1x1x16xf32> to vector<16x16x16xf32>
    %76 = arith.mulf %74, %75 : vector<16x16x16xf32>
    %77 = arith.addf %70, %76 : vector<16x16x16xf32>
    %c0_28 = arith.constant 0 : index
    %c8_29 = arith.constant 8 : index
    %c0_30 = arith.constant 0 : index
    %78 = vector.load %arg11[%c0_28, %c8_29, %c0_30] : memref<18x25x16xf32, #tpu.memory_space<vmem>>, vector<18x16x16xf32>
    %79 = vector.extract_strided_slice %49 {offsets = [1, 0], sizes = [1, 16], strides = [1, 1]} : vector<9x16xf32> to vector<1x16xf32>
    %80 = vector.shape_cast %79 : vector<1x16xf32> to vector<16xf32>
    %81 = vector.shape_cast %80 : vector<16xf32> to vector<1x1x16xf32>
    %82 = vector.extract_strided_slice %78 {offsets = [0, 0, 0], sizes = [16, 16, 16], strides = [1, 1, 1]} : vector<18x16x16xf32> to vector<16x16x16xf32>
    %83 = vector.broadcast %81 : vector<1x1x16xf32> to vector<16x16x16xf32>
    %84 = arith.mulf %82, %83 : vector<16x16x16xf32>
    %85 = arith.addf %77, %84 : vector<16x16x16xf32>
    %86 = vector.extract_strided_slice %49 {offsets = [4, 0], sizes = [1, 16], strides = [1, 1]} : vector<9x16xf32> to vector<1x16xf32>
    %87 = vector.shape_cast %86 : vector<1x16xf32> to vector<16xf32>
    %88 = vector.shape_cast %87 : vector<16xf32> to vector<1x1x16xf32>
    %89 = vector.extract_strided_slice %78 {offsets = [1, 0, 0], sizes = [16, 16, 16], strides = [1, 1, 1]} : vector<18x16x16xf32> to vector<16x16x16xf32>
    %90 = vector.broadcast %88 : vector<1x1x16xf32> to vector<16x16x16xf32>
    %91 = arith.mulf %89, %90 : vector<16x16x16xf32>
    %92 = arith.addf %85, %91 : vector<16x16x16xf32>
    %93 = vector.extract_strided_slice %49 {offsets = [7, 0], sizes = [1, 16], strides = [1, 1]} : vector<9x16xf32> to vector<1x16xf32>
    %94 = vector.shape_cast %93 : vector<1x16xf32> to vector<16xf32>
    %95 = vector.shape_cast %94 : vector<16xf32> to vector<1x1x16xf32>
    %96 = vector.extract_strided_slice %78 {offsets = [2, 0, 0], sizes = [16, 16, 16], strides = [1, 1, 1]} : vector<18x16x16xf32> to vector<16x16x16xf32>
    %97 = vector.broadcast %95 : vector<1x1x16xf32> to vector<16x16x16xf32>
    %98 = arith.mulf %96, %97 : vector<16x16x16xf32>
    %99 = arith.addf %92, %98 : vector<16x16x16xf32>
    %c0_31 = arith.constant 0 : index
    %c9 = arith.constant 9 : index
    %c0_32 = arith.constant 0 : index
    %100 = vector.load %arg11[%c0_31, %c9, %c0_32] : memref<18x25x16xf32, #tpu.memory_space<vmem>>, vector<18x16x16xf32>
    %101 = vector.extract_strided_slice %49 {offsets = [2, 0], sizes = [1, 16], strides = [1, 1]} : vector<9x16xf32> to vector<1x16xf32>
    %102 = vector.shape_cast %101 : vector<1x16xf32> to vector<16xf32>
    %103 = vector.shape_cast %102 : vector<16xf32> to vector<1x1x16xf32>
    %104 = vector.extract_strided_slice %100 {offsets = [0, 0, 0], sizes = [16, 16, 16], strides = [1, 1, 1]} : vector<18x16x16xf32> to vector<16x16x16xf32>
    %105 = vector.broadcast %103 : vector<1x1x16xf32> to vector<16x16x16xf32>
    %106 = arith.mulf %104, %105 : vector<16x16x16xf32>
    %107 = arith.addf %99, %106 : vector<16x16x16xf32>
    %108 = vector.extract_strided_slice %49 {offsets = [5, 0], sizes = [1, 16], strides = [1, 1]} : vector<9x16xf32> to vector<1x16xf32>
    %109 = vector.shape_cast %108 : vector<1x16xf32> to vector<16xf32>
    %110 = vector.shape_cast %109 : vector<16xf32> to vector<1x1x16xf32>
    %111 = vector.extract_strided_slice %100 {offsets = [1, 0, 0], sizes = [16, 16, 16], strides = [1, 1, 1]} : vector<18x16x16xf32> to vector<16x16x16xf32>
    %112 = vector.broadcast %110 : vector<1x1x16xf32> to vector<16x16x16xf32>
    %113 = arith.mulf %111, %112 : vector<16x16x16xf32>
    %114 = arith.addf %107, %113 : vector<16x16x16xf32>
    %115 = vector.extract_strided_slice %49 {offsets = [8, 0], sizes = [1, 16], strides = [1, 1]} : vector<9x16xf32> to vector<1x16xf32>
    %116 = vector.shape_cast %115 : vector<1x16xf32> to vector<16xf32>
    %117 = vector.shape_cast %116 : vector<16xf32> to vector<1x1x16xf32>
    %118 = vector.extract_strided_slice %100 {offsets = [2, 0, 0], sizes = [16, 16, 16], strides = [1, 1, 1]} : vector<18x16x16xf32> to vector<16x16x16xf32>
    %119 = vector.broadcast %117 : vector<1x1x16xf32> to vector<16x16x16xf32>
    %120 = arith.mulf %118, %119 : vector<16x16x16xf32>
    %121 = arith.addf %114, %120 : vector<16x16x16xf32>
    %cst_33 = arith.constant 0.000000e+00 : f32
    %122 = vector.broadcast %cst_33 : f32 to vector<16x16x16xf32>
    %123 = arith.maximumf %121, %122 : vector<16x16x16xf32>
    %c0_34 = arith.constant 0 : index
    %c0_35 = arith.constant 0 : index
    %124 = vector.load %arg6[%c0_34, %c0_35] : memref<32x4xf32, #tpu.memory_space<vmem>>, vector<32x4xf32>
    %c0_36 = arith.constant 0 : index
    %c0_37 = arith.constant 0 : index
    %125 = vector.load %arg7[%c0_36, %c0_37] : memref<1x4xf32, #tpu.memory_space<vmem>>, vector<1x4xf32>
    %cst_38 = arith.constant 0.000000e+00 : f32
    %126 = vector.broadcast %cst_38 : f32 to vector<256x4xf32>
    %127 = vector.broadcast %125 : vector<1x4xf32> to vector<256x4xf32>
    %128 = arith.addf %126, %127 : vector<256x4xf32>
    %129 = vector.shape_cast %48 : vector<16x16x16xf32> to vector<256x16xf32>
    %130 = vector.extract_strided_slice %124 {offsets = [0, 0], sizes = [16, 4], strides = [1, 1]} : vector<32x4xf32> to vector<16x4xf32>
    %cst_39 = arith.constant dense<0.000000e+00> : vector<256x4xf32>
    %131 = tpu.matmul %129, %130, %cst_39 {dimension_numbers = #tpu.dot_dimension_numbers<[1], [0], [0], [1], [0, 0, 1, 1], [], []>} : vector<256x16xf32>, vector<16x4xf32>, vector<256x4xf32> -> vector<256x4xf32>
    %132 = arith.addf %128, %131 : vector<256x4xf32>
    %133 = vector.shape_cast %123 : vector<16x16x16xf32> to vector<256x16xf32>
    %134 = vector.extract_strided_slice %124 {offsets = [16, 0], sizes = [16, 4], strides = [1, 1]} : vector<32x4xf32> to vector<16x4xf32>
    %cst_40 = arith.constant dense<0.000000e+00> : vector<256x4xf32>
    %135 = tpu.matmul %133, %134, %cst_40 {dimension_numbers = #tpu.dot_dimension_numbers<[1], [0], [0], [1], [0, 0, 1, 1], [], []>} : vector<256x16xf32>, vector<16x4xf32>, vector<256x4xf32> -> vector<256x4xf32>
    %136 = arith.addf %132, %135 : vector<256x4xf32>
    %137 = vector.shape_cast %136 : vector<256x4xf32> to vector<16x16x4xf32>
    %c0_41 = arith.constant 0 : index
    %c0_42 = arith.constant 0 : index
    %138 = vector.load %arg8[%c0_41, %c0_42] : memref<9x4xf32, #tpu.memory_space<vmem>>, vector<9x4xf32>
    %c0_43 = arith.constant 0 : index
    %c0_44 = arith.constant 0 : index
    %139 = vector.load %arg9[%c0_43, %c0_44] : memref<1x4xf32, #tpu.memory_space<vmem>>, vector<1x4xf32>
    %c1_45 = arith.constant 1 : index
    %c8_46 = arith.constant 8 : index
    %c0_47 = arith.constant 0 : index
    %140 = vector.load %arg11[%c1_45, %c8_46, %c0_47] : memref<18x25x16xf32, #tpu.memory_space<vmem>>, vector<16x16x4xf32>
    tpu.vector_store %arg11[%c1_45, %c8_46, %c0_47], %137 {strides = array<i32>} : memref<18x25x16xf32, #tpu.memory_space<vmem>>, vector<16x16x4xf32>,
    %cst_48 = arith.constant 0.000000e+00 : f32
    %141 = vector.broadcast %cst_48 : f32 to vector<16x16x4xf32>
    %142 = vector.shape_cast %139 : vector<1x4xf32> to vector<1x1x4xf32>
    %143 = vector.broadcast %142 : vector<1x1x4xf32> to vector<16x16x4xf32>
    %144 = arith.addf %141, %143 : vector<16x16x4xf32>
    %c0_49 = arith.constant 0 : index
    %c7_50 = arith.constant 7 : index
    %c0_51 = arith.constant 0 : index
    %145 = vector.load %arg11[%c0_49, %c7_50, %c0_51] : memref<18x25x16xf32, #tpu.memory_space<vmem>>, vector<18x16x4xf32>
    %146 = vector.extract_strided_slice %138 {offsets = [0, 0], sizes = [1, 4], strides = [1, 1]} : vector<9x4xf32> to vector<1x4xf32>
    %147 = vector.shape_cast %146 : vector<1x4xf32> to vector<4xf32>
    %148 = vector.shape_cast %147 : vector<4xf32> to vector<1x1x4xf32>
    %149 = vector.extract_strided_slice %145 {offsets = [0, 0, 0], sizes = [16, 16, 4], strides = [1, 1, 1]} : vector<18x16x4xf32> to vector<16x16x4xf32>
    %150 = vector.broadcast %148 : vector<1x1x4xf32> to vector<16x16x4xf32>
    %151 = arith.mulf %149, %150 : vector<16x16x4xf32>
    %152 = arith.addf %144, %151 : vector<16x16x4xf32>
    %153 = vector.extract_strided_slice %138 {offsets = [3, 0], sizes = [1, 4], strides = [1, 1]} : vector<9x4xf32> to vector<1x4xf32>
    %154 = vector.shape_cast %153 : vector<1x4xf32> to vector<4xf32>
    %155 = vector.shape_cast %154 : vector<4xf32> to vector<1x1x4xf32>
    %156 = vector.extract_strided_slice %145 {offsets = [1, 0, 0], sizes = [16, 16, 4], strides = [1, 1, 1]} : vector<18x16x4xf32> to vector<16x16x4xf32>
    %157 = vector.broadcast %155 : vector<1x1x4xf32> to vector<16x16x4xf32>
    %158 = arith.mulf %156, %157 : vector<16x16x4xf32>
    %159 = arith.addf %152, %158 : vector<16x16x4xf32>
    %160 = vector.extract_strided_slice %138 {offsets = [6, 0], sizes = [1, 4], strides = [1, 1]} : vector<9x4xf32> to vector<1x4xf32>
    %161 = vector.shape_cast %160 : vector<1x4xf32> to vector<4xf32>
    %162 = vector.shape_cast %161 : vector<4xf32> to vector<1x1x4xf32>
    %163 = vector.extract_strided_slice %145 {offsets = [2, 0, 0], sizes = [16, 16, 4], strides = [1, 1, 1]} : vector<18x16x4xf32> to vector<16x16x4xf32>
    %164 = vector.broadcast %162 : vector<1x1x4xf32> to vector<16x16x4xf32>
    %165 = arith.mulf %163, %164 : vector<16x16x4xf32>
    %166 = arith.addf %159, %165 : vector<16x16x4xf32>
    %c0_52 = arith.constant 0 : index
    %c8_53 = arith.constant 8 : index
    %c0_54 = arith.constant 0 : index
    %167 = vector.load %arg11[%c0_52, %c8_53, %c0_54] : memref<18x25x16xf32, #tpu.memory_space<vmem>>, vector<18x16x4xf32>
    %168 = vector.extract_strided_slice %138 {offsets = [1, 0], sizes = [1, 4], strides = [1, 1]} : vector<9x4xf32> to vector<1x4xf32>
    %169 = vector.shape_cast %168 : vector<1x4xf32> to vector<4xf32>
    %170 = vector.shape_cast %169 : vector<4xf32> to vector<1x1x4xf32>
    %171 = vector.extract_strided_slice %167 {offsets = [0, 0, 0], sizes = [16, 16, 4], strides = [1, 1, 1]} : vector<18x16x4xf32> to vector<16x16x4xf32>
    %172 = vector.broadcast %170 : vector<1x1x4xf32> to vector<16x16x4xf32>
    %173 = arith.mulf %171, %172 : vector<16x16x4xf32>
    %174 = arith.addf %166, %173 : vector<16x16x4xf32>
    %175 = vector.extract_strided_slice %138 {offsets = [4, 0], sizes = [1, 4], strides = [1, 1]} : vector<9x4xf32> to vector<1x4xf32>
    %176 = vector.shape_cast %175 : vector<1x4xf32> to vector<4xf32>
    %177 = vector.shape_cast %176 : vector<4xf32> to vector<1x1x4xf32>
    %178 = vector.extract_strided_slice %167 {offsets = [1, 0, 0], sizes = [16, 16, 4], strides = [1, 1, 1]} : vector<18x16x4xf32> to vector<16x16x4xf32>
    %179 = vector.broadcast %177 : vector<1x1x4xf32> to vector<16x16x4xf32>
    %180 = arith.mulf %178, %179 : vector<16x16x4xf32>
    %181 = arith.addf %174, %180 : vector<16x16x4xf32>
    %182 = vector.extract_strided_slice %138 {offsets = [7, 0], sizes = [1, 4], strides = [1, 1]} : vector<9x4xf32> to vector<1x4xf32>
    %183 = vector.shape_cast %182 : vector<1x4xf32> to vector<4xf32>
    %184 = vector.shape_cast %183 : vector<4xf32> to vector<1x1x4xf32>
    %185 = vector.extract_strided_slice %167 {offsets = [2, 0, 0], sizes = [16, 16, 4], strides = [1, 1, 1]} : vector<18x16x4xf32> to vector<16x16x4xf32>
    %186 = vector.broadcast %184 : vector<1x1x4xf32> to vector<16x16x4xf32>
    %187 = arith.mulf %185, %186 : vector<16x16x4xf32>
    %188 = arith.addf %181, %187 : vector<16x16x4xf32>
    %c0_55 = arith.constant 0 : index
    %c9_56 = arith.constant 9 : index
    %c0_57 = arith.constant 0 : index
    %189 = vector.load %arg11[%c0_55, %c9_56, %c0_57] : memref<18x25x16xf32, #tpu.memory_space<vmem>>, vector<18x16x4xf32>
    %190 = vector.extract_strided_slice %138 {offsets = [2, 0], sizes = [1, 4], strides = [1, 1]} : vector<9x4xf32> to vector<1x4xf32>
    %191 = vector.shape_cast %190 : vector<1x4xf32> to vector<4xf32>
    %192 = vector.shape_cast %191 : vector<4xf32> to vector<1x1x4xf32>
    %193 = vector.extract_strided_slice %189 {offsets = [0, 0, 0], sizes = [16, 16, 4], strides = [1, 1, 1]} : vector<18x16x4xf32> to vector<16x16x4xf32>
    %194 = vector.broadcast %192 : vector<1x1x4xf32> to vector<16x16x4xf32>
    %195 = arith.mulf %193, %194 : vector<16x16x4xf32>
    %196 = arith.addf %188, %195 : vector<16x16x4xf32>
    %197 = vector.extract_strided_slice %138 {offsets = [5, 0], sizes = [1, 4], strides = [1, 1]} : vector<9x4xf32> to vector<1x4xf32>
    %198 = vector.shape_cast %197 : vector<1x4xf32> to vector<4xf32>
    %199 = vector.shape_cast %198 : vector<4xf32> to vector<1x1x4xf32>
    %200 = vector.extract_strided_slice %189 {offsets = [1, 0, 0], sizes = [16, 16, 4], strides = [1, 1, 1]} : vector<18x16x4xf32> to vector<16x16x4xf32>
    %201 = vector.broadcast %199 : vector<1x1x4xf32> to vector<16x16x4xf32>
    %202 = arith.mulf %200, %201 : vector<16x16x4xf32>
    %203 = arith.addf %196, %202 : vector<16x16x4xf32>
    %204 = vector.extract_strided_slice %138 {offsets = [8, 0], sizes = [1, 4], strides = [1, 1]} : vector<9x4xf32> to vector<1x4xf32>
    %205 = vector.shape_cast %204 : vector<1x4xf32> to vector<4xf32>
    %206 = vector.shape_cast %205 : vector<4xf32> to vector<1x1x4xf32>
    %207 = vector.extract_strided_slice %189 {offsets = [2, 0, 0], sizes = [16, 16, 4], strides = [1, 1, 1]} : vector<18x16x4xf32> to vector<16x16x4xf32>
    %208 = vector.broadcast %206 : vector<1x1x4xf32> to vector<16x16x4xf32>
    %209 = arith.mulf %207, %208 : vector<16x16x4xf32>
    %210 = arith.addf %203, %209 : vector<16x16x4xf32>
    %211 = tpu.concatenate %137, %210 in 2 : vector<16x16x4xf32>, vector<16x16x4xf32> -> vector<16x16x8xf32>
    %212 = vector.shape_cast %211 : vector<16x16x8xf32> to vector<16x128xf32>
    %c0_58 = arith.constant 0 : index
    %c0_59 = arith.constant 0 : index
    %c0_60 = arith.constant 0 : index
    %213 = vector.load %arg10[%c0_58, %c0_59, %c0_60] : memref<1x16x128xf32, #tpu.memory_space<vmem>>, vector<1x16x128xf32>
    %214 = vector.shape_cast %213 : vector<1x16x128xf32> to vector<16x128xf32>
    %215 = vector.shape_cast %212 : vector<16x128xf32> to vector<1x16x128xf32>
    tpu.vector_store %arg10[%c0_58, %c0_59, %c0_60], %215 {strides = array<i32>} : memref<1x16x128xf32, #tpu.memory_space<vmem>>, vector<1x16x128xf32>,
    return
  }
  func.func @transform_0(%arg0: i32) -> (i32, i32, i32, i32) {
    %c0_i32 = arith.constant 0 : i32
    %c0_i32_0 = arith.constant 0 : i32
    %c0_i32_1 = arith.constant 0 : i32
    %c0_i32_2 = arith.constant 0 : i32
    return %arg0, %c0_i32, %c0_i32_0, %c0_i32_1 : i32, i32, i32, i32
  }
  func.func @transform_1(%arg0: i32) -> (i32, i32) {
    %c0_i32 = arith.constant 0 : i32
    %c0_i32_0 = arith.constant 0 : i32
    %c0_i32_1 = arith.constant 0 : i32
    return %c0_i32, %c0_i32_0 : i32, i32
  }
  func.func @transform_2(%arg0: i32) -> (i32, i32) {
    %c0_i32 = arith.constant 0 : i32
    %c0_i32_0 = arith.constant 0 : i32
    %c0_i32_1 = arith.constant 0 : i32
    return %c0_i32, %c0_i32_0 : i32, i32
  }
  func.func @transform_3(%arg0: i32) -> (i32, i32) {
    %c0_i32 = arith.constant 0 : i32
    %c0_i32_0 = arith.constant 0 : i32
    %c0_i32_1 = arith.constant 0 : i32
    return %c0_i32, %c0_i32_0 : i32, i32
  }
  func.func @transform_4(%arg0: i32) -> (i32, i32) {
    %c0_i32 = arith.constant 0 : i32
    %c0_i32_0 = arith.constant 0 : i32
    %c0_i32_1 = arith.constant 0 : i32
    return %c0_i32, %c0_i32_0 : i32, i32
  }
  func.func @transform_5(%arg0: i32) -> (i32, i32) {
    %c0_i32 = arith.constant 0 : i32
    %c0_i32_0 = arith.constant 0 : i32
    %c0_i32_1 = arith.constant 0 : i32
    return %c0_i32, %c0_i32_0 : i32, i32
  }
  func.func @transform_6(%arg0: i32) -> (i32, i32) {
    %c0_i32 = arith.constant 0 : i32
    %c0_i32_0 = arith.constant 0 : i32
    %c0_i32_1 = arith.constant 0 : i32
    return %c0_i32, %c0_i32_0 : i32, i32
  }
  func.func @transform_7(%arg0: i32) -> (i32, i32) {
    %c0_i32 = arith.constant 0 : i32
    %c0_i32_0 = arith.constant 0 : i32
    %c0_i32_1 = arith.constant 0 : i32
    return %c0_i32, %c0_i32_0 : i32, i32
  }
  func.func @transform_8(%arg0: i32) -> (i32, i32) {
    %c0_i32 = arith.constant 0 : i32
    %c0_i32_0 = arith.constant 0 : i32
    %c0_i32_1 = arith.constant 0 : i32
    return %c0_i32, %c0_i32_0 : i32, i32
  }
  func.func @transform_9(%arg0: i32) -> (i32, i32, i32) {
    %c0_i32 = arith.constant 0 : i32
    %c0_i32_0 = arith.constant 0 : i32
    %c0_i32_1 = arith.constant 0 : i32
    return %arg0, %c0_i32, %c0_i32_0 : i32, i32, i32
  }
}

</mosaic_0001>

<bundles_post_ra>
// kernel: _lambda_.1
= control target key start
LH: loop header
LB: loop body
LE: loop exit
PB: predicated region body
PF: predicated region fallthrough
CT: control target
= control target key end

     0   :  { %s4906_s30 = smov 0   ;;  %s8141_s0 = inlined_call_operand.vmem [shape: f32[2,16,16,4], index: 0, kind: input, shape index: {}]   ;;  %s8142_s1 = inlined_call_operand.vmem [shape: f32[4,16], index: 1, kind: input, shape index: {}]   ;;  %s8143_s2 = inlined_call_operand.vmem [shape: f32[1,16], index: 2, kind: input, shape index: {}]   ;;  %s8144_s3 = inlined_call_operand.vmem [shape: f32[9,16], index: 3, kind: input, shape index: {}]   ;;  %s8145_s4 = inlined_call_operand.vmem [shape: f32[1,16], index: 4, kind: input, shape index: {}]   ;;  %s8146_s5 = inlined_call_operand.vmem [shape: f32[32,4], index: 5, kind: input, shape index: {}]   ;;  %s8147_s6 = inlined_call_operand.vmem [shape: f32[1,4], index: 6, kind: input, shape index: {}]   ;;  %s8148_s7 = inlined_call_operand.vmem [shape: f32[9,4], index: 7, kind: input, shape index: {}]   ;;  %s8149_s8 = inlined_call_operand.vmem [shape: f32[1,4], index: 8, kind: input, shape index: {}]   ;;  %s8150_s9 = inlined_call_operand.vmem [shape: f32[2,16,128], index: 9, kind: output, shape index: {}]  }
   0x1 LB: > { %s4470_s10 = sadd.s32 4294967295, %s4831_s30   ;;  %p4474_p0 = scmp.ge.s32.totalorder %s4831_s30, 1  ;;  %s4831_s30 = sphi %s4906_s30, %s19_s30  }
   0x2   : > { %p287_p1 = scmp.lt.s32.totalorder %s4831_s30, 3 }
   0x4   : > { %p288_p2 = pnand %p4474_p0, %p287_p1 }
   0x6   : > { %291 = sbr.rel (%p288_p2) target bundleno = 1077 (0x435), region = 56 }
   0xb   : > { %p323_p3 = scmp.lt.s32.totalorder %s4470_s10, 1  ;;  %v8153_v0 = vmov 2   ;;  %v8151_v1 = vmov 0   ;;  %v8157_v7 = vmov 3   ;;  %v8155_v19 = vmov 1   ;;  %v2065_v41 = vld [vmem:[%s8146_s5 + $0x8] sm:$0xff] }
   0xc   : > { %4758 = vset.pattern.permute.xlu0 %v8153_v0  ;;  %4756 = vset.pattern.permute.xlu1 %v8151_v1  ;;  %vm365_vm0 = vcmask 130048   ;;  %vm369_vm1 = vcmask 122880   ;;  %v4837_v22 = vmov 0.0   ;;  %v2064_v43 = vld [vmem:[%s8146_s5] sm:$0xff]  ;;  %v2067_v57 = vld [vmem:[%s8146_s5 + $0x18] sm:$0xff]  ;;  %v2066_v59 = vld [vmem:[%s8146_s5 + $0x10] sm:$0xff]  ;;  %v581_v63 = vlaneseq }
   0xd   : > { %s8433_s10 = smov (!%p323_p3, %s4470_s10), 1  ;;  %366 = vst.msk [vmem:[#allocation2] sm:$0xff] %vm365_vm0, %v4837_v22  ;;  %367 = vst.msk [vmem:[#allocation2 + $0x8] sm:$0xff] %vm365_vm0, %v4837_v22  ;;  %4621 = vmatprep.subr.mxu0 %v2065_v41  ;;  %4673 = vmatprep.subr.mxu1 %v2067_v57  ;;  %vm2785_vm2 = vcmask 31744   ;;  %s4838_s16 = smov 4   ;;  %vm4369_vm3 = vcmask 64512  }
   0xe   : > { %s4551_s11 = sshll.u32 %s8433_s10, 8  ;;  %368 = vst.msk [vmem:[#allocation2 + $0x10] sm:$0xff] %vm365_vm0, %v4837_v22  ;;  %372 = vst.msk [vmem:[#allocation2 + $0x220] sm:$0xff] %vm365_vm0, %v4837_v22  ;;  %4622 = vmatpush3.msra.mxu0 %v2065_v41  ;;  %4674 = vmatpush3.msra.mxu1 %v2067_v57  ;;  %v5264_v57 = vld [vmem:[%s8143_s2] ss:$0 sm:$0xff]  ;;  %s4841_s22 = smov 8  }
   0xf   : > { %s4922_s14 = scalar_lea.vmem %s8141_s0, %s4551_s11  ;;  %377 = vst.msk [vmem:[#allocation2 + $0x27] sm:$0x1] %vm369_vm1, %v4837_v22  ;;  %378 = vst.msk [vmem:[#allocation2 + $0x47] sm:$0x1] %vm369_vm1, %v4837_v22  ;;  %4623 = vmatprep.subr.mxu0 %v2064_v43  ;;  %4675 = vmatprep.subr.mxu1 %v2066_v59  ;;  %s4842_s23 = smov 16   ;;  %vm4374_vm4 = vcmask 195584  }
  0x10   : > { %v4925_v2 = vld [vmem:[%s4922_s14 + $0x10] sm:$0xff]  ;;  %v4928_v3 = vld [vmem:[%s4922_s14] sm:$0xff]  ;;  %v336_v4 = vld [vmem:[%s4922_s14 + $0x18] sm:$0xff]  ;;  %370 = vst.msk [vmem:[#allocation2 + $0x18] sm:$0x1] %vm369_vm1, %v4837_v22  ;;  %4624 = vmatpush3.msra.mxu0 %v2064_v43  ;;  %4676 = vmatpush3.msra.mxu1 %v2066_v59  ;;  %s4843_s24 = smov 24  }
  0x11   : > { %433 = vperm.xlu1 %4756, %v4925_v2   ;;  %846 = vperm.xlu0 %4758, %v4928_v3   ;;  %v4935_v5 = vld [vmem:[%s4922_s14 + $0x28] sm:$0xff]  ;;  %v4939_v6 = vld [vmem:[%s4922_s14 + $0x38] sm:$0xff]  ;;  %v4997_v20 = vld [vmem:[%s4922_s14 + $0xd0] sm:$0xff]  ;;  %373 = vst.msk [vmem:[#allocation2 + $0x228] sm:$0xff] %vm365_vm0, %v4837_v22  ;;  %s4844_s25 = smov 32   ;;  %s4845_s26 = smov 40  }
  0x12   : > { %v4944_v8 = vld [vmem:[%s4922_s14 + $0x48] sm:$0xff]  ;;  %v4949_v9 = vld [vmem:[%s4922_s14 + $0x58] sm:$0xff]  ;;  %v5007_v21 = vld [vmem:[%s4922_s14 + $0x20] sm:$0xff]  ;;  %374 = vst.msk [vmem:[#allocation2 + $0x230] sm:$0xff] %vm365_vm0, %v4837_v22  ;;  %s4846_s27 = smov 48   ;;  %s4847_s28 = smov 56  }
  0x13   : > { %v4954_v10 = vld [vmem:[%s4922_s14 + $0x68] sm:$0xff]  ;;  %v4959_v11 = vld [vmem:[%s4922_s14 + $0x78] sm:$0xff]  ;;  %375 = vst.msk [vmem:[#allocation2 + $0x238] sm:$0x1] %vm369_vm1, %v4837_v22  ;;  %379 = vst.msk [vmem:[#allocation2 + $0x67] sm:$0x1] %vm369_vm1, %v4837_v22 }
  0x14   : > { %v4964_v12 = vld [vmem:[%s4922_s14 + $0x88] sm:$0xff]  ;;  %v4969_v13 = vld [vmem:[%s4922_s14 + $0x98] sm:$0xff]  ;;  %380 = vst.msk [vmem:[#allocation2 + $0x87] sm:$0x1] %vm369_vm1, %v4837_v22  ;;  %381 = vst.msk [vmem:[#allocation2 + $0xa7] sm:$0x1] %vm369_vm1, %v4837_v22 }
  0x15   : > { %438 = vperm.xlu1 %4756, %v336_v4   ;;  %854 = vperm.xlu0 %4758, %v4925_v2   ;;  %v4974_v14 = vld [vmem:[%s4922_s14 + $0xa8] sm:$0xff]  ;;  %v4979_v15 = vld [vmem:[%s4922_s14 + $0xb8] sm:$0xff]  ;;  %382 = vst.msk [vmem:[#allocation2 + $0xc7] sm:$0x1] %vm369_vm1, %v4837_v22  ;;  %383 = vst.msk [vmem:[#allocation2 + $0xe7] sm:$0x1] %vm369_vm1, %v4837_v22 }
  0x16   : > { %v4984_v16 = vld [vmem:[%s4922_s14 + $0xc8] sm:$0xff]  ;;  %v360_v17 = vld [vmem:[%s4922_s14 + $0xd8] sm:$0xff]  ;;  %384 = vst.msk [vmem:[#allocation2 + $0x107] sm:$0x1] %vm369_vm1, %v4837_v22  ;;  %385 = vst.msk [vmem:[#allocation2 + $0x127] sm:$0x1] %vm369_vm1, %v4837_v22 }
  0x17   : > { %v4991_v18 = vld [vmem:[%s4922_s14 + $0x8] sm:$0xff]  ;;  %386 = vst.msk [vmem:[#allocation2 + $0x147] sm:$0x1] %vm369_vm1, %v4837_v22  ;;  %387 = vst.msk [vmem:[#allocation2 + $0x167] sm:$0x1] %vm369_vm1, %v4837_v22  ;;  %v5057_v23 = vld [vmem:[%s4922_s14 + $0x30] sm:$0xff] }
  0x18   : > { %388 = vst.msk [vmem:[#allocation2 + $0x187] sm:$0x1] %vm369_vm1, %v4837_v22  ;;  %389 = vst.msk [vmem:[#allocation2 + $0x1a7] sm:$0x1] %vm369_vm1, %v4837_v22  ;;  %v5062_v24 = vld [vmem:[%s4922_s14 + $0x40] sm:$0xff]  ;;  %v5067_v25 = vld [vmem:[%s4922_s14 + $0x50] sm:$0xff] }
  0x19   : > { %448 = vperm.xlu1 %4756, %v4935_v5   ;;  %858 = vperm.xlu0 %4758, %v336_v4   ;;  %390 = vst.msk [vmem:[#allocation2 + $0x1c7] sm:$0x1] %vm369_vm1, %v4837_v22  ;;  %391 = vst.msk [vmem:[#allocation2 + $0x1e7] sm:$0x1] %vm369_vm1, %v4837_v22  ;;  %v5072_v26 = vld [vmem:[%s4922_s14 + $0x60] sm:$0xff]  ;;  %v5077_v27 = vld [vmem:[%s4922_s14 + $0x70] sm:$0xff] }
  0x1a   : > { %392 = vst.msk [vmem:[#allocation2 + $0x207] sm:$0x1] %vm369_vm1, %v4837_v22  ;;  %395 = vst.msk [vmem:[#allocation2 + $0x38] sm:$0x1] %vm369_vm1, %v4837_v22  ;;  %v5083_v28 = vld [vmem:[%s4922_s14 + $0x80] sm:$0xff]  ;;  %v5088_v29 = vld [vmem:[%s4922_s14 + $0x90] sm:$0xff] }
  0x1b   : > { %396 = vst.msk [vmem:[#allocation2 + $0x58] sm:$0x1] %vm369_vm1, %v4837_v22  ;;  %397 = vst.msk [vmem:[#allocation2 + $0x78] sm:$0x1] %vm369_vm1, %v4837_v22  ;;  %v5094_v30 = vld [vmem:[%s4922_s14 + $0xa0] sm:$0xff]  ;;  %v5100_v31 = vld [vmem:[%s4922_s14 + $0xb0] sm:$0xff] }
  0x1c   : > { %398 = vst.msk [vmem:[#allocation2 + $0x98] sm:$0x1] %vm369_vm1, %v4837_v22  ;;  %399 = vst.msk [vmem:[#allocation2 + $0xb8] sm:$0x1] %vm369_vm1, %v4837_v22  ;;  %v5105_v32 = vld [vmem:[%s4922_s14 + $0xc0] sm:$0xff]  ;;  %v5112_v33 = vld [vmem:[%s4922_s14 + $0xe8] sm:$0xff] }
  0x1d   : > { %458 = vperm.xlu1 %4756, %v4939_v6   ;;  %4762 = vset.pattern.permute.xlu0 %v8157_v7  ;;  %400 = vst.msk [vmem:[#allocation2 + $0xd8] sm:$0x1] %vm369_vm1, %v4837_v22  ;;  %401 = vst.msk [vmem:[#allocation2 + $0xf8] sm:$0x1] %vm369_vm1, %v4837_v22  ;;  %v363_v36 = vld [vmem:[%s4922_s14 + $0xf0] sm:$0xff]  ;;  %s4848_s29 = smov 64  }
  0x1e   : > { %1054 = vperm.xlu0 %4762, %v336_v4   ;;  %402 = vst.msk [vmem:[#allocation2 + $0x118] sm:$0x1] %vm369_vm1, %v4837_v22  ;;  %403 = vst.msk [vmem:[#allocation2 + $0x138] sm:$0x1] %vm369_vm1, %v4837_v22  ;;  %s4849_s11 = smov 72   ;;  %s4850_s12 = smov 80  }
  0x1f   : > { %404 = vst.msk [vmem:[#allocation2 + $0x158] sm:$0x1] %vm369_vm1, %v4837_v22  ;;  %405 = vst.msk [vmem:[#allocation2 + $0x178] sm:$0x1] %vm369_vm1, %v4837_v22  ;;  %s4851_s13 = smov 88   ;;  %s4852_s15 = smov 96  }
  0x20   : > { %406 = vst.msk [vmem:[#allocation2 + $0x198] sm:$0x1] %vm369_vm1, %v4837_v22  ;;  %407 = vst.msk [vmem:[#allocation2 + $0x1b8] sm:$0x1] %vm369_vm1, %v4837_v22  ;;  %s4855_s17 = smov 120   ;;  %vm4377_vm5 = vcmask 261120  }
  0x21   : > { %468 = vperm.xlu1 %4756, %v4944_v8   ;;  %408 = vst.msk [vmem:[#allocation2 + $0x1d8] sm:$0x1] %vm369_vm1, %v4837_v22  ;;  %409 = vst.msk [vmem:[#allocation2 + $0x1f8] sm:$0x1] %vm369_vm1, %v4837_v22  ;;  %vm4380_vm6 = vcmask 326656   ;;  %vm4383_vm7 = vcmask 392192  }
  0x22   : > { %1062 = vperm.xlu0 %4762, %v4935_v5   ;;  %410 = vst.msk [vmem:[#allocation2 + $0x218] sm:$0x1] %vm369_vm1, %v4837_v22  ;;  %376 = vst.msk [vmem:[#allocation2 + $0x7] sm:$0x1] %vm369_vm1, %v4837_v22  ;;  %vm4386_vm8 = vcmask 457728   ;;  %vm4389_vm9 = vcmask 523264  }
  0x23   : > { %394 = vst.msk [vmem:[#allocation2 + $0x18] sm:$0x1] %vm369_vm1, %v4837_v22  ;;  %393 = vst.msk [vmem:[#allocation2 + $0x227] sm:$0x1] %vm369_vm1, %v4837_v22  ;;  %vm4392_vm10 = vcmask 588800   ;;  %vm4395_vm11 = vcmask 654336  }
  0x24   : > { %411 = vst.msk [vmem:[#allocation2 + $0x238] sm:$0x1] %vm369_vm1, %v4837_v22  ;;  %8218 = vst [vmem:[#allocation3_spill] sm:$0xff] %v5105_v32  ;;  %vm4398_vm12 = vcmask 719872   ;;  %vm4401_vm13 = vcmask 785408   ;;  %vm4404_vm14 = vcmask 850944  }
  0x25   : > { %478 = vperm.xlu1 %4756, %v4949_v9   ;;  %s4552_s18 = sshll.u32 %s8433_s10, 4  ;;  %vm4407_vm15 = vcmask 916480   ;;  %vm4410_vm1 = vcmask 982016  }
  0x26   : > { %1070 = vperm.xlu0 %4762, %v4939_v6   ;;  %s8113_s21 = scalar_lea.vmem %s8150_s9, %s4552_s18 }
  0x29   : > { %488 = vperm.xlu1 %4756, %v4954_v10  }
  0x2a   : > { %1078 = vperm.xlu0 %4762, %v4944_v8  }
  0x2d   : > { %498 = vperm.xlu1 %4756, %v4959_v11  }
  0x2e   : > { %1086 = vperm.xlu0 %4762, %v4949_v9  }
  0x31   : > { %508 = vperm.xlu1 %4756, %v4964_v12  }
  0x32   : > { %1094 = vperm.xlu0 %4762, %v4954_v10  }
  0x35   : > { %518 = vperm.xlu1 %4756, %v4969_v13  }
  0x36   : > { %1102 = vperm.xlu0 %4762, %v4959_v11  }
  0x39   : > { %528 = vperm.xlu1 %4756, %v4974_v14  }
  0x3a   : > { %1110 = vperm.xlu0 %4762, %v4964_v12  }
  0x3d   : > { %538 = vperm.xlu1 %4756, %v4979_v15  }
  0x3e   : > { %1118 = vperm.xlu0 %4762, %v4969_v13  }
  0x41   : > { %548 = vperm.xlu1 %4756, %v4984_v16  }
  0x42   : > { %1126 = vperm.xlu0 %4762, %v4974_v14  }
  0x45   : > { %558 = vperm.xlu1 %4756, %v360_v17  }
  0x46   : > { %1134 = vperm.xlu0 %4762, %v4979_v15  }
  0x49   : > { %4757 = vset.pattern.permute.xlu1 %v8155_v19 }
  0x4a   : > { %654 = vperm.xlu1 %4757, %v4991_v18   ;;  %1142 = vperm.xlu0 %4762, %v4984_v16  }
  0x4e   : > { %658 = vperm.xlu1 %4757, %v4925_v2   ;;  %1146 = vperm.xlu0 %4762, %v4997_v20  }
  0x52   : > { %662 = vperm.xlu1 %4757, %v336_v4   ;;  %4799 = vset.pattern.permute.xlu0 %v8151_v1  ;;  %v5213_v4 = vshrl.u32 %v581_v63, 7 }
  0x53   : > { %423 = vperm.xlu0 %4799, %v4928_v3  }
  0x54   : > { %8227 = vst [vmem:[#allocation12_spill] sm:$0xff] %v5213_v4  ;;  %v5237_v22 = vsub.s32 2, %v5213_v4 }
  0x56   : > { %4759 = vset.pattern.permute.xlu1 %v8153_v0  ;;  %8233 = vst [vmem:[#allocation18_spill] sm:$0xff] %v5237_v22 }
  0x57   : > { %850 = vperm.xlu1 %4759, %v4991_v18   ;;  %428 = vperm.xlu0 %4799, %v4991_v18  }
  0x5b   : > { %4760 = vset.pattern.permute.xlu1 %v8157_v7  ;;  %443 = vperm.xlu0 %4799, %v5007_v21  }
  0x5c   : > { %1042 = vperm.xlu1 %4760, %v4928_v3  }
  0x5f   : > { %453 = vperm.xlu0 %4799, %v5057_v23  }
  0x60   : > { %1046 = vperm.xlu1 %4760, %v4991_v18   ;;  %v364_v18 = vld [vmem:[%s4922_s14 + $0xf8] sm:$0xff] }
  0x63   : > { %463 = vperm.xlu0 %4799, %v5062_v24  }
  0x64   : > { %1050 = vperm.xlu1 %4760, %v4925_v2  }
  0x67   : > { %473 = vperm.xlu0 %4799, %v5067_v25  }
  0x68   : > { %4761 = vset.pattern.permute.xlu1 %v8155_v19 }
  0x69   : > { %670 = vperm.xlu1 %4761, %v4935_v5  }
  0x6b   : > { %483 = vperm.xlu0 %4799, %v5072_v26  }
  0x6d   : > { %4763 = vset.pattern.permute.xlu1 %v8153_v0 }
  0x6e   : > { %862 = vperm.xlu1 %4763, %v5007_v21  }
  0x6f   : > { %493 = vperm.xlu0 %4799, %v5077_v27  }
  0x72   : > { %866 = vperm.xlu1 %4763, %v4935_v5  }
  0x73   : > { %503 = vperm.xlu0 %4799, %v5083_v28  }
  0x76   : > { %4764 = vset.pattern.permute.xlu1 %v8157_v7 }
  0x77   : > { %1058 = vperm.xlu1 %4764, %v5007_v21   ;;  %513 = vperm.xlu0 %4799, %v5088_v29  }
  0x7b   : > { %4765 = vset.pattern.permute.xlu1 %v8155_v19  ;;  %523 = vperm.xlu0 %4799, %v5094_v30  }
  0x7c   : > { %678 = vperm.xlu1 %4765, %v4939_v6  }
  0x7f   : > { %533 = vperm.xlu0 %4799, %v5100_v31  }
  0x80   : > { %4766 = vset.pattern.permute.xlu1 %v8153_v0 }
  0x81   : > { %870 = vperm.xlu1 %4766, %v5057_v23  }
  0x83   : > { %543 = vperm.xlu0 %4799, %v5105_v32  }
  0x85   : > { %874 = vperm.xlu1 %4766, %v4939_v6  }
  0x87   : > { %553 = vperm.xlu0 %4799, %v4997_v20  }
  0x89   : > { %4767 = vset.pattern.permute.xlu1 %v8157_v7 }
  0x8a   : > { %1066 = vperm.xlu1 %4767, %v5057_v23  }
  0x8b   : > { %568 = vperm.xlu0 %4799, %v5112_v33  }
  0x8c   : > { %v5117_v34 = vpop.permute.xlu1 %433  ;;  %v5119_v35 = vpop.permute.xlu0 %846 }
  0x8e   : > { %4768 = vset.pattern.permute.xlu1 %v8155_v19 }
  0x8f   : > { %686 = vperm.xlu1 %4768, %v4944_v8   ;;  %573 = vperm.xlu0 %4799, %v363_v36  }
  0x90   : > { %v5124_v37 = vpop.permute.xlu1 %438  ;;  %v5126_v38 = vpop.permute.xlu0 %854 }
  0x93   : > { %4769 = vset.pattern.permute.xlu1 %v8153_v0  ;;  %4801 = vset.pattern.permute.xlu0 %v8155_v19 }
  0x94   : > { %v5130_v39 = vpop.permute.xlu1 %448  ;;  %878 = vperm.xlu1 %4769, %v5062_v24   ;;  %650 = vperm.xlu0 %4801, %v4928_v3   ;;  %v5134_v40 = vpop.permute.xlu0 %858 }
  0x98   : > { %v5139_v42 = vpop.permute.xlu1 %458  ;;  %882 = vperm.xlu1 %4769, %v4944_v8   ;;  %666 = vperm.xlu0 %4801, %v5007_v21   ;;  %v5223_v8 = vsub.s32 0, %v5213_v4 }
  0x99   : > { %v5146_v44 = vpop.permute.xlu0 %1054 }
  0x9a   : > { %8230 = vst [vmem:[#allocation15_spill] sm:$0xff] %v5223_v8 }
  0x9c   : > { %v5148_v45 = vpop.permute.xlu1 %468  ;;  %4770 = vset.pattern.permute.xlu1 %v8157_v7  ;;  %674 = vperm.xlu0 %4801, %v5057_v23   ;;  %v5240_v23 = vsub.s32 3, %v5213_v4 }
  0x9d   : > { %1074 = vperm.xlu1 %4770, %v5062_v24   ;;  %v5153_v46 = vpop.permute.xlu0 %1062 }
  0x9e   : > { %8234 = vst [vmem:[#allocation19_spill] sm:$0xff] %v5240_v23 }
  0xa0   : > { %v5155_v47 = vpop.permute.xlu1 %478  ;;  %682 = vperm.xlu0 %4801, %v5062_v24  }
  0xa1   : > { %4771 = vset.pattern.permute.xlu1 %v8155_v19  ;;  %v5159_v48 = vpop.permute.xlu0 %1070 }
  0xa2   : > { %694 = vperm.xlu1 %4771, %v4949_v9  }
  0xa4   : > { %v5162_v49 = vpop.permute.xlu1 %488  ;;  %690 = vperm.xlu0 %4801, %v5067_v25  }
  0xa5   : > { %v5165_v50 = vpop.permute.xlu0 %1078 }
  0xa6   : > { %4772 = vset.pattern.permute.xlu1 %v8153_v0 }
  0xa7   : > { %886 = vperm.xlu1 %4772, %v5067_v25  }
  0xa8   : > { %v5169_v51 = vpop.permute.xlu1 %498  ;;  %698 = vperm.xlu0 %4801, %v5072_v26  }
  0xa9   : > { %v5172_v52 = vpop.permute.xlu0 %1086 }
  0xab   : > { %890 = vperm.xlu1 %4772, %v4949_v9   ;;  %v412_v9 = vld [vmem:[%s8142_s1] sm:$0xf] }
  0xac   : > { %v5175_v53 = vpop.permute.xlu1 %508  ;;  %706 = vperm.xlu0 %4801, %v5077_v27   ;;  %v5234_v21 = vrot.slane %v412_v9, %v5223_v8  ;;  %v5251_v36 = vrot.slane %v412_v9, %v5237_v22  ;;  %v5254_v41 = vrot.slane %v412_v9, %v5240_v23 }
  0xad   : > { %8219 = vst [vmem:[#allocation4_spill] sm:$0xff] %v5175_v53  ;;  %v5178_v54 = vpop.permute.xlu0 %1094 }
  0xae   : > { %8232 = vst [vmem:[#allocation17_spill] sm:$0xff] %v5234_v21  ;;  %v980_v63 = vmul.f32 %v5251_v36, %v5134_v40 }
  0xaf   : > { %4773 = vset.pattern.permute.xlu1 %v8157_v7 }
  0xb0   : > { %v5181_v55 = vpop.permute.xlu1 %518  ;;  %1082 = vperm.xlu1 %4773, %v5067_v25   ;;  %714 = vperm.xlu0 %4801, %v5083_v28  }
  0xb1   : > { %8220 = vst [vmem:[#allocation5_spill] sm:$0xff] %v5181_v55  ;;  %v5185_v56 = vpop.permute.xlu0 %1102  ;;  %v1553_v55 = vld [vmem:[#allocation2 + $0x10] sm:$0xff] }
  0xb4   : > { %v5190_v58 = vpop.permute.xlu1 %528  ;;  %4774 = vset.pattern.permute.xlu1 %v8155_v19  ;;  %722 = vperm.xlu0 %4801, %v5088_v29  }
  0xb5   : > { %8221 = vst [vmem:[#allocation6_spill] sm:$0xff] %v5190_v58  ;;  %702 = vperm.xlu1 %4774, %v4954_v10   ;;  %v5198_v60 = vpop.permute.xlu0 %1110 }
  0xb6   : > { %8222 = vst [vmem:[#allocation7_spill] sm:$0xff] %v5198_v60  ;;  %v1793_v60 = vld [vmem:[#allocation2 + $0x11] sm:$0xff] }
  0xb8   : > { %v5200_v61 = vpop.permute.xlu1 %538  ;;  %730 = vperm.xlu0 %4801, %v5094_v30  }
  0xb9   : > { %8223 = vst [vmem:[#allocation8_spill] sm:$0xff] %v5200_v61  ;;  %4775 = vset.pattern.permute.xlu1 %v8153_v0  ;;  %v5204_v62 = vpop.permute.xlu0 %1118 }
  0xba   : > { %8224 = vst [vmem:[#allocation9_spill] sm:$0xff] %v5204_v62  ;;  %894 = vperm.xlu1 %4775, %v5072_v26  }
  0xbc   : > { %v5207_v2 = vpop.permute.xlu1 %548  ;;  %738 = vperm.xlu0 %4801, %v5100_v31  }
  0xbd   : > { %8225 = vst [vmem:[#allocation10_spill] sm:$0xff] %v5207_v2  ;;  %v5210_v3 = vpop.permute.xlu0 %1126 }
  0xbe   : > { %8226 = vst [vmem:[#allocation11_spill] sm:$0xff] %v5210_v3  ;;  %898 = vperm.xlu1 %4775, %v4954_v10  }
  0xc0   : > { %v5215_v5 = vpop.permute.xlu1 %558  ;;  %746 = vperm.xlu0 %4801, %v5105_v32  }
  0xc1   : > { %8228 = vst [vmem:[#allocation13_spill] sm:$0xff] %v5215_v5  ;;  %v5218_v6 = vpop.permute.xlu0 %1134 }
  0xc2   : > { %8229 = vst [vmem:[#allocation14_spill] sm:$0xff] %v5218_v6  ;;  %4776 = vset.pattern.permute.xlu1 %v8157_v7 }
  0xc3   : > { %1090 = vperm.xlu1 %4776, %v5072_v26   ;;  %v588_v26 = vmul.f32 %v5234_v21, %v5124_v37 }
  0xc4   : > { %754 = vperm.xlu0 %4801, %v4997_v20   ;;  %v5243_v20 = vsub.s32 1, %v5213_v4 }
  0xc5   : > { %v655_v10 = vpop.permute.xlu1 %654  ;;  %v5229_v17 = vpop.permute.xlu0 %1142  ;;  %v620_v37 = vadd.f32 %v5264_v57, %v588_v26 }
  0xc6   : > { %8231 = vst [vmem:[#allocation16_spill] sm:$0xff] %v5229_v17  ;;  %8235 = vst [vmem:[#allocation20_spill] sm:$0xff] %v5243_v20  ;;  %v5257_v43 = vrot.slane %v412_v9, %v5243_v20  ;;  %v8237_v17 = vmov 3  }
  0xc7   : > { %4777 = vset.pattern.permute.xlu1 %v8155_v19 }
  0xc8   : > { %710 = vperm.xlu1 %4777, %v4959_v11   ;;  %774 = vperm.xlu0 %4801, %v364_v18  }
  0xc9   : > { %v659_v24 = vpop.permute.xlu1 %658  ;;  %v5246_v25 = vpop.permute.xlu0 %1146 }
  0xca   : > { %8236 = vst [vmem:[#allocation21_spill] sm:$0xff] %v5246_v25 }
  0xcc   : > { %4778 = vset.pattern.permute.xlu1 %v8153_v0  ;;  %4806 = vset.pattern.permute.xlu0 %v8153_v0  ;;  %v1176_v0 = vmul.f32 %v5254_v41, %v5146_v44  ;;  %v587_v44 = vmul.f32 %v5234_v21, %v5117_v34 }
  0xcd   : > { %v663_v59 = vpop.permute.xlu1 %662  ;;  %902 = vperm.xlu1 %4778, %v5077_v27   ;;  %962 = vperm.xlu0 %4806, %v5112_v33  }
  0xce   : > { %v784_v9 = vmul.f32 %v5257_v43, %v663_v59  ;;  %v5272_v1 = vpop.permute.xlu0 %423  ;;  %v782_v59 = vmul.f32 %v5257_v43, %v655_v10  ;;  %v8238_v10 = vmov 1  }
  0xd0   : > { %v816_v19 = vadd.f32 %v784_v9, %v620_v37 }
  0xd1   : > { %906 = vperm.xlu1 %4778, %v4959_v11   ;;  %970 = vperm.xlu0 %4806, %v364_v18  }
  0xd2   : > { %v1012_v7 = vadd.f32 %v980_v63, %v816_v19  ;;  %v851_v5 = vpop.permute.xlu1 %850  ;;  %v429_v25 = vpop.permute.xlu0 %428  ;;  %v979_v63 = vmul.f32 %v5251_v36, %v5126_v38 }
  0xd3   : > { %v586_v33 = vmul.f32 %v5234_v21, %v429_v25  ;;  %v619_v25 = vadd.f32 %v5264_v57, %v587_v44  ;;  %v978_v34 = vmul.f32 %v5251_v36, %v851_v5  ;;  %v8239_v44 = vmov 2  }
  0xd4   : > { %v5278_v26 = vadd.f32 %v1176_v0, %v1012_v7  ;;  %v783_v0 = vmul.f32 %v5257_v43, %v659_v24 }
  0xd5   : > { %v618_v40 = vadd.f32 %v5264_v57, %v586_v33  ;;  %4779 = vset.pattern.permute.xlu1 %v8237_v17  ;;  %4809 = vset.pattern.permute.xlu0 %v8237_v17 }
  0xd6   : > { %1098 = vperm.xlu1 %4779, %v5077_v27   ;;  %v5287_v11 = vpop.permute.xlu0 %443  ;;  %v8159_v19 = vmax.f32 %v5278_v26, 0.0  ;;  %v815_v24 = vadd.f32 %v783_v0, %v619_v25 }
  0xd7   : > { %v5290_v18 = vpop.permute.xlu1 %1042  ;;  %v814_v7 = vadd.f32 %v782_v59, %v618_v40 }
  0xd8   : > { %1276 = vst.msk [vmem:[#allocation2 + $0x50] sm:$0xff] %vm365_vm0, %v8159_v19  ;;  %v1011_v2 = vadd.f32 %v979_v63, %v815_v24 }
  0xd9   : > { %v1010_v9 = vadd.f32 %v978_v34, %v814_v7 }
  0xda   : > { %4780 = vset.pattern.permute.xlu1 %v8238_v10  ;;  %v5299_v27 = vpop.permute.xlu0 %453 }
  0xdb   : > { %718 = vperm.xlu1 %4780, %v4964_v12   ;;  %v1047_v37 = vpop.permute.xlu1 %1046 }
  0xdc   : > { %v1174_v33 = vmul.f32 %v5254_v41, %v1047_v37  ;;  %v590_v37 = vmul.f32 %v5234_v21, %v5130_v39 }
  0xde   : > { %v5305_v40 = vadd.f32 %v1174_v33, %v1010_v9  ;;  %v5307_v59 = vpop.permute.xlu0 %463  ;;  %v1178_v9 = vmul.f32 %v5254_v41, %v5153_v46 }
  0xdf   : > { %4781 = vset.pattern.permute.xlu1 %v8239_v44  ;;  %v1051_v5 = vpop.permute.xlu1 %1050 }
  0xe0   : > { %v8162_v19 = vmax.f32 %v5305_v40, 0.0  ;;  %v1175_v6 = vmul.f32 %v5254_v41, %v1051_v5  ;;  %910 = vperm.xlu1 %4781, %v5083_v28  }
  0xe2   : > { %1274 = vst.msk [vmem:[#allocation2 + $0x30] sm:$0xff] %vm365_vm0, %v8162_v19  ;;  %v5316_v38 = vadd.f32 %v1175_v6, %v1011_v2  ;;  %v5318_v0 = vpop.permute.xlu0 %473  ;;  %v1180_v19 = vmul.f32 %v5254_v41, %v5159_v48 }
  0xe4   : > { %v8160_v7 = vmax.f32 %v5316_v38, 0.0  ;;  %914 = vperm.xlu1 %4781, %v4964_v12   ;;  %v671_v25 = vpop.permute.xlu1 %670  ;;  %v622_v12 = vadd.f32 %v5264_v57, %v590_v37 }
  0xe5   : > { %v786_v6 = vmul.f32 %v5257_v43, %v671_v25 }
  0xe6   : > { %1275 = vst.msk [vmem:[#allocation2 + $0x48] sm:$0xff] %vm365_vm0, %v8160_v7  ;;  %v5325_v34 = vpop.permute.xlu0 %483 }
  0xe7   : > { %v818_v33 = vadd.f32 %v786_v6, %v622_v12 }
  0xe8   : > { %4782 = vset.pattern.permute.xlu1 %v8237_v17 }
  0xe9   : > { %1106 = vperm.xlu1 %4782, %v5083_v28   ;;  %v5331_v2 = vpop.permute.xlu1 %862  ;;  %v1795_v32 = vld [vmem:[#allocation2 + $0x31] sm:$0xff] }
  0xea   : > { %v5334_v63 = vpop.permute.xlu0 %493 }
  0xed   : > { %4783 = vset.pattern.permute.xlu1 %v8238_v10  ;;  %v867_v24 = vpop.permute.xlu1 %866 }
  0xee   : > { %v982_v39 = vmul.f32 %v5251_v36, %v867_v24  ;;  %726 = vperm.xlu1 %4783, %v4969_v13   ;;  %v5342_v28 = vpop.permute.xlu0 %503 }
  0xf0   : > { %v1014_v5 = vadd.f32 %v982_v39, %v818_v33 }
  0xf2   : > { %v5344_v7 = vadd.f32 %v1178_v9, %v1014_v5  ;;  %4784 = vset.pattern.permute.xlu1 %v8239_v44  ;;  %v5347_v25 = vpop.permute.xlu1 %1058  ;;  %v5349_v37 = vpop.permute.xlu0 %513  ;;  %v592_v9 = vmul.f32 %v5234_v21, %v5139_v42 }
  0xf3   : > { %8240 = vst [vmem:[#allocation22_spill] sm:$0xff] %v5349_v37  ;;  %918 = vperm.xlu1 %4784, %v5088_v29  }
  0xf4   : > { %v8161_v46 = vmax.f32 %v5344_v7, 0.0 }
  0xf6   : > { %1278 = vst.msk [vmem:[#allocation2 + $0x70] sm:$0xff] %vm365_vm0, %v8161_v46  ;;  %v5356_v6 = vpop.permute.xlu0 %523  ;;  %v624_v46 = vadd.f32 %v5264_v57, %v592_v9  ;;  %v1269_v9 = vld [vmem:[%s8144_s3] sm:$0xff] }
  0xf7   : > { %8241 = vst [vmem:[#allocation23_spill] sm:$0xff] %v5356_v6  ;;  %922 = vperm.xlu1 %4784, %v4969_v13   ;;  %v679_v12 = vpop.permute.xlu1 %678  ;;  %v5428_v58 = vrot.slane %v1269_v9, %v5237_v22  ;;  %v8250_v22 = vsub.s32 6, %v5213_v4 }
  0xf8   : > { %v788_v39 = vmul.f32 %v5257_v43, %v679_v12 }
  0xf9   : > { %v5501_v53 = vmul.f32 %v5428_v58, %v1793_v60  ;;  %v597_v60 = vmul.f32 %v5234_v21, %v5325_v34 }
  0xfa   : > { %v5359_v24 = vpop.permute.xlu0 %533 }
  0xfb   : > { %8242 = vst [vmem:[#allocation24_spill] sm:$0xff] %v5359_v24  ;;  %4785 = vset.pattern.permute.xlu1 %v8237_v17  ;;  %v820_v24 = vadd.f32 %v788_v39, %v624_v46  ;;  %v1313_v39 = vld [vmem:[#allocation2 + $0xf] sm:$0xff]  ;;  %v596_v46 = vmul.f32 %v5234_v21, %v5155_v47  ;;  %v8247_v47 = vsub.s32 7, %v5213_v4  ;;  %8255 = vst [vmem:[#allocation33_spill] sm:$0xff] %v5501_v53 }
  0xfc   : > { %1114 = vperm.xlu1 %4785, %v5088_v29   ;;  %v5365_v33 = vpop.permute.xlu1 %870 }
  0xfe   : > { %v5368_v5 = vpop.permute.xlu0 %543 }
  0xff   : > { %8243 = vst [vmem:[#allocation25_spill] sm:$0xff] %v5368_v5  ;;  %v1312_v5 = vld [vmem:[#allocation2 + $0x7] sm:$0xff] }
 0x100   : > { %4786 = vset.pattern.permute.xlu1 %v8238_v10  ;;  %v875_v13 = vpop.permute.xlu1 %874 }
 0x101   : > { %v984_v42 = vmul.f32 %v5251_v36, %v875_v13  ;;  %734 = vperm.xlu1 %4786, %v4974_v14  }
 0x102   : > { %v5376_v29 = vpop.permute.xlu0 %553 }
 0x103   : > { %8244 = vst [vmem:[#allocation26_spill] sm:$0xff] %v5376_v29  ;;  %v1016_v61 = vadd.f32 %v984_v42, %v820_v24  ;;  %v594_v24 = vmul.f32 %v5234_v21, %v5148_v45  ;;  %v5409_v45 = vrot.slane %v1269_v9, %v5243_v20  ;;  %v1552_v20 = vld [vmem:[#allocation2 + $0x8] sm:$0xff] }
 0x105   : > { %v5378_v3 = vadd.f32 %v1180_v19, %v1016_v61  ;;  %4787 = vset.pattern.permute.xlu1 %v8239_v44  ;;  %v5381_v12 = vpop.permute.xlu1 %1066  ;;  %v5392_v61 = vrot.slane %v1269_v9, %v5223_v8  ;;  %v598_v8 = vmul.f32 %v5234_v21, %v5162_v49  ;;  %v8246_v19 = vsub.s32 4, %v5213_v4 }
 0x106   : > { %926 = vperm.xlu1 %4787, %v5094_v30   ;;  %v5389_v13 = vpop.permute.xlu0 %568 }
 0x107   : > { %8245 = vst [vmem:[#allocation27_spill] sm:$0xff] %v5389_v13  ;;  %v8164_v42 = vmax.f32 %v5378_v3, 0.0  ;;  %v1352_v48 = vmul.f32 %v5392_v61, %v1312_v5  ;;  %v1353_v6 = vmul.f32 %v5392_v61, %v1313_v39  ;;  %v5413_v29 = vrot.slane %v1269_v9, %v8246_v19 }
 0x108   : > { %v5417_v13 = vrot.slane %v1269_v9, %v8247_v47  ;;  %v585_v5 = vmul.f32 %v5234_v21, %v5272_v1  ;;  %v8249_v19 = vsub.s32 5, %v5213_v4  ;;  %v977_v47 = vmul.f32 %v5251_v36, %v5119_v35 }
 0x109   : > { %1280 = vst.msk [vmem:[#allocation2 + $0x90] sm:$0xff] %vm365_vm0, %v8164_v42  ;;  %v5425_v42 = vrot.slane %v1269_v9, %v5240_v23  ;;  %v626_v1 = vadd.f32 %v5264_v57, %v594_v24  ;;  %v5442_v23 = vld [vmem:[%s8145_s4] ss:$0 sm:$0xff]  ;;  %v5453_v35 = vmul.f32 %v5254_v41, %v5165_v50  ;;  %v5462_v4 = vadd.f32 %v5264_v57, %v598_v8 }
 0x10a   : > { %930 = vperm.xlu1 %4787, %v4974_v14   ;;  %v687_v49 = vpop.permute.xlu1 %686  ;;  %v5422_v39 = vpop.permute.xlu0 %573  ;;  %v5432_v62 = vrot.slane %v1269_v9, %v8249_v19  ;;  %v600_v14 = vmul.f32 %v5234_v21, %v5169_v51  ;;  %v5449_v19 = vadd.f32 %v5264_v57, %v596_v46  ;;  %v5456_v24 = vadd.f32 %v5442_v23, %v1352_v48  ;;  %v1792_v51 = vld [vmem:[#allocation2 + $0x9] sm:$0xff] }
 0x10b   : > { %8248 = vst [vmem:[#allocation28_spill] sm:$0xff] %v5422_v39  ;;  %v5446_v39 = vrot.slane %v1269_v9, %v8250_v22  ;;  %v5459_v37 = vadd.f32 %v5442_v23, %v1353_v6  ;;  %8251 = vst [vmem:[#allocation29_spill] sm:$0xff] %v5462_v4  ;;  %v589_v22 = vmul.f32 %v5234_v21, %v5287_v11 }
 0x10c   : > { %v591_v9 = vmul.f32 %v5234_v21, %v5299_v27  ;;  %v5469_v50 = vmul.f32 %v5409_v45, %v1552_v20  ;;  %v5473_v48 = vmul.f32 %v5254_v41, %v5172_v52  ;;  %v617_v6 = vadd.f32 %v5264_v57, %v585_v5  ;;  %v1557_v5 = vld [vmem:[#allocation2 + $0x50] sm:$0xff] }
 0x10d   : > { %v593_v46 = vmul.f32 %v5234_v21, %v5307_v59  ;;  %v5480_v8 = vmul.f32 %v5409_v45, %v1553_v55  ;;  %v5483_v11 = vadd.f32 %v5264_v57, %v600_v14  ;;  %v5487_v20 = vmul.f32 %v5254_v41, %v5178_v54  ;;  %v5495_v59 = vld [vmem:[%s8144_s3 + $0x8] ss:$0 sm:$0xff]  ;;  %v1797_v14 = vld [vmem:[#allocation2 + $0x51] sm:$0xff] }
 0x10e   : > { %4788 = vset.pattern.permute.xlu1 %v8237_v17  ;;  %v5498_v55 = vmul.f32 %v5428_v58, %v1792_v51  ;;  %v5505_v54 = vmul.f32 %v5254_v41, %v5185_v56  ;;  %v621_v4 = vadd.f32 %v5264_v57, %v589_v22  ;;  %v623_v51 = vadd.f32 %v5264_v57, %v591_v9 }
 0x10f   : > { %8252 = vst [vmem:[#allocation30_spill] sm:$0xff] %v5483_v11  ;;  %8253 = vst [vmem:[#allocation31_spill] sm:$0xff] %v5487_v20  ;;  %1122 = vperm.xlu1 %4788, %v5094_v30   ;;  %v5490_v52 = vpop.permute.xlu1 %878  ;;  %v651_v27 = vpop.permute.xlu0 %650  ;;  %v1173_v30 = vmul.f32 %v5254_v41, %v5290_v18  ;;  %v790_v11 = vmul.f32 %v5257_v43, %v687_v49  ;;  %v5518_v56 = vadd.f32 %v5264_v57, %v593_v46 }
 0x110   : > { %8254 = vst [vmem:[#allocation32_spill] sm:$0xff] %v5498_v55  ;;  %8256 = vst [vmem:[#allocation34_spill] sm:$0xff] %v5505_v54  ;;  %v781_v20 = vmul.f32 %v5257_v43, %v651_v27  ;;  %v595_v55 = vmul.f32 %v5234_v21, %v5318_v0  ;;  %v5521_v18 = vmul.f32 %v5417_v13, %v1557_v5  ;;  %v1555_v27 = vld [vmem:[#allocation2 + $0x30] sm:$0xff] }
 0x111   : > { %v5524_v49 = vmul.f32 %v5495_v59, %v1797_v14  ;;  %v5528_v0 = vmul.f32 %v5413_v29, %v1557_v5  ;;  %v5531_v34 = vmul.f32 %v5432_v62, %v1797_v14  ;;  %v5534_v46 = vmul.f32 %v5409_v45, %v1557_v5 }
 0x112   : > { %v813_v54 = vadd.f32 %v781_v20, %v617_v6  ;;  %8257 = vst [vmem:[#allocation35_spill] sm:$0xff] %v5521_v18  ;;  %v5537_v6 = vmul.f32 %v5428_v58, %v1797_v14  ;;  %v822_v20 = vadd.f32 %v790_v11, %v626_v1  ;;  %v981_v5 = vmul.f32 %v5251_v36, %v5331_v2 }
 0x113   : > { %8258 = vst [vmem:[#allocation36_spill] sm:$0xff] %v5524_v49  ;;  %4789 = vset.pattern.permute.xlu1 %v8238_v10  ;;  %v883_v22 = vpop.permute.xlu1 %882  ;;  %v667_v9 = vpop.permute.xlu0 %666  ;;  %8259 = vst [vmem:[#allocation37_spill] sm:$0xff] %v5528_v0  ;;  %v5543_v0 = vadd.f32 %v5264_v57, %v595_v55  ;;  %v599_v1 = vmul.f32 %v5234_v21, %v5334_v63  ;;  %v1177_v55 = vmul.f32 %v5254_v41, %v5347_v25 }
 0x114   : > { %8260 = vst [vmem:[#allocation38_spill] sm:$0xff] %v5531_v34  ;;  %8261 = vst [vmem:[#allocation39_spill] sm:$0xff] %v5534_v46  ;;  %v986_v49 = vmul.f32 %v5251_v36, %v883_v22  ;;  %v785_v53 = vmul.f32 %v5257_v43, %v667_v9  ;;  %742 = vperm.xlu1 %4789, %v4979_v15   ;;  %v1009_v18 = vadd.f32 %v977_v47, %v813_v54  ;;  %v1316_v9 = vld [vmem:[#allocation2 + $0x47] sm:$0xff] }
 0x115   : > { %8262 = vst [vmem:[#allocation40_spill] sm:$0xff] %v5537_v6  ;;  %v5546_v34 = vadd.f32 %v5264_v57, %v597_v60  ;;  %v1556_v6 = vld [vmem:[#allocation2 + $0x48] sm:$0xff]  ;;  %v5553_v47 = vmul.f32 %v5413_v29, %v1555_v27  ;;  %v5558_v60 = vmul.f32 %v5432_v62, %v1795_v32  ;;  %v5561_v2 = vmul.f32 %v5409_v45, %v1555_v27 }
 0x116   : > { %v1018_v11 = vadd.f32 %v986_v49, %v822_v20  ;;  %v817_v14 = vadd.f32 %v785_v53, %v621_v4  ;;  %v1205_v22 = vadd.f32 %v1173_v30, %v1009_v18  ;;  %v5564_v63 = vmul.f32 %v5428_v58, %v1795_v32  ;;  %v1796_v49 = vld [vmem:[#allocation2 + $0x49] sm:$0xff] }
 0x117   : > { %8263 = vst [vmem:[#allocation41_spill] sm:$0xff] %v5546_v34  ;;  %v675_v54 = vpop.permute.xlu0 %674  ;;  %v1317_v20 = vld [vmem:[#allocation2 + $0x4f] sm:$0xff]  ;;  %v5572_v46 = vadd.f32 %v5264_v57, %v599_v1  ;;  %v1356_v32 = vmul.f32 %v5392_v61, %v1316_v9  ;;  %v5577_v27 = vmul.f32 %v5446_v39, %v1316_v9  ;;  %v5589_v57 = vmul.f32 %v5234_v21, %v5342_v28 }
 0x118   : > { %v5567_v53 = vadd.f32 %v5453_v35, %v1018_v11  ;;  %v1013_v4 = vadd.f32 %v981_v5, %v817_v14  ;;  %v787_v30 = vmul.f32 %v5257_v43, %v675_v54  ;;  %4790 = vset.pattern.permute.xlu1 %v8239_v44  ;;  %v1075_v18 = vpop.permute.xlu1 %1074  ;;  %v1237_v25 = vmax.f32 %v1205_v22, 0.0 }
 0x119   : > { %8264 = vst [vmem:[#allocation42_spill] sm:$0xff] %v5572_v46  ;;  %934 = vperm.xlu1 %4790, %v5100_v31   ;;  %v5580_v35 = vmul.f32 %v5409_v45, %v1556_v6  ;;  %v983_v5 = vmul.f32 %v5251_v36, %v5365_v33  ;;  %8265 = vst [vmem:[#allocation43_spill] sm:$0xff] %v5589_v57  ;;  %v8266_v1 = vmax.f32 %v5305_v40, 0.0 }
 0x11a   : > { %v8172_v11 = vmax.f32 %v5567_v53, 0.0  ;;  %v1209_v14 = vadd.f32 %v1177_v55, %v1013_v4  ;;  %v819_v22 = vadd.f32 %v787_v30, %v623_v51  ;;  %1273 = vst.msk [vmem:[#allocation2 + $0x28] sm:$0xff] %vm365_vm0, %v1237_v25  ;;  %4625 = vmatprep.mubr.msk.f32.mxu0 %vm365_vm0, %v1237_v25  ;;  %v5595_v46 = vmul.f32 %v5417_v13, %v1556_v6 }
 0x11b   : > { %4626 = vmatmul.mubr.msk.f32.vlgmr.msra.gmra.mxu0 %vm365_vm0, %v8266_v1  ;;  %v683_v54 = vpop.permute.xlu0 %682  ;;  %v5598_v33 = vmul.f32 %v5495_v59, %v1796_v49  ;;  %v1357_v51 = vmul.f32 %v5392_v61, %v1317_v20  ;;  %v1179_v55 = vmul.f32 %v5254_v41, %v5381_v12  ;;  %v8267_v30 = vmax.f32 %v5316_v38, 0.0 }
 0x11c   : > { %1282 = vst.msk [vmem:[#allocation2 + $0xb0] sm:$0xff] %vm365_vm0, %v8172_v11  ;;  %v1241_v28 = vmax.f32 %v1209_v14, 0.0  ;;  %v1015_v40 = vadd.f32 %v983_v5, %v819_v22  ;;  %v789_v4 = vmul.f32 %v5257_v43, %v683_v54  ;;  %v5612_v1 = vmul.f32 %v5446_v39, %v1317_v20  ;;  %v1559_v54 = vld [vmem:[#allocation2 + $0x70] sm:$0xff] }
 0x11d   : > { %4628 = vmatprep.mubr.msk.f32.mxu0 %vm365_vm0, %v8267_v30  ;;  %938 = vperm.xlu1 %4790, %v4979_v15   ;;  %v695_v25 = vpop.permute.xlu1 %694  ;;  %v5615_v12 = vmul.f32 %v5425_v42, %v1316_v9  ;;  %v5618_v57 = vmul.f32 %v5413_v29, %v1556_v6  ;;  %v5621_v5 = vmul.f32 %v5432_v62, %v1796_v49  ;;  %v1799_v9 = vld [vmem:[#allocation2 + $0x71] sm:$0xff]  ;;  %v8268_v6 = vmax.f32 %v5278_v26, 0.0 }
 0x11e   : > { %v985_v38 = vmul.f32 %v5251_v36, %v5490_v52  ;;  %1277 = vst.msk [vmem:[#allocation2 + $0x68] sm:$0xff] %vm365_vm0, %v1241_v28  ;;  %v1211_v14 = vadd.f32 %v1179_v55, %v1015_v40  ;;  %v821_v15 = vadd.f32 %v789_v4, %v5518_v56  ;;  %v5628_v22 = vmul.f32 %v5425_v42, %v1317_v20 }
 0x11f   : > { %v792_v30 = vmul.f32 %v5257_v43, %v695_v25  ;;  %4629 = vmatmul.mubr.msk.f32.gmra.mxu0 %vm365_vm0, %v8268_v6  ;;  %v691_v11 = vpop.permute.xlu0 %690  ;;  %v5635_v21 = vadd.f32 %v5442_v23, %v1356_v32  ;;  %v5638_v52 = vmul.f32 %v5428_v58, %v1796_v49  ;;  %v5641_v56 = vadd.f32 %v5442_v23, %v1357_v51 }
 0x120   : > { %v1243_v20 = vmax.f32 %v1211_v14, 0.0  ;;  %v1181_v55 = vmul.f32 %v5254_v41, %v1075_v18  ;;  %v1017_v40 = vadd.f32 %v985_v38, %v821_v15  ;;  %4631 = vmatprep.mubr.msk.f32.mxu0 %vm365_vm0, %v1241_v28  ;;  %v791_v26 = vmul.f32 %v5257_v43, %v691_v11 }
 0x121   : > { %4791 = vset.pattern.permute.xlu1 %v8237_v17  ;;  %v1314_v4 = vld [vmem:[#allocation2 + $0x27] sm:$0xff]  ;;  %v5648_v32 = vmul.f32 %v5417_v13, %v1559_v54  ;;  %v5651_v49 = vmul.f32 %v5495_v59, %v1799_v9  ;;  %v5654_v51 = vmul.f32 %v5413_v29, %v1559_v54  ;;  %v5657_v18 = vmul.f32 %v5432_v62, %v1799_v9  ;;  %v1315_v6 = vld [vmem:[#allocation2 + $0x2f] sm:$0xff] }
 0x122   : > { %v1554_v25 = vld [vmem:[#allocation2 + $0x28] sm:$0xff]  ;;  %1279 = vst.msk [vmem:[#allocation2 + $0x88] sm:$0xff] %vm365_vm0, %v1243_v20  ;;  %v1213_v28 = vadd.f32 %v1181_v55, %v1017_v40  ;;  %1130 = vperm.xlu1 %4791, %v5100_v31   ;;  %v887_v11 = vpop.permute.xlu1 %886  ;;  %v1354_v38 = vmul.f32 %v5392_v61, %v1314_v4  ;;  %v1420_v14 = vmul.f32 %v5425_v42, %v1314_v4  ;;  %v8273_v55 = vmax.f32 %v5344_v7, 0.0 }
 0x123   : > { %8269 = vst [vmem:[#allocation44_spill] sm:$0xff] %v5651_v49  ;;  %8270 = vst [vmem:[#allocation45_spill] sm:$0xff] %v5654_v51  ;;  %v1794_v15 = vld [vmem:[#allocation2 + $0x29] sm:$0xff]  ;;  %v5664_v49 = vmul.f32 %v5409_v45, %v1559_v54  ;;  %v824_v51 = vadd.f32 %v792_v30, %v5449_v19  ;;  %v823_v34 = vadd.f32 %v791_v26, %v5543_v0  ;;  %v699_v31 = vpop.permute.xlu0 %698 }
 0x124   : > { %8271 = vst [vmem:[#allocation46_spill] sm:$0xff] %v5657_v18  ;;  %v987_v18 = vmul.f32 %v5251_v36, %v887_v11  ;;  %4632 = vmatmul.mubr.msk.f32.gmra.mxu0 %vm365_vm0, %v8273_v55  ;;  %v5673_v40 = vmul.f32 %v5428_v58, %v1799_v9  ;;  %v1245_v4 = vmax.f32 %v1213_v28, 0.0  ;;  %v1452_v54 = vadd.f32 %v1420_v14, %v5456_v24 }
 0x125   : > { %8272 = vst [vmem:[#allocation47_spill] sm:$0xff] %v5664_v49  ;;  %4634 = vmatprep.mubr.msk.f32.mxu0 %vm365_vm0, %v1243_v20  ;;  %v1594_v49 = vmul.f32 %v5409_v45, %v1554_v25  ;;  %v1421_v19 = vmul.f32 %v5425_v42, %v1315_v6  ;;  %v1660_v0 = vmul.f32 %v5413_v29, %v1554_v25  ;;  %v5681_v7 = vld [vmem:[#allocation2 + $0x67] sm:$0xff]  ;;  %v5694_v14 = vld [vmem:[#allocation2 + $0x6f] sm:$0xff]  ;;  %v8274_v55 = vmax.f32 %v5378_v3, 0.0 }
 0x126   : > { %v1900_v30 = vmul.f32 %v5432_v62, %v1794_v15  ;;  %v1386_v26 = vadd.f32 %v5442_v23, %v1354_v38  ;;  %v1355_v9 = vmul.f32 %v5392_v61, %v1315_v6  ;;  %1281 = vst.msk [vmem:[#allocation2 + $0xa8] sm:$0xff] %vm365_vm0, %v1245_v4  ;;  %4792 = vset.pattern.permute.xlu1 %v8238_v10  ;;  %v891_v20 = vpop.permute.xlu1 %890 }
 0x127   : > { %v5688_v24 = vmul.f32 %v5257_v43, %v699_v31  ;;  %v1520_v28 = vadd.f32 %v5577_v27, %v1452_v54  ;;  %v1453_v25 = vadd.f32 %v1421_v19, %v5459_v37  ;;  %v1490_v11 = vmul.f32 %v5446_v39, %v5681_v7  ;;  %750 = vperm.xlu1 %4792, %v4984_v16  }
 0x128   : > { %v1019_v38 = vadd.f32 %v987_v18, %v823_v34  ;;  %v988_v6 = vmul.f32 %v5251_v36, %v891_v20  ;;  %4635 = vmatmul.mubr.msk.f32.gmra.mxu0 %vm365_vm0, %v8274_v55  ;;  %v1454_v31 = vadd.f32 %v5615_v12, %v1386_v26  ;;  %v1834_v54 = vmul.f32 %v5428_v58, %v1794_v15 }
 0x129   : > { %4637 = vmatprep.mubr.msk.f32.mxu0 %vm365_vm0, %v1245_v4  ;;  %v1624_v37 = vadd.f32 %v5469_v50, %v1520_v28  ;;  %v1521_v27 = vadd.f32 %v5612_v1, %v1453_v25  ;;  %v1387_v34 = vadd.f32 %v5442_v23, %v1355_v9  ;;  %v1491_v16 = vmul.f32 %v5446_v39, %v5694_v14  ;;  %v5709_v3 = vld [vmem:[#allocation2 + $0x87] sm:$0xff] }
 0x12a   : > { %v1020_v18 = vadd.f32 %v988_v6, %v824_v51  ;;  %v1522_v19 = vadd.f32 %v1490_v11, %v1454_v31  ;;  %v1424_v12 = vmul.f32 %v5425_v42, %v5681_v7  ;;  %v5714_v50 = vld [vmem:[#allocation2 + $0x68] sm:$0xff]  ;;  %v1492_v15 = vmul.f32 %v5446_v39, %v5709_v3  ;;  %v8276_v25 = vld [vmem:[#allocation3_spill] sm:$0xff] }
 0x12b   : > { %v1692_v26 = vadd.f32 %v1660_v0, %v1624_v37  ;;  %v1625_v4 = vadd.f32 %v5480_v8, %v1521_v27  ;;  %v1455_v1 = vadd.f32 %v5628_v22, %v1387_v34  ;;  %4793 = vset.pattern.permute.xlu1 %v8239_v44  ;;  %v1083_v9 = vpop.permute.xlu1 %1082  ;;  %v8275_v20 = vmax.f32 %v5567_v53, 0.0  ;;  %v5729_v6 = vld [vmem:[#allocation2 + $0x69] sm:$0xff]  ;;  %v8278_v34 = vld [vmem:[#allocation35_spill] sm:$0xff] }
 0x12c   : > { %v1216_v51 = vadd.f32 %v5473_v48, %v1020_v18  ;;  %v1626_v28 = vadd.f32 %v1594_v49, %v1522_v19  ;;  %v1456_v0 = vadd.f32 %v1424_v12, %v5635_v21  ;;  %v1183_v8 = vmul.f32 %v5254_v41, %v1083_v9  ;;  %942 = vperm.xlu1 %4793, %v8276_v25   ;;  %v8277_v37 = vld [vmem:[#allocation32_spill] sm:$0xff] }
 0x12d   : > { %4638 = vmatmul.mubr.msk.f32.gmra.mxu0 %vm365_vm0, %v8275_v20  ;;  %v1760_v22 = vadd.f32 %v5595_v46, %v1692_v26  ;;  %v1693_v11 = vadd.f32 %v5553_v47, %v1625_v4  ;;  %v1523_v48 = vadd.f32 %v1491_v16, %v1455_v1  ;;  %v1730_v49 = vmul.f32 %v5417_v13, %v5714_v50  ;;  %v5737_v19 = vld [vmem:[#allocation2 + $0x88] sm:$0xff] }
 0x12e   : > { %v1248_v55 = vmax.f32 %v1216_v51, 0.0  ;;  %v1694_v53 = vadd.f32 %v5618_v57, %v1626_v28  ;;  %v1524_v31 = vadd.f32 %v1492_v15, %v1456_v0  ;;  %v1215_v21 = vadd.f32 %v1183_v8, %v1019_v38  ;;  %v4810_v26 = vld [vmem:[%s4922_s14 + $0xc8] sm:$0xff]  ;;  %v8279_v15 = vld [vmem:[#allocation33_spill] sm:$0xff] }
 0x12f   : > { %v1864_v27 = vadd.f32 %v8277_v37, %v1760_v22  ;;  %v1761_v18 = vadd.f32 %v8278_v34, %v1693_v11  ;;  %v1627_v46 = vadd.f32 %v5561_v2, %v1523_v48  ;;  %v1970_v16 = vmul.f32 %v5495_v59, %v5729_v6  ;;  %v8280_v51 = vld [vmem:[#allocation37_spill] sm:$0xff]  ;;  %v5772_v34 = vld [vmem:[#allocation2 + $0xa7] sm:$0xff] }
 0x130   : > { %1284 = vst.msk [vmem:[#allocation2 + $0xd0] sm:$0xff] %vm365_vm0, %v1248_v55  ;;  %v1762_v47 = vadd.f32 %v1730_v49, %v1694_v53  ;;  %v1628_v57 = vadd.f32 %v5580_v35, %v1524_v31  ;;  %v1664_v12 = vmul.f32 %v5413_v29, %v5714_v50  ;;  %v1247_v38 = vmax.f32 %v1215_v21, 0.0  ;;  %946 = vperm.xlu1 %4793, %v4810_v26   ;;  %v703_v4 = vpop.permute.xlu1 %702  ;;  %v5748_v20 = vld [vmem:[#allocation2 + $0x8f] sm:$0xff] }
 0x131   : > { %v1932_v1 = vadd.f32 %v1900_v30, %v1864_v27  ;;  %v1865_v2 = vadd.f32 %v8279_v15, %v1761_v18  ;;  %v1695_v9 = vadd.f32 %v8280_v51, %v1627_v46  ;;  %v1732_v8 = vmul.f32 %v5417_v13, %v5737_v19  ;;  %v5764_v31 = vld [vmem:[#allocation2 + $0x89] sm:$0xff]  ;;  %v8285_v51 = vld [vmem:[#allocation39_spill] sm:$0xff] }
 0x132   : > { %v1866_v28 = vadd.f32 %v1834_v54, %v1762_v47  ;;  %v1696_v0 = vadd.f32 %v1664_v12, %v1628_v57  ;;  %v1904_v35 = vmul.f32 %v5432_v62, %v5729_v6  ;;  %1283 = vst.msk [vmem:[#allocation2 + $0xc8] sm:$0xff] %vm365_vm0, %v1247_v38  ;;  %4640 = vmatprep.mubr.msk.f32.mxu0 %vm365_vm0, %v1247_v38  ;;  %v5776_v46 = vld [vmem:[#allocation2 + $0x90] sm:$0xff]  ;;  %v8284_v15 = vld [vmem:[#allocation44_spill] sm:$0xff] }
 0x133   : > { %v2000_v30 = vadd.f32 %v5598_v33, %v1932_v1  ;;  %v1933_v22 = vadd.f32 %v5558_v60, %v1865_v2  ;;  %v1763_v11 = vadd.f32 %v5648_v32, %v1695_v9  ;;  %v1425_v54 = vmul.f32 %v5425_v42, %v5694_v14  ;;  %4641 = vmatmul.mubr.msk.f32.gmra.mxu0 %vm365_vm0, %v1248_v55  ;;  %v8281_v33 = vld [vmem:[#allocation36_spill] sm:$0xff] }
 0x134   : > { %v794_v48 = vmul.f32 %v5257_v43, %v703_v4  ;;  %v1934_v53 = vadd.f32 %v5621_v5, %v1866_v28  ;;  %v1764_v49 = vadd.f32 %v1732_v8, %v1696_v0  ;;  %v1493_v21 = vmul.f32 %v5446_v39, %v5748_v20  ;;  %4794 = vset.pattern.permute.xlu1 %v8237_v17  ;;  %v8283_v4 = vld [vmem:[#allocation41_spill] sm:$0xff] }
 0x135   : > { %v2032_v60 = vmax.f32 %v2000_v30, 0.0  ;;  %v2001_v32 = vadd.f32 %v8281_v33, %v1933_v22  ;;  %v1867_v37 = vadd.f32 %v5564_v63, %v1763_v11  ;;  %v1457_v27 = vadd.f32 %v1425_v54, %v5641_v56  ;;  %1138 = vperm.xlu1 %4794, %v8276_v25   ;;  %v895_v5 = vpop.permute.xlu1 %894  ;;  %v8282_v56 = vld [vmem:[#allocation38_spill] sm:$0xff]  ;;  %v8286_v22 = vld [vmem:[#allocation29_spill] sm:$0xff] }
 0x136   : > { %v2002_v55 = vadd.f32 %v1970_v16, %v1934_v53  ;;  %v1868_v18 = vadd.f32 %v5638_v52, %v1764_v49  ;;  %v1358_v47 = vmul.f32 %v5392_v61, %v5681_v7  ;;  %v1426_v57 = vmul.f32 %v5425_v42, %v5709_v3  ;;  %v5796_v0 = vld [vmem:[#allocation2 + $0x91] sm:$0xff] }
 0x137   : > { %4677 = vmatprep.mubr.msk.f32.mxu1 %vm365_vm0, %v2032_v60  ;;  %v2033_v63 = vmax.f32 %v2001_v32, 0.0  ;;  %v1935_v12 = vadd.f32 %v8282_v56, %v1867_v37  ;;  %v1972_v25 = vmul.f32 %v5495_v59, %v5764_v31  ;;  %v1525_v38 = vadd.f32 %v1493_v21, %v1457_v27  ;;  %v5804_v53 = vld [vmem:[%s4922_s14 + $0xd8] sm:$0xff]  ;;  %v8287_v21 = vld [vmem:[#allocation45_spill] sm:$0xff] }
 0x138   : > { %v2034_v16 = vmax.f32 %v2002_v55, 0.0  ;;  %v1936_v26 = vadd.f32 %v1904_v35, %v1868_v18  ;;  %v1390_v52 = vadd.f32 %v5442_v23, %v1358_v47  ;;  %v1494_v7 = vmul.f32 %v5446_v39, %v5772_v34  ;;  %v5816_v55 = vld [vmem:[%s4922_s14 + $0xe0] sm:$0xff]  ;;  %v5818_v47 = vld [vmem:[#allocation2 + $0xa8] sm:$0xff] }
 0x139   : > { %v825_v1 = vadd.f32 %v5688_v24, %v8283_v4  ;;  %4678 = vmatmul.mubr.msk.f32.vlgmr.msra.gmra.mxu1 %vm365_vm0, %v2033_v63  ;;  %v2003_v2 = vadd.f32 %v8284_v15, %v1935_v12  ;;  %v1629_v9 = vadd.f32 %v8285_v51, %v1525_v38  ;;  %v1733_v28 = vmul.f32 %v5417_v13, %v5776_v46  ;;  %v899_v35 = vpop.permute.xlu1 %898  ;;  %v8288_v38 = vld [vmem:[#allocation31_spill] sm:$0xff] }
 0x13a   : > { %v989_v8 = vmul.f32 %v5251_v36, %v895_v5  ;;  %4680 = vmatprep.mubr.msk.f32.mxu1 %vm365_vm0, %v2034_v16  ;;  %4795 = vset.pattern.permute.xlu1 %v8238_v10  ;;  %v2004_v24 = vadd.f32 %v1972_v25, %v1936_v26  ;;  %v1458_v30 = vadd.f32 %v1426_v57, %v1390_v52  ;;  %v5812_v5 = vld [vmem:[#allocation2 + $0xaf] sm:$0xff]  ;;  %v8289_v26 = vmov 0  }
 0x13b   : > { %v826_v11 = vadd.f32 %v794_v48, %v8286_v22  ;;  %v990_v54 = vmul.f32 %v5251_v36, %v899_v35  ;;  %758 = vperm.xlu1 %4795, %v5804_v53   ;;  %v2035_v49 = vmax.f32 %v2003_v2, 0.0  ;;  %v1697_v60 = vadd.f32 %v8287_v21, %v1629_v9  ;;  %v5839_v9 = vld [vmem:[#allocation2 + $0xc7] sm:$0xff]  ;;  %v8291_v35 = vld [vmem:[#allocation46_spill] sm:$0xff] }
 0x13c   : > { %v2036_v33 = vmax.f32 %v2004_v24, 0.0  ;;  %v1973_v32 = vmul.f32 %v5495_v59, %v5796_v0  ;;  %v1526_v37 = vadd.f32 %v1494_v7, %v1458_v30  ;;  %v1598_v27 = vmul.f32 %v5409_v45, %v5714_v50  ;;  %v8290_v7 = vld [vmem:[#allocation40_spill] sm:$0xff] }
 0x13d   : > { %v1022_v48 = vadd.f32 %v990_v54, %v826_v11  ;;  %4681 = vmatmul.mubr.msk.f32.gmra.mxu1 %vm365_vm0, %v2035_v49  ;;  %v1765_v18 = vadd.f32 %v1733_v28, %v1697_v60  ;;  %v1359_v57 = vmul.f32 %v5392_v61, %v5694_v14  ;;  %v1667_v63 = vmul.f32 %v5413_v29, %v5776_v46  ;;  %v5846_v49 = vld [vmem:[#allocation2 + $0xa9] sm:$0xff] }
 0x13e   : > { %v1021_v56 = vadd.f32 %v989_v8, %v825_v1  ;;  %4683 = vmatprep.mubr.msk.f32.mxu1 %vm365_vm0, %v2036_v33  ;;  %v1630_v50 = vadd.f32 %v1598_v27, %v1526_v37  ;;  %v1666_v12 = vmul.f32 %v5413_v29, %v5737_v19  ;;  %v1427_v25 = vmul.f32 %v5425_v42, %v5748_v20  ;;  %v1091_v52 = vpop.permute.xlu1 %1090  ;;  %v5852_v37 = vld [vmem:[#allocation2 + $0xb0] sm:$0xff] }
 0x13f   : > { %v1218_v16 = vadd.f32 %v8288_v38, %v1022_v48  ;;  %4796 = vset.pattern.permute.xlu1 %v8289_v26  ;;  %v1869_v14 = vadd.f32 %v8290_v7, %v1765_v18  ;;  %v1391_v4 = vadd.f32 %v5442_v23, %v1359_v57  ;;  %v1495_v1 = vmul.f32 %v5446_v39, %v5812_v5  ;;  %v8292_v38 = vld [vmem:[#allocation47_spill] sm:$0xff] }
 0x140   : > { %v1185_v15 = vmul.f32 %v5254_v41, %v1091_v52  ;;  %563 = vperm.xlu1 %4796, %v5816_v55   ;;  %v1698_v2 = vadd.f32 %v1666_v12, %v1630_v50  ;;  %v1734_v51 = vmul.f32 %v5417_v13, %v5818_v47  ;;  %v1360_v28 = vmul.f32 %v5392_v61, %v5709_v3  ;;  %v707_v50 = vpop.permute.xlu0 %706  ;;  %v4812_v52 = vld [vmem:[%s4922_s14 + $0xd0] sm:$0xff] }
 0x141   : > { %v1250_v8 = vmax.f32 %v1218_v16, 0.0  ;;  %v1937_v24 = vadd.f32 %v8291_v35, %v1869_v14  ;;  %v1459_v30 = vadd.f32 %v1427_v25, %v1391_v4  ;;  %v1428_v22 = vmul.f32 %v5425_v42, %v5772_v34  ;;  %v5880_v35 = vld [vmem:[#allocation2 + $0xcf] sm:$0xff] }
 0x142   : > { %v1217_v11 = vadd.f32 %v1185_v15, %v1021_v56  ;;  %v1766_v54 = vadd.f32 %v1734_v51, %v1698_v2  ;;  %v1838_v21 = vmul.f32 %v5428_v58, %v5729_v6  ;;  %v1392_v60 = vadd.f32 %v5442_v23, %v1360_v28  ;;  %v5871_v15 = vld [vmem:[#allocation2 + $0xc8] sm:$0xff] }
 0x143   : > { %1286 = vst.msk [vmem:[#allocation2 + $0xf0] sm:$0xff] %vm365_vm0, %v1250_v8  ;;  %v2005_v3 = vadd.f32 %v1973_v32, %v1937_v24  ;;  %v1527_v33 = vadd.f32 %v1495_v1, %v1459_v30  ;;  %v1907_v27 = vmul.f32 %v5432_v62, %v5796_v0  ;;  %v1496_v48 = vmul.f32 %v5446_v39, %v5839_v9  ;;  %v711_v56 = vpop.permute.xlu1 %710  ;;  %v5882_v30 = vld [vmem:[#allocation2 + $0xb1] sm:$0xff] }
 0x144   : > { %v1249_v18 = vmax.f32 %v1217_v11, 0.0  ;;  %v1870_v57 = vadd.f32 %v1838_v21, %v1766_v54  ;;  %v1906_v6 = vmul.f32 %v5432_v62, %v5764_v31  ;;  %4797 = vset.pattern.permute.xlu1 %v8239_v44  ;;  %v1460_v12 = vadd.f32 %v1428_v22, %v1392_v60 }
 0x145   : > { %v2037_v32 = vmax.f32 %v2005_v3, 0.0  ;;  %v1974_v25 = vmul.f32 %v5495_v59, %v5846_v49  ;;  %v1631_v16 = vadd.f32 %v8292_v38, %v1527_v33  ;;  %950 = vperm.xlu1 %4797, %v4812_v52   ;;  %v1601_v7 = vmul.f32 %v5409_v45, %v5776_v46  ;;  %v8294_v38 = vld [vmem:[#allocation30_spill] sm:$0xff] }
 0x146   : > { %1285 = vst.msk [vmem:[#allocation2 + $0xe8] sm:$0xff] %vm365_vm0, %v1249_v18  ;;  %v1938_v14 = vadd.f32 %v1906_v6, %v1870_v57  ;;  %v1735_v4 = vmul.f32 %v5417_v13, %v5852_v37  ;;  %4643 = vmatprep.mubr.msk.f32.mxu0 %vm365_vm0, %v1249_v18  ;;  %v1528_v1 = vadd.f32 %v1496_v48, %v1460_v12  ;;  %v8293_v6 = vld [vmem:[#allocation42_spill] sm:$0xff]  ;;  %v5906_v12 = vld [vmem:[#allocation2 + $0xc9] sm:$0xff] }
 0x147   : > { %v1600_v2 = vmul.f32 %v5409_v45, %v5737_v19  ;;  %4684 = vmatmul.mubr.msk.f32.gmra.mxu1 %vm365_vm0, %v2037_v32  ;;  %v1699_v51 = vadd.f32 %v1667_v63, %v1631_v16  ;;  %4644 = vmatmul.mubr.msk.f32.gmra.mxu0 %vm365_vm0, %v1250_v8  ;;  %v795_v46 = vmul.f32 %v5257_v43, %v707_v50 }
 0x148   : > { %v1668_v28 = vmul.f32 %v5413_v29, %v5818_v47  ;;  %v2006_v24 = vadd.f32 %v1974_v25, %v1938_v14  ;;  %v1361_v11 = vmul.f32 %v5392_v61, %v5748_v20  ;;  %v1429_v19 = vmul.f32 %v5425_v42, %v5812_v5  ;;  %v903_v54 = vpop.permute.xlu1 %902 }
 0x149   : > { %v1632_v22 = vadd.f32 %v1600_v2, %v1528_v1  ;;  %v796_v63 = vmul.f32 %v5257_v43, %v711_v56  ;;  %v1767_v8 = vadd.f32 %v1735_v4, %v1699_v51  ;;  %954 = vperm.xlu1 %4797, %v5804_v53   ;;  %v1736_v21 = vmul.f32 %v5417_v13, %v5871_v15 }
 0x14a   : > { %v5894_v60 = vmul.f32 %v5428_v58, %v5796_v0  ;;  %v2038_v3 = vmax.f32 %v2006_v24, 0.0  ;;  %v1393_v20 = vadd.f32 %v5442_v23, %v1361_v11  ;;  %v1497_v48 = vmul.f32 %v5446_v39, %v5880_v35 }
 0x14b   : > { %v1700_v33 = vadd.f32 %v1668_v28, %v1632_v22  ;;  %v1871_v18 = vadd.f32 %v5673_v40, %v1767_v8  ;;  %v1975_v57 = vmul.f32 %v5495_v59, %v5882_v30  ;;  %v827_v56 = vadd.f32 %v795_v46, %v8293_v6 }
 0x14c   : > { %v1840_v50 = vmul.f32 %v5428_v58, %v5764_v31  ;;  %4686 = vmatprep.mubr.msk.f32.mxu1 %vm365_vm0, %v2038_v3  ;;  %v1908_v32 = vmul.f32 %v5432_v62, %v5846_v49  ;;  %v1461_v25 = vadd.f32 %v1429_v19, %v1393_v20  ;;  %v1362_v40 = vmul.f32 %v5392_v61, %v5772_v34  ;;  %v907_v31 = vpop.permute.xlu1 %906  ;;  %v5921_v34 = vld [vmem:[#allocation2 + $0xd0] sm:$0xff] }
 0x14d   : > { %v1768_v0 = vadd.f32 %v1736_v21, %v1700_v33  ;;  %v828_v16 = vadd.f32 %v796_v63, %v8294_v38  ;;  %v1939_v52 = vadd.f32 %v1907_v27, %v1871_v18  ;;  %v991_v14 = vmul.f32 %v5251_v36, %v903_v54  ;;  %4798 = vset.pattern.permute.xlu1 %v8238_v10  ;;  %v5915_v4 = vld [vmem:[#allocation2 + $0xe7] sm:$0xff] }
 0x14e   : > { %v1430_v1 = vmul.f32 %v5425_v42, %v5839_v9  ;;  %v992_v2 = vmul.f32 %v5251_v36, %v907_v31  ;;  %762 = vperm.xlu1 %4798, %v5816_v55   ;;  %v1529_v46 = vadd.f32 %v1497_v48, %v1461_v25  ;;  %v1394_v27 = vadd.f32 %v5442_v23, %v1362_v40  ;;  %v8295_v48 = vld [vmem:[#allocation34_spill] sm:$0xff]  ;;  %v5943_v25 = vld [vmem:[#allocation2 + $0xe8] sm:$0xff] }
 0x14f   : > { %v1872_v51 = vadd.f32 %v1840_v50, %v1768_v0  ;;  %v2007_v28 = vadd.f32 %v1975_v57, %v1939_v52  ;;  %v1976_v24 = vmul.f32 %v5495_v59, %v5906_v12  ;;  %v1669_v22 = vmul.f32 %v5413_v29, %v5852_v37  ;;  %v5936_v50 = vld [vmem:[%s4922_s14 + $0xe8] sm:$0xff] }
 0x150   : > { %v1498_v11 = vmul.f32 %v5446_v39, %v5915_v4  ;;  %v1024_v19 = vadd.f32 %v992_v2, %v828_v16  ;;  %v1633_v8 = vadd.f32 %v1601_v7, %v1529_v46  ;;  %v1462_v54 = vadd.f32 %v1430_v1, %v1394_v27  ;;  %v5939_v7 = vld [vmem:[#allocation2 + $0xef] sm:$0xff] }
 0x151   : > { %v1940_v63 = vadd.f32 %v1908_v32, %v1872_v51  ;;  %v2039_v21 = vmax.f32 %v2007_v28, 0.0  ;;  %v1023_v3 = vadd.f32 %v991_v14, %v827_v56  ;;  %v1737_v33 = vmul.f32 %v5417_v13, %v5921_v34  ;;  %v1099_v0 = vpop.permute.xlu1 %1098  ;;  %v5951_v1 = vld [vmem:[#allocation2 + $0xd1] sm:$0xff] }
 0x152   : > { %v1602_v20 = vmul.f32 %v5409_v45, %v5818_v47  ;;  %v1220_v18 = vadd.f32 %v8295_v48, %v1024_v19  ;;  %v1701_v6 = vadd.f32 %v1669_v22, %v1633_v8  ;;  %766 = vperm.xlu1 %4798, %v5936_v50   ;;  %v1530_v32 = vadd.f32 %v1498_v11, %v1462_v54  ;;  %v715_v19 = vpop.permute.xlu0 %714  ;;  %v5974_v48 = vld [vmem:[%s8143_s2] ss:$0 sm:$0xff] }
 0x153   : > { %v2008_v57 = vadd.f32 %v1976_v24, %v1940_v63  ;;  %4687 = vmatmul.mubr.msk.f32.gmra.mxu1 %vm365_vm0, %v2039_v21  ;;  %v1187_v56 = vmul.f32 %v5254_v41, %v1099_v0  ;;  %v1670_v47 = vmul.f32 %v5413_v29, %v5871_v15  ;;  %v1363_v40 = vmul.f32 %v5392_v61, %v5812_v5 }
 0x154   : > { %v1431_v38 = vmul.f32 %v5425_v42, %v5880_v35  ;;  %v1252_v16 = vmax.f32 %v1220_v18, 0.0  ;;  %v1769_v14 = vadd.f32 %v1737_v33, %v1701_v6  ;;  %v1634_v31 = vadd.f32 %v1602_v20, %v1530_v32  ;;  %v8297_v33 = vld [vmem:[#allocation17_spill] sm:$0xff] }
 0x155   : > { %v2040_v52 = vmax.f32 %v2008_v57, 0.0  ;;  %v1909_v2 = vmul.f32 %v5432_v62, %v5882_v30  ;;  %v1219_v51 = vadd.f32 %v1187_v56, %v1023_v3  ;;  %v1395_v46 = vadd.f32 %v5442_v23, %v1363_v40  ;;  %v8296_v3 = vld [vmem:[#allocation4_spill] sm:$0xff]  ;;  %v5988_v40 = vld [vmem:[#allocation2 + $0xf0] sm:$0xff] }
 0x156   : > { %v1499_v27 = vmul.f32 %v5446_v39, %v5939_v7  ;;  %1288 = vst.msk [vmem:[#allocation2 + $0x110] sm:$0xff] %vm365_vm0, %v1252_v16  ;;  %v1873_v5 = vadd.f32 %v5894_v60, %v1769_v14  ;;  %4800 = vset.pattern.permute.xlu1 %v8237_v17  ;;  %v1702_v28 = vadd.f32 %v1670_v47, %v1634_v31  ;;  %v719_v11 = vpop.permute.xlu1 %718  ;;  %v5980_v57 = vld [vmem:[#allocation2 + $0xe9] sm:$0xff] }
 0x157   : > { %4689 = vmatprep.mubr.msk.f32.mxu1 %vm365_vm0, %v2040_v52  ;;  %v1738_v24 = vmul.f32 %v5417_v13, %v5943_v25  ;;  %v1251_v22 = vmax.f32 %v1219_v51, 0.0  ;;  %1150 = vperm.xlu1 %4800, %v5804_v53   ;;  %v1463_v63 = vadd.f32 %v1431_v38, %v1395_v46  ;;  %v1977_v54 = vmul.f32 %v5495_v59, %v5951_v1  ;;  %v8298_v53 = vld [vmem:[#allocation43_spill] sm:$0xff] }
 0x158   : > { %v1941_v8 = vadd.f32 %v1909_v2, %v1873_v5  ;;  %v1842_v60 = vmul.f32 %v5428_v58, %v5846_v49  ;;  %v602_v20 = vmul.f32 %v8297_v33, %v8296_v3  ;;  %v633_v18 = vadd.f32 %v5974_v48, %v8298_v53 }
 0x159   : > { %v1770_v21 = vadd.f32 %v1738_v24, %v1702_v28  ;;  %1287 = vst.msk [vmem:[#allocation2 + $0x108] sm:$0xff] %vm365_vm0, %v1251_v22  ;;  %4646 = vmatprep.mubr.msk.f32.mxu0 %vm365_vm0, %v1251_v22  ;;  %v1531_v6 = vadd.f32 %v1499_v27, %v1463_v63  ;;  %v1603_v49 = vmul.f32 %v5409_v45, %v5852_v37  ;;  %v6007_v63 = vld [vmem:[#allocation2 + $0xf1] sm:$0xff] }
 0x15a   : > { %v2009_v0 = vadd.f32 %v1977_v54, %v1941_v8  ;;  %4647 = vmatmul.mubr.msk.f32.gmra.mxu0 %vm365_vm0, %v1252_v16  ;;  %v797_v32 = vmul.f32 %v5257_v43, %v715_v19  ;;  %v1910_v47 = vmul.f32 %v5432_v62, %v5906_v12  ;;  %v1671_v52 = vmul.f32 %v5413_v29, %v5921_v34 }
 0x15b   : > { %v1874_v56 = vadd.f32 %v1842_v60, %v1770_v21  ;;  %4802 = vset.pattern.permute.xlu1 %v8239_v44  ;;  %v1635_v38 = vadd.f32 %v1603_v49, %v1531_v6  ;;  %v1364_v37 = vmul.f32 %v5392_v61, %v5839_v9  ;;  %v798_v16 = vmul.f32 %v5257_v43, %v719_v11  ;;  %v911_v31 = vpop.permute.xlu1 %910  ;;  %v8299_v9 = vld [vmem:[#allocation7_spill] sm:$0xff]  ;;  %v6023_v49 = vld [vmem:[%s4922_s14 + $0xf8] sm:$0xff] }
 0x15c   : > { %v2041_v14 = vmax.f32 %v2009_v0, 0.0  ;;  %958 = vperm.xlu1 %4802, %v5816_v55   ;;  %v1978_v51 = vmul.f32 %v5495_v59, %v5980_v57  ;;  %v1739_v27 = vmul.f32 %v5417_v13, %v5988_v40  ;;  %v1432_v5 = vmul.f32 %v5425_v42, %v5915_v4 }
 0x15d   : > { %v1942_v2 = vadd.f32 %v1910_v47, %v1874_v56  ;;  %v1703_v46 = vadd.f32 %v1671_v52, %v1635_v38  ;;  %v634_v28 = vadd.f32 %v5974_v48, %v602_v20  ;;  %v1190_v24 = vmul.f32 %v5254_v41, %v8299_v9 }
 0x15e   : > { %4690 = vmatmul.mubr.msk.f32.gmra.mxu1 %vm365_vm0, %v2041_v14  ;;  %v829_v22 = vadd.f32 %v797_v32, %v633_v18  ;;  %v1843_v8 = vmul.f32 %v5428_v58, %v5882_v30  ;;  %v1396_v54 = vadd.f32 %v5442_v23, %v1364_v37  ;;  %v1365_v21 = vmul.f32 %v5392_v61, %v5880_v35 }
 0x15f   : > { %v2010_v11 = vadd.f32 %v1978_v51, %v1942_v2  ;;  %v1771_v19 = vadd.f32 %v1739_v27, %v1703_v46  ;;  %v830_v60 = vadd.f32 %v798_v16, %v634_v28  ;;  %v915_v3 = vpop.permute.xlu1 %914  ;;  %v1911_v53 = vmul.f32 %v5432_v62, %v5951_v1 }
 0x160   : > { %4803 = vset.pattern.permute.xlu1 %v8289_v26  ;;  %v6017_v18 = vld [vmem:[#allocation2 + $0x107] sm:$0xff]  ;;  %v1433_v6 = vmul.f32 %v5425_v42, %v5939_v7  ;;  %v994_v30 = vmul.f32 %v5251_v36, %v915_v3  ;;  %v1464_v0 = vadd.f32 %v1432_v5, %v1396_v54  ;;  %v6028_v32 = vld [vmem:[#allocation2 + $0x10f] sm:$0xff]  ;;  %v993_v56 = vmul.f32 %v5251_v36, %v911_v31 }
 0x161   : > { %v2042_v20 = vmax.f32 %v2010_v11, 0.0  ;;  %578 = vperm.xlu1 %4803, %v6023_v49   ;;  %v1875_v35 = vadd.f32 %v1843_v8, %v1771_v19  ;;  %v1500_v26 = vmul.f32 %v5446_v39, %v6017_v18  ;;  %v1979_v47 = vmul.f32 %v5495_v59, %v6007_v63  ;;  %v6039_v51 = vld [vmem:[#allocation2 + $0x108] sm:$0xff]  ;;  %v6046_v19 = vld [vmem:[%s4922_s14 + $0xf0] sm:$0xff]  ;;  %s4854_s14 = smov 112  }
 0x162   : > { %v1397_v38 = vadd.f32 %v5442_v23, %v1365_v21  ;;  %v1501_v52 = vmul.f32 %v5446_v39, %v6028_v32  ;;  %v1026_v37 = vadd.f32 %v994_v30, %v830_v60  ;;  %v1604_v2 = vmul.f32 %v5409_v45, %v5871_v15  ;;  %v6053_v60 = vld [vmem:[#allocation2 + $0x110] sm:$0xff] }
 0x163   : > { %4692 = vmatprep.mubr.msk.f32.mxu1 %vm365_vm0, %v2042_v20  ;;  %v1943_v14 = vadd.f32 %v1911_v53, %v1875_v35  ;;  %v1532_v16 = vadd.f32 %v1500_v26, %v1464_v0  ;;  %v1672_v23 = vmul.f32 %v5413_v29, %v5943_v25  ;;  %v1025_v9 = vadd.f32 %v993_v56, %v829_v22  ;;  %v6062_v35 = vld [vmem:[#allocation2 + $0x109] sm:$0xff] }
 0x164   : > { %v1465_v31 = vadd.f32 %v1433_v6, %v1397_v38  ;;  %v1222_v46 = vadd.f32 %v1190_v24, %v1026_v37  ;;  %v1107_v5 = vpop.permute.xlu1 %1106  ;;  %v1605_v8 = vmul.f32 %v5409_v45, %v5921_v34  ;;  %v1673_v20 = vmul.f32 %v5413_v29, %v5988_v40  ;;  %v8300_v38 = vld [vmem:[#allocation22_spill] sm:$0xff] }
 0x165   : > { %v2011_v27 = vadd.f32 %v1979_v47, %v1943_v14  ;;  %4804 = vset.pattern.permute.xlu1 %v8238_v10  ;;  %v1636_v28 = vadd.f32 %v1604_v2, %v1532_v16  ;;  %v1189_v11 = vmul.f32 %v5254_v41, %v1107_v5  ;;  %v1740_v10 = vmul.f32 %v5417_v13, %v6039_v51  ;;  %v6078_v16 = vld [vmem:[#allocation2 + $0x111] sm:$0xff] }
 0x166   : > { %770 = vperm.xlu1 %4804, %v6046_v19   ;;  %v1533_v15 = vadd.f32 %v1501_v52, %v1465_v31  ;;  %v1254_v24 = vmax.f32 %v1222_v46, 0.0  ;;  %v1844_v34 = vmul.f32 %v5428_v58, %v5906_v12  ;;  %v1741_v26 = vmul.f32 %v5417_v13, %v6053_v60  ;;  %v8301_v31 = vld [vmem:[#allocation5_spill] sm:$0xff] }
 0x167   : > { %v2043_v54 = vmax.f32 %v2011_v27, 0.0  ;;  %v1704_v21 = vadd.f32 %v1672_v23, %v1636_v28  ;;  %v1221_v3 = vadd.f32 %v1189_v11, %v1025_v9  ;;  %v1912_v47 = vmul.f32 %v5432_v62, %v5980_v57  ;;  %v723_v11 = vpop.permute.xlu0 %722 }
 0x168   : > { %v1637_v22 = vadd.f32 %v1605_v8, %v1533_v15  ;;  %1290 = vst.msk [vmem:[#allocation2 + $0x130] sm:$0xff] %vm365_vm0, %v1254_v24  ;;  %v603_v52 = vmul.f32 %v8297_v33, %v8300_v38  ;;  %v1845_v37 = vmul.f32 %v5428_v58, %v5951_v1  ;;  %v1366_v2 = vmul.f32 %v5392_v61, %v5915_v4  ;;  %v6096_v8 = vld [vmem:[%s8144_s3 + $0x8] ss:$0 sm:$0xff] }
 0x169   : > { %4693 = vmatmul.mubr.msk.f32.gmra.mxu1 %vm365_vm0, %v2043_v54  ;;  %v1772_v53 = vadd.f32 %v1740_v10, %v1704_v21  ;;  %v1253_v6 = vmax.f32 %v1221_v3, 0.0  ;;  %v727_v30 = vpop.permute.xlu1 %726  ;;  %v604_v46 = vmul.f32 %v8297_v33, %v8301_v31  ;;  %v1913_v5 = vmul.f32 %v5432_v62, %v6007_v63 }
 0x16a   : > { %4805 = vset.pattern.permute.xlu1 %v8237_v17  ;;  %v1705_v0 = vadd.f32 %v1673_v20, %v1637_v22  ;;  %v1434_v23 = vmul.f32 %v5425_v42, %v6017_v18  ;;  %v635_v9 = vadd.f32 %v5974_v48, %v603_v52  ;;  %v800_v4 = vmul.f32 %v5257_v43, %v727_v30 }
 0x16b   : > { %1154 = vperm.xlu1 %4805, %v5816_v55   ;;  %v1876_v56 = vadd.f32 %v1844_v34, %v1772_v53  ;;  %1289 = vst.msk [vmem:[#allocation2 + $0x128] sm:$0xff] %vm365_vm0, %v1253_v6  ;;  %4649 = vmatprep.mubr.msk.f32.mxu0 %vm365_vm0, %v1253_v6  ;;  %v1980_v55 = vmul.f32 %v5495_v59, %v6062_v35 }
 0x16c   : > { %v1773_v12 = vadd.f32 %v1741_v26, %v1705_v0  ;;  %4650 = vmatmul.mubr.msk.f32.gmra.mxu0 %vm365_vm0, %v1254_v24  ;;  %v1367_v59 = vmul.f32 %v5392_v61, %v5939_v7  ;;  %v799_v24 = vmul.f32 %v5257_v43, %v723_v11  ;;  %v6104_v7 = vld [vmem:[%s8145_s4] ss:$0 sm:$0xff]  ;;  %v1435_v10 = vmul.f32 %v5425_v42, %v6028_v32 }
 0x16d   : > { %v1944_v14 = vadd.f32 %v1912_v47, %v1876_v56  ;;  %v1398_v21 = vadd.f32 %v6104_v7, %v1366_v2  ;;  %v636_v3 = vadd.f32 %v5974_v48, %v604_v46  ;;  %v1606_v31 = vmul.f32 %v5409_v45, %v5943_v25 }
 0x16e   : > { %v1877_v27 = vadd.f32 %v1845_v37, %v1773_v12  ;;  %v919_v1 = vpop.permute.xlu1 %918  ;;  %v1399_v6 = vadd.f32 %v6104_v7, %v1367_v59  ;;  %v8302_v37 = vld [vmem:[#allocation9_spill] sm:$0xff]  ;;  %v1674_v59 = vmul.f32 %v5413_v29, %v6039_v51 }
 0x16f   : > { %1158 = vperm.xlu1 %4805, %v5936_v50   ;;  %v2012_v28 = vadd.f32 %v1980_v55, %v1944_v14  ;;  %v1981_v50 = vmul.f32 %v6096_v8, %v6078_v16  ;;  %v1466_v34 = vadd.f32 %v1434_v23, %v1398_v21  ;;  %v832_v30 = vadd.f32 %v800_v4, %v636_v3 }
 0x170   : > { %v1945_v15 = vadd.f32 %v1913_v5, %v1877_v27  ;;  %v995_v38 = vmul.f32 %v5251_v36, %v919_v1  ;;  %v1467_v52 = vadd.f32 %v1435_v10, %v1399_v6  ;;  %v1192_v14 = vmul.f32 %v5254_v41, %v8302_v37 }
 0x171   : > { %v2044_v54 = vmax.f32 %v2012_v28, 0.0  ;;  %v1607_v5 = vmul.f32 %v5409_v45, %v5988_v40  ;;  %v1847_v6 = vmul.f32 %v5428_v58, %v6007_v63  ;;  %v1368_v37 = vmul.f32 %v5392_v61, %v6017_v18 }
 0x172   : > { %v2013_v22 = vadd.f32 %v1981_v50, %v1945_v15  ;;  %v923_v20 = vpop.permute.xlu1 %922  ;;  %v6112_v53 = vld [vmem:[#allocation2 + $0x127] sm:$0xff]  ;;  %v6119_v47 = vld [vmem:[#allocation2 + $0x12f] sm:$0xff]  ;;  %v1675_v15 = vmul.f32 %v5413_v29, %v6053_v60 }
 0x173   : > { %4807 = vset.pattern.permute.xlu1 %v8239_v44  ;;  %4695 = vmatprep.mubr.msk.f32.mxu1 %vm365_vm0, %v2044_v54  ;;  %v996_v0 = vmul.f32 %v5251_v36, %v923_v20  ;;  %v1502_v56 = vmul.f32 %v5446_v39, %v6112_v53  ;;  %v831_v44 = vadd.f32 %v799_v24, %v635_v9  ;;  %v6129_v46 = vld [vmem:[#allocation2 + $0x128] sm:$0xff]  ;;  %v6136_v9 = vld [vmem:[#allocation2 + $0x130] sm:$0xff] }
 0x174   : > { %966 = vperm.xlu1 %4807, %v6046_v19   ;;  %v2045_v26 = vmax.f32 %v2013_v22, 0.0  ;;  %v1503_v12 = vmul.f32 %v5446_v39, %v6119_v47  ;;  %v1743_v21 = vmul.f32 %v5417_v13, %v6136_v9  ;;  %v6150_v20 = vld [vmem:[#allocation2 + $0x129] sm:$0xff] }
 0x175   : > { %v1028_v55 = vadd.f32 %v996_v0, %v832_v30  ;;  %v1534_v2 = vadd.f32 %v1502_v56, %v1466_v34  ;;  %v1027_v4 = vadd.f32 %v995_v38, %v831_v44  ;;  %v1914_v0 = vmul.f32 %v5432_v62, %v6062_v35  ;;  %v8303_v44 = vld [vmem:[#allocation6_spill] sm:$0xff] }
 0x176   : > { %4696 = vmatmul.mubr.msk.f32.gmra.mxu1 %vm365_vm0, %v2045_v26  ;;  %v1535_v27 = vadd.f32 %v1503_v12, %v1467_v52  ;;  %v6156_v26 = vld [vmem:[#allocation2 + $0x131] sm:$0xff]  ;;  %v1982_v63 = vmul.f32 %v6096_v8, %v6150_v20  ;;  %v606_v38 = vmul.f32 %v8297_v33, %v8303_v44 }
 0x177   : > { %v1224_v1 = vadd.f32 %v1192_v14, %v1028_v55  ;;  %v1115_v28 = vpop.permute.xlu1 %1114  ;;  %v1638_v23 = vadd.f32 %v1606_v31, %v1534_v2  ;;  %v1983_v12 = vmul.f32 %v6096_v8, %v6156_v26  ;;  %v8304_v14 = vld [vmem:[#allocation23_spill] sm:$0xff] }
 0x178   : > { %4808 = vset.pattern.permute.xlu1 %v8237_v17  ;;  %v1191_v11 = vmul.f32 %v5254_v41, %v1115_v28  ;;  %v1639_v25 = vadd.f32 %v1607_v5, %v1535_v27  ;;  %v1742_v17 = vmul.f32 %v5417_v13, %v6129_v46  ;;  %v605_v55 = vmul.f32 %v8297_v33, %v8304_v14 }
 0x179   : > { %1162 = vperm.xlu1 %4808, %v6046_v19   ;;  %v1256_v40 = vmax.f32 %v1224_v1, 0.0  ;;  %v1706_v50 = vadd.f32 %v1674_v59, %v1638_v23  ;;  %v1846_v19 = vmul.f32 %v5428_v58, %v5980_v57  ;;  %v1369_v27 = vmul.f32 %v5392_v61, %v6028_v32 }
 0x17a   : > { %v1223_v24 = vadd.f32 %v1191_v11, %v1027_v4  ;;  %v1707_v54 = vadd.f32 %v1675_v15, %v1639_v25  ;;  %v1436_v28 = vmul.f32 %v5425_v42, %v6112_v53  ;;  %v1437_v59 = vmul.f32 %v5425_v42, %v6119_v47  ;;  %v731_v4 = vpop.permute.xlu0 %730 }
 0x17b   : > { %1292 = vst.msk [vmem:[#allocation2 + $0x150] sm:$0xff] %vm365_vm0, %v1256_v40  ;;  %v1774_v10 = vadd.f32 %v1742_v17, %v1706_v50  ;;  %v638_v18 = vadd.f32 %v5974_v48, %v606_v38  ;;  %v1400_v25 = vadd.f32 %v6104_v7, %v1368_v37  ;;  %v637_v15 = vadd.f32 %v5974_v48, %v605_v55 }
 0x17c   : > { %v1255_v3 = vmax.f32 %v1223_v24, 0.0  ;;  %v735_v22 = vpop.permute.xlu1 %734  ;;  %v1775_v34 = vadd.f32 %v1743_v21, %v1707_v54  ;;  %v801_v32 = vmul.f32 %v5257_v43, %v731_v4  ;;  %v1401_v17 = vadd.f32 %v6104_v7, %v1369_v27 }
 0x17d   : > { %1166 = vperm.xlu1 %4808, %v6023_v49   ;;  %v1878_v30 = vadd.f32 %v1846_v19, %v1774_v10  ;;  %v1915_v49 = vmul.f32 %v5432_v62, %v6078_v16  ;;  %v802_v5 = vmul.f32 %v5257_v43, %v735_v22  ;;  %v1468_v21 = vadd.f32 %v1436_v28, %v1400_v25 }
 0x17e   : > { %1291 = vst.msk [vmem:[#allocation2 + $0x148] sm:$0xff] %vm365_vm0, %v1255_v3  ;;  %4652 = vmatprep.mubr.msk.f32.mxu0 %vm365_vm0, %v1255_v3  ;;  %v1879_v57 = vadd.f32 %v1847_v6, %v1775_v34  ;;  %v1469_v22 = vadd.f32 %v1437_v59, %v1401_v17  ;;  %v8305_v6 = vld [vmem:[#allocation11_spill] sm:$0xff]  ;;  %v1609_v38 = vmul.f32 %v5409_v45, %v6053_v60 }
 0x17f   : > { %4653 = vmatmul.mubr.msk.f32.gmra.mxu0 %vm365_vm0, %v1256_v40  ;;  %v1946_v56 = vadd.f32 %v1914_v0, %v1878_v30  ;;  %v834_v24 = vadd.f32 %v802_v5, %v638_v18  ;;  %v1194_v30 = vmul.f32 %v5254_v41, %v8305_v6  ;;  %v1676_v14 = vmul.f32 %v5413_v29, %v6129_v46 }
 0x180   : > { %v1947_v52 = vadd.f32 %v1915_v49, %v1879_v57  ;;  %v1608_v49 = vmul.f32 %v5409_v45, %v6039_v51  ;;  %v1677_v51 = vmul.f32 %v5413_v29, %v6136_v9  ;;  %v1848_v4 = vmul.f32 %v5428_v58, %v6062_v35 }
 0x181   : > { %v927_v2 = vpop.permute.xlu1 %926  ;;  %v2014_v31 = vadd.f32 %v1982_v63, %v1946_v56  ;;  %v833_v56 = vadd.f32 %v801_v32, %v637_v15  ;;  %v1917_v35 = vmul.f32 %v5432_v62, %v6156_v26 }
 0x182   : > { %v2015_v1 = vadd.f32 %v1983_v12, %v1947_v52  ;;  %v997_v3 = vmul.f32 %v5251_v36, %v927_v2  ;;  %v6207_v55 = vld [vmem:[#allocation2 + $0x150] sm:$0xff] }
 0x183   : > { %v2046_v23 = vmax.f32 %v2014_v31, 0.0  ;;  %v1745_v59 = vmul.f32 %v5417_v13, %v6207_v55 }
 0x184   : > { %v2047_v11 = vmax.f32 %v2015_v1, 0.0  ;;  %v1029_v2 = vadd.f32 %v997_v3, %v833_v56  ;;  %v8306_v3 = vld [vmem:[#allocation8_spill] sm:$0xff] }
 0x185   : > { %v931_v40 = vpop.permute.xlu1 %930  ;;  %4698 = vmatprep.mubr.msk.f32.mxu1 %vm365_vm0, %v2046_v23  ;;  %v6185_v50 = vld [vmem:[#allocation2 + $0x147] sm:$0xff]  ;;  %v6192_v19 = vld [vmem:[#allocation2 + $0x14f] sm:$0xff] }
 0x186   : > { %v998_v54 = vmul.f32 %v5251_v36, %v931_v40  ;;  %4699 = vmatmul.mubr.msk.f32.gmra.mxu1 %vm365_vm0, %v2047_v11  ;;  %v1504_v10 = vmul.f32 %v5446_v39, %v6185_v50  ;;  %v1505_v34 = vmul.f32 %v5446_v39, %v6192_v19  ;;  %v6201_v63 = vld [vmem:[#allocation2 + $0x148] sm:$0xff]  ;;  %v1849_v40 = vmul.f32 %v5428_v58, %v6078_v16 }
 0x187   : > { %v1744_v60 = vmul.f32 %v5417_v13, %v6201_v63  ;;  %v6219_v15 = vld [vmem:[#allocation2 + $0x149] sm:$0xff] }
 0x188   : > { %v1030_v0 = vadd.f32 %v998_v54, %v834_v24  ;;  %v1536_v57 = vadd.f32 %v1504_v10, %v1468_v21  ;;  %v1537_v44 = vadd.f32 %v1505_v34, %v1469_v22  ;;  %v1916_v24 = vmul.f32 %v5432_v62, %v6150_v20  ;;  %v6225_v54 = vld [vmem:[#allocation2 + $0x151] sm:$0xff] }
 0x189   : > { %v1984_v16 = vmul.f32 %v6096_v8, %v6219_v15  ;;  %v608_v22 = vmul.f32 %v8297_v33, %v8306_v3  ;;  %v1985_v6 = vmul.f32 %v6096_v8, %v6225_v54 }
 0x18a   : > { %v1226_v52 = vadd.f32 %v1194_v30, %v1030_v0  ;;  %v1123_v12 = vpop.permute.xlu1 %1122  ;;  %v1640_v37 = vadd.f32 %v1608_v49, %v1536_v57  ;;  %v1641_v27 = vadd.f32 %v1609_v38, %v1537_v44  ;;  %v1370_v30 = vmul.f32 %v5392_v61, %v6112_v53  ;;  %v8307_v0 = vld [vmem:[#allocation24_spill] sm:$0xff] }
 0x18b   : > { %v1193_v31 = vmul.f32 %v5254_v41, %v1123_v12  ;;  %v607_v57 = vmul.f32 %v8297_v33, %v8307_v0  ;;  %v1371_v44 = vmul.f32 %v5392_v61, %v6119_v47  ;;  %v1438_v12 = vmul.f32 %v5425_v42, %v6185_v50 }
 0x18c   : > { %v1258_v5 = vmax.f32 %v1226_v52, 0.0  ;;  %v1708_v1 = vadd.f32 %v1676_v14, %v1640_v37  ;;  %v1709_v23 = vadd.f32 %v1677_v51, %v1641_v27  ;;  %v1439_v14 = vmul.f32 %v5425_v42, %v6192_v19 }
 0x18d   : > { %v1225_v28 = vadd.f32 %v1193_v31, %v1029_v2  ;;  %v640_v53 = vadd.f32 %v5974_v48, %v608_v22  ;;  %v739_v2 = vpop.permute.xlu0 %738  ;;  %v1402_v27 = vadd.f32 %v6104_v7, %v1370_v30  ;;  %v639_v51 = vadd.f32 %v5974_v48, %v607_v57 }
 0x18e   : > { %1294 = vst.msk [vmem:[#allocation2 + $0x170] sm:$0xff] %vm365_vm0, %v1258_v5  ;;  %v1776_v18 = vadd.f32 %v1744_v60, %v1708_v1  ;;  %v1777_v32 = vadd.f32 %v1745_v59, %v1709_v23  ;;  %v803_v47 = vmul.f32 %v5257_v43, %v739_v2  ;;  %v1403_v60 = vadd.f32 %v6104_v7, %v1371_v44 }
 0x18f   : > { %v1257_v11 = vmax.f32 %v1225_v28, 0.0  ;;  %v743_v25 = vpop.permute.xlu1 %742  ;;  %v1470_v59 = vadd.f32 %v1438_v12, %v1402_v27  ;;  %v1611_v22 = vmul.f32 %v5409_v45, %v6136_v9  ;;  %v1678_v0 = vmul.f32 %v5413_v29, %v6201_v63 }
 0x190   : > { %v1880_v17 = vadd.f32 %v1848_v4, %v1776_v18  ;;  %v1881_v21 = vadd.f32 %v1849_v40, %v1777_v32  ;;  %v804_v38 = vmul.f32 %v5257_v43, %v743_v25  ;;  %v1471_v25 = vadd.f32 %v1439_v14, %v1403_v60  ;;  %v8308_v40 = vld [vmem:[#allocation14_spill] sm:$0xff] }
 0x191   : > { %1293 = vst.msk [vmem:[#allocation2 + $0x168] sm:$0xff] %vm365_vm0, %v1257_v11  ;;  %4655 = vmatprep.mubr.msk.f32.mxu0 %vm365_vm0, %v1257_v11  ;;  %v1850_v2 = vmul.f32 %v5428_v58, %v6150_v20  ;;  %v1919_v20 = vmul.f32 %v5432_v62, %v6225_v54 }
 0x192   : > { %4656 = vmatmul.mubr.msk.f32.gmra.mxu0 %vm365_vm0, %v1258_v5  ;;  %v1948_v10 = vadd.f32 %v1916_v24, %v1880_v17  ;;  %v1949_v34 = vadd.f32 %v1917_v35, %v1881_v21  ;;  %v836_v28 = vadd.f32 %v804_v38, %v640_v53  ;;  %v1196_v17 = vmul.f32 %v5254_v41, %v8308_v40 }
 0x193   : > { %v1610_v35 = vmul.f32 %v5409_v45, %v6129_v46  ;;  %v1679_v46 = vmul.f32 %v5413_v29, %v6207_v55 }
 0x194   : > { %v935_v49 = vpop.permute.xlu1 %934  ;;  %v2016_v56 = vadd.f32 %v1984_v16, %v1948_v10  ;;  %v2017_v52 = vadd.f32 %v1985_v6, %v1949_v34  ;;  %v835_v10 = vadd.f32 %v803_v47, %v639_v51 }
 0x195   : > { %v999_v11 = vmul.f32 %v5251_v36, %v935_v49  ;;  %v6276_v57 = vld [vmem:[#allocation2 + $0x170] sm:$0xff] }
 0x196   : > { %v2048_v37 = vmax.f32 %v2016_v56, 0.0  ;;  %v2049_v31 = vmax.f32 %v2017_v52, 0.0  ;;  %v1747_v14 = vmul.f32 %v5417_v13, %v6276_v57 }
 0x197   : > { %v1031_v49 = vadd.f32 %v999_v11, %v835_v10  ;;  %v8309_v11 = vld [vmem:[#allocation10_spill] sm:$0xff] }
 0x198   : > { %v939_v5 = vpop.permute.xlu1 %938  ;;  %4701 = vmatprep.mubr.msk.f32.mxu1 %vm365_vm0, %v2048_v37  ;;  %v6254_v1 = vld [vmem:[#allocation2 + $0x167] sm:$0xff]  ;;  %v6261_v4 = vld [vmem:[#allocation2 + $0x16f] sm:$0xff] }
 0x199   : > { %v1000_v23 = vmul.f32 %v5251_v36, %v939_v5  ;;  %4702 = vmatmul.mubr.msk.f32.gmra.mxu1 %vm365_vm0, %v2049_v31  ;;  %v1506_v18 = vmul.f32 %v5446_v39, %v6254_v1  ;;  %v1507_v32 = vmul.f32 %v5446_v39, %v6261_v4  ;;  %v6270_v16 = vld [vmem:[#allocation2 + $0x168] sm:$0xff]  ;;  %v1851_v5 = vmul.f32 %v5428_v58, %v6156_v26 }
 0x19a   : > { %v1746_v9 = vmul.f32 %v5417_v13, %v6270_v16  ;;  %v6288_v51 = vld [vmem:[#allocation2 + $0x169] sm:$0xff] }
 0x19b   : > { %v1032_v24 = vadd.f32 %v1000_v23, %v836_v28  ;;  %v1538_v21 = vadd.f32 %v1506_v18, %v1470_v59  ;;  %v1539_v3 = vadd.f32 %v1507_v32, %v1471_v25  ;;  %v1918_v28 = vmul.f32 %v5432_v62, %v6219_v15  ;;  %v6294_v23 = vld [vmem:[#allocation2 + $0x171] sm:$0xff] }
 0x19c   : > { %v1986_v26 = vmul.f32 %v6096_v8, %v6288_v51  ;;  %v610_v25 = vmul.f32 %v8297_v33, %v8309_v11  ;;  %v1987_v40 = vmul.f32 %v6096_v8, %v6294_v23 }
 0x19d   : > { %v1228_v34 = vadd.f32 %v1196_v17, %v1032_v24  ;;  %v1131_v6 = vpop.permute.xlu1 %1130  ;;  %v1642_v30 = vadd.f32 %v1610_v35, %v1538_v21  ;;  %v1643_v44 = vadd.f32 %v1611_v22, %v1539_v3  ;;  %v1372_v17 = vmul.f32 %v5392_v61, %v6185_v50  ;;  %v8310_v24 = vld [vmem:[#allocation25_spill] sm:$0xff] }
 0x19e   : > { %v1195_v56 = vmul.f32 %v5254_v41, %v1131_v6  ;;  %v609_v21 = vmul.f32 %v8297_v33, %v8310_v24  ;;  %v1373_v3 = vmul.f32 %v5392_v61, %v6192_v19  ;;  %v1440_v6 = vmul.f32 %v5425_v42, %v6254_v1 }
 0x19f   : > { %v1260_v38 = vmax.f32 %v1228_v34, 0.0  ;;  %v1710_v52 = vadd.f32 %v1678_v0, %v1642_v30  ;;  %v1711_v37 = vadd.f32 %v1679_v46, %v1643_v44  ;;  %v1441_v0 = vmul.f32 %v5425_v42, %v6261_v4 }
 0x1a0   : > { %v1227_v12 = vadd.f32 %v1195_v56, %v1031_v49  ;;  %v642_v50 = vadd.f32 %v5974_v48, %v610_v25  ;;  %v747_v49 = vpop.permute.xlu0 %746  ;;  %v1404_v44 = vadd.f32 %v6104_v7, %v1372_v17  ;;  %v641_v46 = vadd.f32 %v5974_v48, %v609_v21 }
 0x1a1   : > { %1296 = vst.msk [vmem:[#allocation2 + $0x190] sm:$0xff] %vm365_vm0, %v1260_v38  ;;  %v1778_v53 = vadd.f32 %v1746_v9, %v1710_v52  ;;  %v1779_v47 = vadd.f32 %v1747_v14, %v1711_v37  ;;  %v805_v19 = vmul.f32 %v5257_v43, %v747_v49  ;;  %v1405_v9 = vadd.f32 %v6104_v7, %v1373_v3 }
 0x1a2   : > { %v1259_v31 = vmax.f32 %v1227_v12, 0.0  ;;  %v751_v27 = vpop.permute.xlu1 %750  ;;  %v1472_v14 = vadd.f32 %v1440_v6, %v1404_v44  ;;  %v1613_v25 = vmul.f32 %v5409_v45, %v6207_v55  ;;  %v1680_v24 = vmul.f32 %v5413_v29, %v6270_v16 }
 0x1a3   : > { %v1882_v60 = vadd.f32 %v1850_v2, %v1778_v53  ;;  %v1883_v59 = vadd.f32 %v1851_v5, %v1779_v47  ;;  %v806_v22 = vmul.f32 %v5257_v43, %v751_v27  ;;  %v1473_v27 = vadd.f32 %v1441_v0, %v1405_v9  ;;  %v8311_v5 = vld [vmem:[#allocation16_spill] sm:$0xff] }
 0x1a4   : > { %1295 = vst.msk [vmem:[#allocation2 + $0x188] sm:$0xff] %vm365_vm0, %v1259_v31  ;;  %4658 = vmatprep.mubr.msk.f32.mxu0 %vm365_vm0, %v1259_v31  ;;  %v1852_v49 = vmul.f32 %v5428_v58, %v6219_v15 }
 0x1a5   : > { %4659 = vmatmul.mubr.msk.f32.gmra.mxu0 %vm365_vm0, %v1260_v38  ;;  %v1950_v18 = vadd.f32 %v1918_v28, %v1882_v60  ;;  %v1951_v32 = vadd.f32 %v1919_v20, %v1883_v59  ;;  %v838_v12 = vadd.f32 %v806_v22, %v642_v50  ;;  %v1198_v60 = vmul.f32 %v5254_v41, %v8311_v5 }
 0x1a6   : > { %v1612_v20 = vmul.f32 %v5409_v45, %v6201_v63  ;;  %v1681_v63 = vmul.f32 %v5413_v29, %v6276_v57 }
 0x1a7   : > { %v943_v35 = vpop.permute.xlu1 %942  ;;  %v2018_v10 = vadd.f32 %v1986_v26, %v1950_v18  ;;  %v2019_v34 = vadd.f32 %v1987_v40, %v1951_v32  ;;  %v837_v18 = vadd.f32 %v805_v19, %v641_v46 }
 0x1a8   : > { %v1001_v31 = vmul.f32 %v5251_v36, %v943_v35  ;;  %v6345_v21 = vld [vmem:[#allocation2 + $0x190] sm:$0xff] }
 0x1a9   : > { %v2050_v30 = vmax.f32 %v2018_v10, 0.0  ;;  %v2051_v56 = vmax.f32 %v2019_v34, 0.0  ;;  %v1749_v0 = vmul.f32 %v5417_v13, %v6345_v21 }
 0x1aa   : > { %v1033_v35 = vadd.f32 %v1001_v31, %v837_v18  ;;  %v1375_v18 = vmul.f32 %v5392_v61, %v6261_v4 }
 0x1ab   : > { %v947_v38 = vpop.permute.xlu1 %946  ;;  %4704 = vmatprep.mubr.msk.f32.mxu1 %vm365_vm0, %v2050_v30  ;;  %v6323_v52 = vld [vmem:[#allocation2 + $0x187] sm:$0xff]  ;;  %v6330_v2 = vld [vmem:[#allocation2 + $0x18f] sm:$0xff] }
 0x1ac   : > { %v1002_v37 = vmul.f32 %v5251_v36, %v947_v38  ;;  %4705 = vmatmul.mubr.msk.f32.gmra.mxu1 %vm365_vm0, %v2051_v56  ;;  %v1508_v53 = vmul.f32 %v5446_v39, %v6323_v52  ;;  %v1509_v47 = vmul.f32 %v5446_v39, %v6330_v2  ;;  %v6339_v26 = vld [vmem:[#allocation2 + $0x188] sm:$0xff]  ;;  %v1853_v38 = vmul.f32 %v5428_v58, %v6225_v54 }
 0x1ad   : > { %v1748_v55 = vmul.f32 %v5417_v13, %v6339_v26  ;;  %v6359_v46 = vld [vmem:[#allocation2 + $0x189] sm:$0xff]  ;;  %v1407_v4 = vadd.f32 %v6104_v7, %v1375_v18 }
 0x1ae   : > { %v1034_v28 = vadd.f32 %v1002_v37, %v838_v12  ;;  %v1540_v59 = vadd.f32 %v1508_v53, %v1472_v14  ;;  %v1541_v11 = vadd.f32 %v1509_v47, %v1473_v27  ;;  %v1920_v12 = vmul.f32 %v5432_v62, %v6288_v51  ;;  %v6365_v37 = vld [vmem:[#allocation2 + $0x191] sm:$0xff]  ;;  %v755_v47 = vpop.permute.xlu0 %754 }
 0x1af   : > { %v1921_v14 = vmul.f32 %v5432_v62, %v6294_v23  ;;  %v8312_v53 = vld [vmem:[#allocation26_spill] sm:$0xff]  ;;  %v1988_v27 = vmul.f32 %v6096_v8, %v6359_v46 }
 0x1b0   : > { %v1230_v32 = vadd.f32 %v1198_v60, %v1034_v28  ;;  %v1139_v40 = vpop.permute.xlu1 %1138  ;;  %v1644_v17 = vadd.f32 %v1612_v20, %v1540_v59  ;;  %v1645_v3 = vadd.f32 %v1613_v25, %v1541_v11  ;;  %v611_v31 = vmul.f32 %v8297_v33, %v8312_v53 }
 0x1b1   : > { %v1197_v10 = vmul.f32 %v5254_v41, %v1139_v40  ;;  %v1989_v60 = vmul.f32 %v6096_v8, %v6365_v37  ;;  %v1374_v28 = vmul.f32 %v5392_v61, %v6254_v1  ;;  %v1442_v25 = vmul.f32 %v5425_v42, %v6323_v52 }
 0x1b2   : > { %v1262_v22 = vmax.f32 %v1230_v32, 0.0  ;;  %v1712_v34 = vadd.f32 %v1680_v24, %v1644_v17  ;;  %v1713_v30 = vadd.f32 %v1681_v63, %v1645_v3  ;;  %v643_v32 = vadd.f32 %v5974_v48, %v611_v31 }
 0x1b3   : > { %v1229_v6 = vadd.f32 %v1197_v10, %v1033_v35  ;;  %v807_v40 = vmul.f32 %v5257_v43, %v755_v47  ;;  %v1443_v24 = vmul.f32 %v5425_v42, %v6330_v2  ;;  %v1406_v1 = vadd.f32 %v6104_v7, %v1374_v28 }
 0x1b4   : > { %1298 = vst.msk [vmem:[#allocation2 + $0x1b0] sm:$0xff] %vm365_vm0, %v1262_v22  ;;  %v1780_v50 = vadd.f32 %v1748_v55, %v1712_v34  ;;  %v1781_v19 = vadd.f32 %v1749_v0, %v1713_v30  ;;  %v1682_v31 = vmul.f32 %v5413_v29, %v6339_v26 }
 0x1b5   : > { %v1261_v56 = vmax.f32 %v1229_v6, 0.0  ;;  %v1474_v63 = vadd.f32 %v1442_v25, %v1406_v1  ;;  %v839_v55 = vadd.f32 %v807_v40, %v643_v32  ;;  %v1475_v30 = vadd.f32 %v1443_v24, %v1407_v4  ;;  %v8314_v4 = vld [vmem:[#allocation13_spill] sm:$0xff] }
 0x1b6   : > { %v6357_v44 = vpop.permute.xlu1 %758  ;;  %v1884_v9 = vadd.f32 %v1852_v49, %v1780_v50  ;;  %v1885_v15 = vadd.f32 %v1853_v38, %v1781_v19  ;;  %v1614_v49 = vmul.f32 %v5409_v45, %v6270_v16  ;;  %v1683_v16 = vmul.f32 %v5413_v29, %v6345_v21 }
 0x1b7   : > { %1297 = vst.msk [vmem:[#allocation2 + $0x1a8] sm:$0xff] %vm365_vm0, %v1261_v56  ;;  %4661 = vmatprep.mubr.msk.f32.mxu0 %vm365_vm0, %v1261_v56  ;;  %v8313_v56 = vld [vmem:[#allocation21_spill] sm:$0xff] }
 0x1b8   : > { %4662 = vmatmul.mubr.msk.f32.gmra.mxu0 %vm365_vm0, %v1262_v22  ;;  %v1952_v54 = vadd.f32 %v1920_v12, %v1884_v9  ;;  %v1953_v5 = vadd.f32 %v1921_v14, %v1885_v15  ;;  %v1199_v19 = vmul.f32 %v5254_v41, %v8313_v56  ;;  %v1615_v15 = vmul.f32 %v5409_v45, %v6276_v57 }
 0x1ba   : > { %v2020_v20 = vadd.f32 %v1988_v27, %v1952_v54  ;;  %v2021_v11 = vadd.f32 %v1989_v60, %v1953_v5 }
 0x1bb   : > { %v6380_v59 = vpop.permute.xlu1 %563  ;;  %v6413_v54 = vld [vmem:[#allocation2 + $0x1b0] sm:$0xff] }
 0x1bc   : > { %v2052_v17 = vmax.f32 %v2020_v20, 0.0  ;;  %v2053_v35 = vmax.f32 %v2021_v11, 0.0  ;;  %v1751_v57 = vmul.f32 %v5417_v13, %v6413_v54  ;;  %v1854_v11 = vmul.f32 %v5428_v58, %v6288_v51  ;;  %v6433_v1 = vld [vmem:[#allocation2 + $0x1b1] sm:$0xff] }
 0x1bd   : > { %v612_v51 = vmul.f32 %v8297_v33, %v8314_v4  ;;  %v1856_v4 = vmul.f32 %v5428_v58, %v6359_v46 }
 0x1be   : > { %4707 = vmatprep.mubr.msk.f32.mxu1 %vm365_vm0, %v2052_v17  ;;  %v6392_v10 = vld [vmem:[#allocation2 + $0x1a7] sm:$0xff]  ;;  %v6398_v34 = vld [vmem:[#allocation2 + $0x1af] sm:$0xff]  ;;  %v1855_v17 = vmul.f32 %v5428_v58, %v6294_v23 }
 0x1bf   : > { %4708 = vmatmul.mubr.msk.f32.gmra.mxu1 %vm365_vm0, %v2053_v35  ;;  %v1510_v22 = vmul.f32 %v5446_v39, %v6392_v10  ;;  %v1511_v0 = vmul.f32 %v5446_v39, %v6398_v34  ;;  %v6407_v9 = vld [vmem:[#allocation2 + $0x1a8] sm:$0xff]  ;;  %v1922_v35 = vmul.f32 %v5432_v62, %v6359_v46  ;;  %v8315_v46 = vld [vmem:[#allocation27_spill] sm:$0xff] }
 0x1c0   : > { %v951_v3 = vpop.permute.xlu1 %950  ;;  %v1750_v60 = vmul.f32 %v5417_v13, %v6407_v9  ;;  %v6427_v32 = vld [vmem:[#allocation2 + $0x1a9] sm:$0xff] }
 0x1c1   : > { %v1003_v6 = vmul.f32 %v5251_v36, %v951_v3  ;;  %v1542_v50 = vadd.f32 %v1510_v22, %v1474_v63  ;;  %v1543_v12 = vadd.f32 %v1511_v0, %v1475_v30  ;;  %v1923_v63 = vmul.f32 %v5432_v62, %v6365_v37 }
 0x1c2   : > { %v1376_v22 = vmul.f32 %v5392_v61, %v6323_v52  ;;  %v1990_v23 = vmul.f32 %v6096_v8, %v6427_v32 }
 0x1c3   : > { %v1035_v38 = vadd.f32 %v1003_v6, %v839_v55  ;;  %v1646_v53 = vadd.f32 %v1614_v49, %v1542_v50  ;;  %v1647_v47 = vadd.f32 %v1615_v15, %v1543_v12  ;;  %v808_v6 = vmul.f32 %v5257_v43, %v6357_v44 }
 0x1c4   : > { %v955_v14 = vpop.permute.xlu1 %954  ;;  %v1991_v50 = vmul.f32 %v6096_v8, %v6433_v1  ;;  %v1444_v49 = vmul.f32 %v5425_v42, %v6392_v10  ;;  %v1408_v12 = vadd.f32 %v6104_v7, %v1376_v22  ;;  %v775_v22 = vpop.permute.xlu0 %774 }
 0x1c5   : > { %v1231_v27 = vadd.f32 %v1199_v19, %v1035_v38  ;;  %v1714_v5 = vadd.f32 %v1682_v31, %v1646_v53  ;;  %v1715_v20 = vadd.f32 %v1683_v16, %v1647_v47  ;;  %v644_v19 = vadd.f32 %v5974_v48, %v612_v51 }
 0x1c6   : > { %v1004_v52 = vmul.f32 %v5251_v36, %v955_v14 }
 0x1c7   : > { %v1263_v28 = vmax.f32 %v1231_v27, 0.0  ;;  %v1782_v18 = vadd.f32 %v1750_v60, %v1714_v5  ;;  %v1783_v40 = vadd.f32 %v1751_v57, %v1715_v20  ;;  %v840_v44 = vadd.f32 %v808_v6, %v644_v19 }
 0x1c8   : > { %v1476_v27 = vadd.f32 %v1444_v49, %v1408_v12  ;;  %v1616_v60 = vmul.f32 %v5409_v45, %v6339_v26  ;;  %v1377_v26 = vmul.f32 %v5392_v61, %v6330_v2  ;;  %v1924_v2 = vmul.f32 %v5432_v62, %v6427_v32 }
 0x1c9   : > { %1299 = vst.msk [vmem:[#allocation2 + $0x1c8] sm:$0xff] %vm365_vm0, %v1263_v28  ;;  %v6424_v25 = vpop.permute.xlu1 %762  ;;  %4664 = vmatprep.mubr.msk.f32.mxu0 %vm365_vm0, %v1263_v28  ;;  %v1886_v24 = vadd.f32 %v1854_v11, %v1782_v18  ;;  %v1887_v3 = vadd.f32 %v1855_v17, %v1783_v40  ;;  %v1036_v5 = vadd.f32 %v1004_v52, %v840_v44  ;;  %v6495_v52 = vld [vmem:[%s8148_s7] sm:$0xff] }
 0x1ca   : > { %v1684_v18 = vmul.f32 %v5413_v29, %v6407_v9  ;;  %v1409_v6 = vadd.f32 %v6104_v7, %v1377_v26 }
 0x1cb   : > { %v1954_v55 = vadd.f32 %v1922_v35, %v1886_v24  ;;  %v1955_v0 = vadd.f32 %v1923_v63, %v1887_v3  ;;  %v1445_v63 = vmul.f32 %v5425_v42, %v6398_v34 }
 0x1cd   : > { %v767_v30 = vpop.permute.xlu1 %766  ;;  %v2022_v56 = vadd.f32 %v1990_v23, %v1954_v55  ;;  %v2023_v38 = vadd.f32 %v1991_v50, %v1955_v0  ;;  %v613_v0 = vmul.f32 %v8297_v33, %v6380_v59  ;;  %v614_v50 = vmul.f32 %v8297_v33, %v8315_v46  ;;  %v963_v59 = vpop.permute.xlu0 %962 }
 0x1ce   : > { %v1477_v19 = vadd.f32 %v1445_v63, %v1409_v6  ;;  %v1006_v46 = vmul.f32 %v5251_v36, %v963_v59 }
 0x1cf   : > { %v2054_v15 = vmax.f32 %v2022_v56, 0.0  ;;  %v2055_v31 = vmax.f32 %v2023_v38, 0.0  ;;  %v809_v38 = vmul.f32 %v5257_v43, %v6424_v25  ;;  %v1617_v25 = vmul.f32 %v5409_v45, %v6345_v21 }
 0x1d0   : > { %v6452_v53 = vld [vmem:[#allocation2 + $0x1c7] sm:$0xff] }
 0x1d1   : > { %v1512_v47 = vmul.f32 %v5446_v39, %v6452_v53  ;;  %4710 = vmatprep.mubr.msk.f32.mxu1 %vm365_vm0, %v2054_v15  ;;  %v6461_v28 = vld [vmem:[#allocation2 + $0x1c8] sm:$0xff]  ;;  %v971_v26 = vpop.permute.xlu0 %970 }
 0x1d2   : > { %v1151_v16 = vpop.permute.xlu1 %1150  ;;  %4711 = vmatmul.mubr.msk.f32.gmra.mxu1 %vm365_vm0, %v2055_v31  ;;  %v1752_v24 = vmul.f32 %v5417_v13, %v6461_v28 }
 0x1d3   : > { %v1200_v48 = vmul.f32 %v5254_v41, %v1151_v16  ;;  %v1544_v14 = vadd.f32 %v1512_v47, %v1476_v27  ;;  %v8316_v27 = vld [vmem:[#allocation28_spill] sm:$0xff]  ;;  %v810_v16 = vmul.f32 %v5257_v43, %v767_v30 }
 0x1d4   : > { %v615_v47 = vmul.f32 %v8297_v33, %v8316_v27  ;;  %v3065_v27 = vld [vmem:[#allocation2 + $0x8] sm:$0xff] }
 0x1d5   : > { %v1232_v20 = vadd.f32 %v1200_v48, %v1036_v5  ;;  %v1648_v57 = vadd.f32 %v1616_v60, %v1544_v14  ;;  %v6515_v48 = vld [vmem:[%s8143_s2] ss:$0 sm:$0xff] }
 0x1d6   : > { %v645_v14 = vadd.f32 %v6515_v48, %v613_v0  ;;  %v6533_v6 = vadd.f32 %v6515_v48, %v615_v47  ;;  %v6536_v0 = vmul.f32 %v5257_v43, %v775_v22  ;;  %v6546_v47 = vmul.f32 %v5251_v36, %v971_v26  ;;  %v3305_v26 = vld [vmem:[#allocation2 + $0x9] sm:$0xff] }
 0x1d7   : > { %v1264_v11 = vmax.f32 %v1232_v20, 0.0  ;;  %v959_v40 = vpop.permute.xlu1 %958  ;;  %v1716_v17 = vadd.f32 %v1684_v18, %v1648_v57  ;;  %v646_v18 = vadd.f32 %v6515_v48, %v614_v50 }
 0x1d8   : > { %v1005_v60 = vmul.f32 %v5251_v36, %v959_v40  ;;  %v1685_v40 = vmul.f32 %v5413_v29, %v6413_v54 }
 0x1d9   : > { %1300 = vst.msk [vmem:[#allocation2 + $0x1d0] sm:$0xff] %vm365_vm0, %v1264_v11  ;;  %4665 = vmatmul.mubr.msk.f32.gmra.mxu0 %vm365_vm0, %v1264_v11  ;;  %v1784_v35 = vadd.f32 %v1752_v24, %v1716_v17  ;;  %v8317_v11 = vld [vmem:[#allocation15_spill] sm:$0xff] }
 0x1da   : > { %v6522_v30 = vrot.slane %v6495_v52, %v8317_v11  ;;  %v8318_v17 = vld [vmem:[#allocation19_spill] sm:$0xff] }
 0x1db   : > { %v6475_v3 = vpop.f32.mrf.mxu0  ;;  %v1888_v55 = vadd.f32 %v1856_v4, %v1784_v35  ;;  %v6526_v21 = vrot.slane %v6495_v52, %v8318_v17  ;;  %v841_v35 = vadd.f32 %v809_v38, %v645_v14  ;;  %v8323_v14 = vld [vmem:[#allocation20_spill] sm:$0xff]  ;;  %v6563_v11 = vld [vmem:[%s8149_s8] ss:$0 sm:$0xff] }
 0x1dc   : > { %v6473_v51 = vpop.permute.xlu1 %578 }
 0x1dd   : > { %v6479_v23 = vpop.f32.mrf.mxu0  ;;  %v1956_v15 = vadd.f32 %v1924_v2, %v1888_v55  ;;  %8319 = vst [vmem:[#allocation3_spill] sm:$0xff] %v6526_v21  ;;  %v2825_v55 = vld [vmem:[#allocation2 + $0x7] sm:$0xff]  ;;  %v842_v2 = vadd.f32 %v810_v16, %v646_v18  ;;  %v1037_v38 = vadd.f32 %v1005_v60, %v841_v35  ;;  %v6556_v60 = vrot.slane %v6495_v52, %v8323_v14 }
 0x1de   : > { %v2865_v22 = vmul.f32 %v6522_v30, %v2825_v55  ;;  %v8320_v16 = vld [vmem:[#allocation12_spill] sm:$0xff]  ;;  %v1857_v18 = vmul.f32 %v5428_v58, %v6365_v37  ;;  %v1925_v55 = vmul.f32 %v5432_v62, %v6433_v1 }
 0x1df   : > { %v6508_v5 = vpop.f32.mrf.mxu0  ;;  %v8321_v59 = vsub.s32 6, %v8320_v16  ;;  %v8324_v17 = vsub.s32 4, %v8320_v16  ;;  %v6577_v37 = vmul.f32 %v6556_v60, %v3065_v27  ;;  %v1038_v14 = vadd.f32 %v1006_v46, %v842_v2  ;;  %v1586_v21 = vld [vmem:[#allocation2 + $0x228] sm:$0xff]  ;;  %v3066_v27 = vld [vmem:[#allocation2 + $0x10] sm:$0xff] }
 0x1e0   : > { %v6488_v49 = vld [vmem:[#allocation2 + $0x1c9] sm:$0xff] }
 0x1e1   : > { %v6490_v56 = vld [vmem:[#allocation2 + $0x1cf] sm:$0xff]  ;;  %v6499_v12 = vpop.permute.xlu1 %770  ;;  %v1992_v44 = vmul.f32 %v6096_v8, %v6488_v49  ;;  %v6539_v50 = vpop.f32.mrf.mxu0  ;;  %v6568_v35 = vrot.slane %v6495_v52, %v8324_v17  ;;  %8327 = vst [vmem:[#allocation37_spill] sm:$0xff] %v6577_v37  ;;  %v616_v37 = vmul.f32 %v8297_v33, %v6473_v51 }
 0x1e2   : > { %v1513_v31 = vmul.f32 %v5446_v39, %v6490_v56  ;;  %v6528_v24 = vld [vmem:[#allocation2 + $0x1d0] sm:$0xff] }
 0x1e3   : > { %v2024_v20 = vadd.f32 %v1992_v44, %v1956_v15  ;;  %8325 = vst [vmem:[#allocation35_spill] sm:$0xff] %v6568_v35 }
 0x1e4   : > { %v1545_v57 = vadd.f32 %v1513_v31, %v1477_v19  ;;  %v1753_v31 = vmul.f32 %v5417_v13, %v6528_v24 }
 0x1e5   : > { %v2056_v4 = vmax.f32 %v2024_v20, 0.0 }
 0x1e6   : > { %v1649_v63 = vadd.f32 %v1617_v25, %v1545_v57  ;;  %v1155_v19 = vpop.permute.xlu1 %1154  ;;  %v6552_v25 = vrot.slane %v6495_v52, %v8321_v59  ;;  %v2826_v59 = vld [vmem:[#allocation2 + $0xf] sm:$0xff] }
 0x1e7   : > { %v1201_v15 = vmul.f32 %v5254_v41, %v1155_v19  ;;  %4713 = vmatprep.mubr.msk.f32.mxu1 %vm365_vm0, %v2056_v4  ;;  %v6570_v4 = vpop.f32.mrf.mxu0  ;;  %v8328_v19 = vsub.s32 7, %v8320_v16  ;;  %v2866_v51 = vmul.f32 %v6522_v30, %v2826_v59 }
 0x1e8   : > { %v1717_v44 = vadd.f32 %v1685_v40, %v1649_v63  ;;  %8322 = vst [vmem:[#allocation32_spill] sm:$0xff] %v6552_v25  ;;  %8326 = vst [vmem:[#allocation33_spill] sm:$0xff] %v6570_v4  ;;  %v6572_v40 = vld [vmem:[#allocation2 + $0x1d1] sm:$0xff]  ;;  %v1826_v4 = vld [vmem:[#allocation2 + $0x229] sm:$0xff] }
 0x1e9   : > { %v1233_v20 = vadd.f32 %v1201_v15, %v1037_v38  ;;  %v6582_v38 = vrot.slane %v6495_v52, %v8328_v19  ;;  %v8330_v15 = vld [vmem:[#allocation18_spill] sm:$0xff]  ;;  %v6592_v19 = vadd.f32 %v6563_v11, %v2865_v22  ;;  %v1993_v33 = vmul.f32 %v6096_v8, %v6572_v40 }
 0x1ea   : > { %v1785_v57 = vadd.f32 %v1753_v31, %v1717_v44  ;;  %v1159_v63 = vpop.permute.xlu1 %1158  ;;  %v6586_v44 = vrot.slane %v6495_v52, %v8330_v15  ;;  %v1346_v31 = vld [vmem:[#allocation2 + $0x227] sm:$0xff]  ;;  %v8332_v15 = vsub.s32 5, %v8320_v16  ;;  %v3306_v22 = vld [vmem:[#allocation2 + $0x11] sm:$0xff] }
 0x1eb   : > { %8329 = vst [vmem:[#allocation36_spill] sm:$0xff] %v6582_v38  ;;  %v1265_v17 = vmax.f32 %v1233_v20, 0.0  ;;  %v1202_v25 = vmul.f32 %v5254_v41, %v1159_v63  ;;  %v811_v63 = vmul.f32 %v5257_v43, %v6499_v12  ;;  %v1446_v12 = vmul.f32 %v5425_v42, %v6452_v53 }
 0x1ec   : > { %8331 = vst [vmem:[#allocation38_spill] sm:$0xff] %v6586_v44  ;;  %v1889_v35 = vadd.f32 %v1857_v18, %v1785_v57  ;;  %v6595_v38 = vmul.f32 %v6586_v44, %v3305_v26  ;;  %v6600_v2 = vrot.slane %v6495_v52, %v8332_v15  ;;  %v1347_v57 = vld [vmem:[#allocation2 + $0x22f] sm:$0xff]  ;;  %v6607_v18 = vpop.f32.mrf.mxu0  ;;  %v6610_v26 = vmul.f32 %v5446_v39, %v1346_v31 }
 0x1ed   : > { %1301 = vst.msk [vmem:[#allocation2 + $0x1e8] sm:$0xff] %vm365_vm0, %v1265_v17  ;;  %v1234_v46 = vadd.f32 %v1202_v25, %v1038_v14  ;;  %4667 = vmatprep.mubr.msk.f32.mxu0 %vm365_vm0, %v1265_v17  ;;  %v6613_v52 = vmul.f32 %v5417_v13, %v1586_v21  ;;  %v6616_v25 = vmul.f32 %v6096_v8, %v1826_v4  ;;  %v1587_v31 = vld [vmem:[#allocation2 + $0x230] sm:$0xff] }
 0x1ee   : > { %8333 = vst [vmem:[#allocation41_spill] sm:$0xff] %v6600_v2  ;;  %v1957_v20 = vadd.f32 %v1925_v55, %v1889_v35  ;;  %v6619_v35 = vmul.f32 %v6556_v60, %v3066_v27  ;;  %v1378_v17 = vmul.f32 %v5392_v61, %v6392_v10  ;;  %v1827_v15 = vld [vmem:[#allocation2 + $0x231] sm:$0xff]  ;;  %v648_v21 = vadd.f32 %v6515_v48, %v616_v37 }
 0x1ef   : > { %v1266_v55 = vmax.f32 %v1234_v46, 0.0  ;;  %v967_v59 = vpop.permute.xlu1 %966  ;;  %v1379_v4 = vmul.f32 %v5392_v61, %v6398_v34  ;;  %v6629_v16 = vmul.f32 %v6586_v44, %v3306_v22  ;;  %v6632_v27 = vmul.f32 %v5446_v39, %v1347_v57  ;;  %v6642_v34 = vpop.f32.mrf.mxu0 }
 0x1f0   : > { %v2025_v14 = vadd.f32 %v1993_v33, %v1957_v20  ;;  %v1007_v43 = vmul.f32 %v5251_v36, %v967_v59  ;;  %v6640_v48 = vadd.f32 %v6563_v11, %v2866_v51  ;;  %v6646_v37 = vmul.f32 %v5409_v45, %v6413_v54  ;;  %v6659_v33 = vld [vmem:[%s8147_s6] ss:$0 sm:$0xff] }
 0x1f1   : > { %8334 = vst [vmem:[#allocation44_spill] sm:$0xff] %v6629_v16  ;;  %1302 = vst.msk [vmem:[#allocation2 + $0x1f0] sm:$0xff] %vm365_vm0, %v1266_v55  ;;  %4668 = vmatmul.mubr.msk.f32.gmra.mxu0 %vm365_vm0, %v1266_v55  ;;  %v1380_v46 = vmul.f32 %v5392_v61, %v6452_v53  ;;  %v6651_v36 = vmul.f32 %v5417_v13, %v1587_v31  ;;  %v6654_v20 = vmul.f32 %v6096_v8, %v1827_v15  ;;  %v2268_v31 = vpop.f32.mrf.mxu0 }
 0x1f2   : > { %v2057_v10 = vmax.f32 %v2025_v14, 0.0  ;;  %8337 = vst [vmem:[#allocation45_spill] sm:$0xff] %v6659_v33  ;;  %v843_v51 = vadd.f32 %v811_v63, %v6533_v6  ;;  %v1410_v54 = vadd.f32 %v6104_v7, %v1378_v17  ;;  %v1618_v53 = vmul.f32 %v5409_v45, %v6407_v9 }
 0x1f3   : > { %8335 = vst [vmem:[#allocation39_spill] sm:$0xff] %v6651_v36  ;;  %8336 = vst [vmem:[#allocation29_spill] sm:$0xff] %v6654_v20  ;;  %v6668_v22 = vmul.f32 %v5428_v58, %v6433_v1  ;;  %v844_v8 = vadd.f32 %v6536_v0, %v648_v21  ;;  %v1686_v59 = vmul.f32 %v5413_v29, %v6461_v28 }
 0x1f4   : > { %4714 = vmatmul.mubr.msk.f32.gmra.mxu1 %vm365_vm0, %v2057_v10  ;;  %v1163_v57 = vpop.permute.xlu1 %1162  ;;  %v6671_v55 = vld [vmem:[#allocation2 + $0x1e7] sm:$0xff]  ;;  %v6677_v6 = vmul.f32 %v5428_v58, %v6427_v32  ;;  %v1411_v63 = vadd.f32 %v6104_v7, %v1379_v4  ;;  %v1039_v14 = vadd.f32 %v1007_v43, %v843_v51  ;;  %v1478_v17 = vadd.f32 %v1446_v12, %v1410_v54  ;;  %v6690_v32 = vld [vmem:[%s8145_s4] ss:$0 sm:$0xff] }
 0x1f5   : > { %v1203_v9 = vmul.f32 %v5254_v41, %v1163_v57  ;;  %v1514_v1 = vmul.f32 %v5446_v39, %v6671_v55  ;;  %v2398_v0 = vadd.f32 %v6475_v3, %v6659_v33  ;;  %v1447_v15 = vmul.f32 %v5425_v42, %v6490_v56 }
 0x1f6   : > { %v6693_v7 = vadd.f32 %v6690_v32, %v1380_v46  ;;  %v6697_v21 = vmul.f32 %v5409_v45, %v6461_v28  ;;  %v2397_v4 = vadd.f32 %v6659_v33, %v6479_v23  ;;  %v2400_v3 = vadd.f32 %v6508_v5, %v6659_v33  ;;  %v1582_v46 = vld [vmem:[#allocation2 + $0x1e8] sm:$0xff] }
 0x1f7   : > { %v1235_v43 = vadd.f32 %v1203_v9, %v1039_v14  ;;  %v1546_v10 = vadd.f32 %v1514_v1, %v1478_v17  ;;  %v1040_v12 = vadd.f32 %v6546_v47, %v844_v8  ;;  %v2399_v51 = vadd.f32 %v6659_v33, %v6539_v50  ;;  %v4639_v50 = vpop.f32.mrf.mxu0 }
 0x1f8   : > { %v1167_v54 = vpop.permute.xlu1 %1166  ;;  %v1926_v57 = vmul.f32 %v5432_v62, %v6488_v49  ;;  %v6708_v28 = vld [vmem:[#allocation2 + $0x1ef] sm:$0xff]  ;;  %v1687_v23 = vmul.f32 %v5413_v29, %v6528_v24  ;;  %v6715_v47 = vmul.f32 %v5432_v62, %v6572_v40  ;;  %v1479_v17 = vadd.f32 %v1447_v15, %v1411_v63 }
 0x1f9   : > { %v1267_v20 = vmax.f32 %v1235_v43, 0.0  ;;  %v1204_v5 = vmul.f32 %v5254_v41, %v1167_v54  ;;  %v4679_v14 = vpop.f32.mrf.mxu1  ;;  %v1650_v9 = vadd.f32 %v1618_v53, %v1546_v10  ;;  %v1515_v1 = vmul.f32 %v5446_v39, %v6708_v28  ;;  %v8339_v43 = vld [vmem:[#allocation33_spill] sm:$0xff] }
 0x1fa   : > { %v6717_v8 = vadd.f32 %v4679_v14, %v2398_v0  ;;  %v1381_v36 = vmul.f32 %v5392_v61, %v6490_v56  ;;  %v6725_v16 = vadd.f32 %v8339_v43, %v6659_v33  ;;  %v1754_v0 = vmul.f32 %v5417_v13, %v1582_v46  ;;  %v1583_v14 = vld [vmem:[#allocation2 + $0x1f0] sm:$0xff] }
 0x1fb   : > { %1303 = vst.msk [vmem:[#allocation2 + $0x208] sm:$0xff] %vm365_vm0, %v1267_v20  ;;  %v1236_v41 = vadd.f32 %v1204_v5, %v1040_v12  ;;  %v2591_v53 = vpop.f32.mrf.mxu1  ;;  %4670 = vmatprep.mubr.msk.f32.mxu0 %vm365_vm0, %v1267_v20  ;;  %v1718_v10 = vadd.f32 %v1686_v59, %v1650_v9  ;;  %v1547_v15 = vadd.f32 %v1515_v1, %v1479_v17  ;;  %v2278_v9 = vpop.f32.mrf.mxu0 }
 0x1fc   : > { %8338 = vst [vmem:[#allocation31_spill] sm:$0xff] %v6717_v8  ;;  %2787 = vst.msk [vmem:[#allocation2 + $0x30] sm:$0xff] %vm2785_vm2, %v6717_v8  ;;  %v6732_v63 = vadd.f32 %v2591_v53, %v2397_v4  ;;  %v6736_v56 = vmul.f32 %v5428_v58, %v6488_v49  ;;  %v6740_v54 = vmul.f32 %v5409_v45, %v6528_v24  ;;  %v1822_v24 = vld [vmem:[#allocation2 + $0x1e9] sm:$0xff] }
 0x1fd   : > { %v6744_v20 = vadd.f32 %v6659_v33, %v6607_v18  ;;  %v1268_v59 = vmax.f32 %v1236_v41, 0.0  ;;  %v4682_v12 = vpop.f32.mrf.mxu1  ;;  %v1786_v5 = vadd.f32 %v1754_v0, %v1718_v10  ;;  %v6748_v4 = vmul.f32 %v5428_v58, %v6572_v40 }
 0x1fe   : > { %8340 = vst [vmem:[#allocation40_spill] sm:$0xff] %v6732_v63  ;;  %2786 = vst.msk [vmem:[#allocation2 + $0x28] sm:$0xff] %vm2785_vm2, %v6732_v63  ;;  %v6752_v49 = vadd.f32 %v4682_v12, %v2400_v3  ;;  %v1651_v17 = vadd.f32 %v6646_v37, %v1547_v15  ;;  %v1448_v18 = vmul.f32 %v5425_v42, %v6671_v55 }
 0x1ff   : > { %v1413_v1 = vadd.f32 %v6690_v32, %v1381_v36  ;;  %v6760_v43 = vadd.f32 %v6642_v34, %v6659_v33  ;;  %v6763_v40 = vadd.f32 %v6659_v33, %v2268_v31  ;;  %1304 = vst.msk [vmem:[#allocation2 + $0x210] sm:$0xff] %vm365_vm0, %v1268_v59  ;;  %v2601_v41 = vpop.f32.mrf.mxu1  ;;  %4671 = vmatmul.mubr.msk.f32.gmra.mxu0 %vm365_vm0, %v1268_v59 }
 0x200   : > { %8341 = vst [vmem:[#allocation46_spill] sm:$0xff] %v6752_v49  ;;  %v1890_v3 = vadd.f32 %v6677_v6, %v1786_v5  ;;  %v1382_v37 = vmul.f32 %v5392_v61, %v6671_v55  ;;  %v6771_v53 = vadd.f32 %v4639_v50, %v6659_v33  ;;  %2789 = vst.msk [vmem:[#allocation2 + $0x50] sm:$0xff] %vm2785_vm2, %v6752_v49  ;;  %v6784_v6 = vld [vmem:[%s8144_s3 + $0x8] ss:$0 sm:$0xff]  ;;  %v1823_v50 = vld [vmem:[#allocation2 + $0x1f1] sm:$0xff] }
 0x201   : > { %v6775_v34 = vadd.f32 %v2601_v41, %v2399_v51  ;;  %v1719_v36 = vadd.f32 %v1687_v23, %v1651_v17  ;;  %v1755_v31 = vmul.f32 %v5417_v13, %v1583_v14  ;;  %v6779_v10 = vadd.f32 %v6659_v33, %v2278_v9 }
 0x202   : > { %8342 = vst [vmem:[#allocation47_spill] sm:$0xff] %v6771_v53  ;;  %v1958_v0 = vadd.f32 %v1926_v57, %v1890_v3  ;;  %v1994_v55 = vmul.f32 %v6784_v6, %v1822_v24  ;;  %v1688_v15 = vmul.f32 %v5413_v29, %v1582_v46  ;;  %v1344_v23 = vld [vmem:[#allocation2 + $0x207] sm:$0xff]  ;;  %v1480_v59 = vadd.f32 %v1448_v18, %v6693_v7 }
 0x203   : > { %8343 = vst [vmem:[#allocation42_spill] sm:$0xff] %v6775_v34  ;;  %8344 = vst [vmem:[#allocation30_spill] sm:$0xff] %v6779_v10  ;;  %v1787_v51 = vadd.f32 %v1755_v31, %v1719_v36  ;;  %v1449_v57 = vmul.f32 %v5425_v42, %v6708_v28  ;;  %v6794_v12 = vmul.f32 %v5409_v45, %v1582_v46  ;;  %v1584_v8 = vld [vmem:[#allocation2 + $0x208] sm:$0xff]  ;;  %v6835_v33 = vld [vmem:[#allocation2 + $0x31] sm:$0xff] }
 0x204   : > { %2788 = vst.msk [vmem:[#allocation2 + $0x48] sm:$0xff] %vm2785_vm2, %v6775_v34  ;;  %v2026_v5 = vadd.f32 %v1994_v55, %v1958_v0  ;;  %v1516_v9 = vmul.f32 %v5446_v39, %v1344_v23  ;;  %v1414_v17 = vadd.f32 %v6690_v32, %v1382_v37  ;;  %v1383_v41 = vmul.f32 %v5392_v61, %v6708_v28  ;;  %v8345_v28 = vld [vmem:[#allocation3_spill] sm:$0xff]  ;;  %v6817_v34 = vld [vmem:[#allocation2 + $0x30] sm:$0xff] }
 0x205   : > { %v1891_v3 = vadd.f32 %v6668_v22, %v1787_v51  ;;  %v1995_v36 = vmul.f32 %v6784_v6, %v1823_v50  ;;  %v1928_v7 = vmul.f32 %v5432_v62, %v1822_v24  ;;  %v6804_v18 = vmul.f32 %v5413_v29, %v1583_v14  ;;  %v2827_v0 = vld [vmem:[#allocation2 + $0x27] sm:$0xff]  ;;  %8348 = vst [vmem:[#allocation17_spill] sm:$0xff] %v6835_v33  ;;  %v8355_v10 = vld [vmem:[#allocation37_spill] sm:$0xff] }
 0x206   : > { %v2058_v31 = vmax.f32 %v2026_v5, 0.0  ;;  %v1548_v46 = vadd.f32 %v1516_v9, %v1480_v59  ;;  %v6807_v55 = vmul.f32 %v5432_v62, %v1823_v50  ;;  %v1450_v37 = vmul.f32 %v5425_v42, %v1344_v23  ;;  %v6812_v51 = vld [vmem:[#allocation2 + $0x20f] sm:$0xff] }
 0x207   : > { %v1959_v61 = vadd.f32 %v6715_v47, %v1891_v3  ;;  %v2933_v22 = vmul.f32 %v8345_v28, %v2827_v0  ;;  %v1481_v49 = vadd.f32 %v1449_v57, %v1413_v1  ;;  %v6815_v63 = vmul.f32 %v5428_v58, %v1822_v24  ;;  %v4685_v59 = vpop.f32.mrf.mxu1  ;;  %v3067_v3 = vld [vmem:[#allocation2 + $0x28] sm:$0xff] }
 0x208   : > { %4716 = vmatprep.mubr.msk.f32.mxu1 %vm365_vm0, %v2058_v31  ;;  %v1652_v5 = vadd.f32 %v6697_v21, %v1548_v46  ;;  %v6822_v9 = vadd.f32 %v6690_v32, %v1383_v41  ;;  %v6825_v47 = vmul.f32 %v5409_v45, %v1583_v14  ;;  %v6828_v23 = vmul.f32 %v5428_v58, %v1823_v50  ;;  %v6837_v41 = vld [vmem:[#allocation2 + $0x209] sm:$0xff]  ;;  %v8349_v50 = vld [vmem:[#allocation35_spill] sm:$0xff] }
 0x209   : > { %v6831_v1 = vadd.f32 %v4685_v59, %v6725_v16  ;;  %v2027_v24 = vadd.f32 %v1995_v36, %v1959_v61  ;;  %v1756_v57 = vmul.f32 %v5417_v13, %v1584_v8  ;;  %v1690_v31 = vmul.f32 %v5413_v29, %v1584_v8  ;;  %v2611_v21 = vpop.f32.mrf.mxu1  ;;  %v3307_v14 = vld [vmem:[#allocation2 + $0x29] sm:$0xff] }
 0x20a   : > { %8346 = vst [vmem:[#allocation34_spill] sm:$0xff] %v6828_v23  ;;  %v1720_v32 = vadd.f32 %v1688_v15, %v1652_v5  ;;  %v1517_v58 = vmul.f32 %v5446_v39, %v6812_v51  ;;  %v1482_v16 = vadd.f32 %v1450_v37, %v1414_v17  ;;  %v6845_v36 = vmul.f32 %v8349_v50, %v6817_v34  ;;  %v8351_v61 = vld [vmem:[#allocation32_spill] sm:$0xff]  ;;  %v6855_v5 = vld [vmem:[#allocation2 + $0x210] sm:$0xff] }
 0x20b   : > { %8347 = vst [vmem:[#allocation4_spill] sm:$0xff] %v6831_v1  ;;  %v6839_v45 = vld [vmem:[#allocation2 + $0x47] sm:$0xff]  ;;  %2791 = vst.msk [vmem:[#allocation2 + $0x70] sm:$0xff] %vm2785_vm2, %v6831_v1  ;;  %v6850_v8 = vadd.f32 %v2611_v21, %v6744_v20  ;;  %v2059_v15 = vmax.f32 %v2027_v24, 0.0  ;;  %v2965_v46 = vadd.f32 %v2933_v22, %v6592_v19  ;;  %v2867_v17 = vmul.f32 %v6522_v30, %v2827_v0  ;;  %v6876_v21 = vld [vmem:[#allocation2 + $0x4f] sm:$0xff] }
 0x20c   : > { %v3001_v59 = vmul.f32 %v8351_v61, %v6839_v45  ;;  %v1788_v39 = vadd.f32 %v1756_v57, %v1720_v32  ;;  %v6858_v37 = vld [vmem:[#allocation2 + $0x48] sm:$0xff]  ;;  %v6861_v23 = vmul.f32 %v6556_v60, %v3067_v3  ;;  %v6865_v20 = vmul.f32 %v6600_v2, %v6835_v33 }
 0x20d   : > { %8350 = vst [vmem:[#allocation43_spill] sm:$0xff] %v6850_v8  ;;  %8352 = vst [vmem:[#allocation7_spill] sm:$0xff] %v6858_v37  ;;  %4717 = vmatmul.mubr.msk.f32.gmra.mxu1 %vm365_vm0, %v2059_v15  ;;  %v1996_v19 = vmul.f32 %v6784_v6, %v6837_v41  ;;  %v3173_v0 = vmul.f32 %v8349_v50, %v3067_v3  ;;  %v6874_v24 = vmul.f32 %v6586_v44, %v3307_v14  ;;  %v2828_v57 = vld [vmem:[#allocation2 + $0x2f] sm:$0xff] }
 0x20e   : > { %2790 = vst.msk [vmem:[#allocation2 + $0x68] sm:$0xff] %vm2785_vm2, %v6850_v8  ;;  %v3033_v22 = vadd.f32 %v3001_v59, %v2965_v46  ;;  %v1892_v32 = vadd.f32 %v6736_v56, %v1788_v39  ;;  %v6879_v1 = vld [vmem:[#allocation2 + $0x49] sm:$0xff]  ;;  %v3413_v8 = vmul.f32 %v6600_v2, %v3307_v14  ;;  %v1549_v33 = vadd.f32 %v1517_v58, %v1481_v49  ;;  %v6893_v56 = vld [vmem:[%s8148_s7 + $0x8] ss:$0 sm:$0xff]  ;;  %v6896_v14 = vld [vmem:[#allocation2 + $0x211] sm:$0xff] }
 0x20f   : > { %8353 = vst [vmem:[#allocation22_spill] sm:$0xff] %v6874_v24  ;;  %8354 = vst [vmem:[#allocation5_spill] sm:$0xff] %v6879_v1  ;;  %v1757_v15 = vmul.f32 %v5417_v13, %v6855_v5  ;;  %v3175_v3 = vmul.f32 %v8349_v50, %v6858_v37  ;;  %v2935_v59 = vmul.f32 %v8345_v28, %v6839_v45  ;;  %v8356_v39 = vld [vmem:[#allocation36_spill] sm:$0xff] }
 0x210   : > { %v3137_v46 = vadd.f32 %v8355_v10, %v3033_v22  ;;  %v1550_v44 = vadd.f32 %v6610_v26, %v1482_v16  ;;  %v1960_v53 = vadd.f32 %v1928_v7, %v1892_v32  ;;  %v1653_v49 = vadd.f32 %v6740_v54, %v1549_v33 }
 0x211   : > { %v2934_v13 = vmul.f32 %v8345_v28, %v2828_v57  ;;  %v3002_v10 = vmul.f32 %v8351_v61, %v6876_v21  ;;  %v3241_v22 = vmul.f32 %v8356_v39, %v6858_v37  ;;  %v3481_v26 = vmul.f32 %v6893_v56, %v6879_v1 }
 0x212   : > { %v3205_v58 = vadd.f32 %v3173_v0, %v3137_v46  ;;  %v1654_v7 = vadd.f32 %v6794_v12, %v1550_v44  ;;  %v2028_v16 = vadd.f32 %v1996_v19, %v1960_v53  ;;  %v1721_v32 = vadd.f32 %v6804_v18, %v1653_v49  ;;  %v6911_v46 = vld [vmem:[#allocation2 + $0x50] sm:$0xff] }
 0x213   : > { %v2966_v33 = vadd.f32 %v2934_v13, %v6640_v48  ;;  %v2899_v54 = vadd.f32 %v6563_v11, %v2867_v17  ;;  %v1997_v24 = vmul.f32 %v6784_v6, %v6896_v14  ;;  %v1451_v37 = vmul.f32 %v5425_v42, %v6812_v51  ;;  %v4688_v2 = vpop.f32.mrf.mxu1 }
 0x214   : > { %v3273_v50 = vadd.f32 %v3241_v22, %v3205_v58  ;;  %v1722_v0 = vadd.f32 %v1690_v31, %v1654_v7  ;;  %v2060_v1 = vmax.f32 %v2028_v16, 0.0  ;;  %v1789_v44 = vadd.f32 %v1757_v15, %v1721_v32 }
 0x215   : > { %v3034_v53 = vadd.f32 %v3002_v10, %v2966_v33  ;;  %v6915_v12 = vld [vmem:[#allocation2 + $0x67] sm:$0xff]  ;;  %v2967_v18 = vadd.f32 %v2935_v59, %v2899_v54  ;;  %v6918_v48 = vadd.f32 %v4688_v2, %v6760_v43  ;;  %v2621_v42 = vpop.f32.mrf.mxu1  ;;  %v1930_v15 = vmul.f32 %v5432_v62, %v6837_v41  ;;  %v6944_v49 = vld [vmem:[#allocation2 + $0x6f] sm:$0xff] }
 0x216   : > { %v3377_v17 = vadd.f32 %v6595_v38, %v3273_v50  ;;  %v1790_v6 = vadd.f32 %v6613_v52, %v1722_v0  ;;  %v3003_v31 = vmul.f32 %v8351_v61, %v6915_v12  ;;  %v6924_v19 = vld [vmem:[#allocation2 + $0x68] sm:$0xff]  ;;  %4719 = vmatprep.mubr.msk.f32.mxu1 %vm365_vm0, %v2060_v1  ;;  %v1893_v51 = vadd.f32 %v6748_v4, %v1789_v44 }
 0x217   : > { %8357 = vst [vmem:[#allocation9_spill] sm:$0xff] %v6918_v48  ;;  %v3138_v2 = vadd.f32 %v6619_v35, %v3034_v53  ;;  %v3242_v38 = vmul.f32 %v8356_v39, %v6911_v46  ;;  %2793 = vst.msk [vmem:[#allocation2 + $0x90] sm:$0xff] %vm2785_vm2, %v6918_v48  ;;  %v6936_v52 = vadd.f32 %v2621_v42, %v6763_v40 }
 0x218   : > { %v3445_v43 = vadd.f32 %v3413_v8, %v3377_v17  ;;  %v1894_v50 = vadd.f32 %v6815_v63, %v1790_v6  ;;  %v3035_v1 = vadd.f32 %v3003_v31, %v2967_v18  ;;  %v1961_v4 = vadd.f32 %v6807_v55, %v1893_v51  ;;  %v8359_v17 = vld [vmem:[#allocation5_spill] sm:$0xff] }
 0x219   : > { %v3206_v59 = vadd.f32 %v6845_v36, %v3138_v2  ;;  %v3243_v35 = vmul.f32 %v8356_v39, %v6924_v19  ;;  %v1483_v41 = vadd.f32 %v1451_v37, %v6822_v9  ;;  %2792 = vst.msk [vmem:[#allocation2 + $0x88] sm:$0xff] %vm2785_vm2, %v6936_v52  ;;  %v2868_v63 = vmul.f32 %v6522_v30, %v2828_v57  ;;  %v6955_v37 = vld [vmem:[#allocation2 + $0x51] sm:$0xff]  ;;  %v8358_v57 = vld [vmem:[#allocation44_spill] sm:$0xff]  ;;  %v8364_v2 = vld [vmem:[#allocation39_spill] sm:$0xff] }
 0x21a   : > { %v3513_v40 = vadd.f32 %v3481_v26, %v3445_v43  ;;  %v1962_v13 = vadd.f32 %v1930_v15, %v1894_v50  ;;  %v3139_v8 = vadd.f32 %v6861_v23, %v3035_v1  ;;  %v2029_v10 = vadd.f32 %v1997_v24, %v1961_v4  ;;  %v6984_v43 = vld [vmem:[#allocation2 + $0x70] sm:$0xff] }
 0x21b   : > { %v3274_v55 = vadd.f32 %v3242_v38, %v3206_v59  ;;  %v1551_v36 = vadd.f32 %v6632_v27, %v1483_v41  ;;  %v2936_v58 = vmul.f32 %v8345_v28, %v6876_v21  ;;  %v2900_v26 = vadd.f32 %v6563_v11, %v2868_v63  ;;  %v6961_v27 = vld [vmem:[#allocation2 + $0x69] sm:$0xff]  ;;  %v8367_v63 = vld [vmem:[#allocation34_spill] sm:$0xff] }
 0x21c   : > { %3577 = vrot.lane.b32.xlu0 %v3513_v40, %s4838_s16  ;;  %v2030_v9 = vadd.f32 %v6616_v25, %v1962_v13  ;;  %v3207_v22 = vadd.f32 %v3175_v3, %v3139_v8  ;;  %v3004_v23 = vmul.f32 %v8351_v61, %v6944_v49  ;;  %v2061_v24 = vmax.f32 %v2029_v10, 0.0  ;;  %v8366_v13 = vld [vmem:[#allocation30_spill] sm:$0xff] }
 0x21d   : > { %v3378_v7 = vadd.f32 %v8358_v57, %v3274_v55  ;;  %v1655_v16 = vadd.f32 %v6825_v47, %v1551_v36  ;;  %v1691_v32 = vmul.f32 %v5413_v29, %v6855_v5  ;;  %v2869_v25 = vmul.f32 %v6522_v30, %v6839_v45  ;;  %v8360_v29 = vld [vmem:[#allocation41_spill] sm:$0xff]  ;;  %v8361_v45 = vld [vmem:[#allocation22_spill] sm:$0xff]  ;;  %v8368_v57 = vld [vmem:[#allocation7_spill] sm:$0xff] }
 0x21e   : > { %v2062_v33 = vmax.f32 %v2030_v9, 0.0  ;;  %v3275_v3 = vadd.f32 %v3243_v35, %v3207_v22  ;;  %v2968_v54 = vadd.f32 %v2936_v58, %v2900_v26  ;;  %4720 = vmatmul.mubr.msk.f32.gmra.mxu1 %vm365_vm0, %v2061_v24  ;;  %v3482_v44 = vmul.f32 %v6893_v56, %v6955_v37  ;;  %v4691_v18 = vpop.f32.mrf.mxu1  ;;  %v4642_v58 = vpop.f32.mrf.mxu0 }
 0x21f   : > { %v3446_v0 = vadd.f32 %v6865_v20, %v3378_v7  ;;  %v1723_v53 = vadd.f32 %v1691_v32, %v1655_v16  ;;  %v3108_v47 = vmul.f32 %v6556_v60, %v6817_v34  ;;  %v3415_v5 = vmul.f32 %v8360_v29, %v8359_v17  ;;  %v8362_v20 = vld [vmem:[#allocation47_spill] sm:$0xff]  ;;  %v7015_v32 = vld [vmem:[#allocation2 + $0x71] sm:$0xff] }
 0x220   : > { %4722 = vmatprep.mubr.msk.f32.mxu1 %vm365_vm0, %v2062_v33  ;;  %v3379_v6 = vadd.f32 %v8361_v45, %v3275_v3  ;;  %v3483_v31 = vmul.f32 %v6893_v56, %v6961_v27  ;;  %v3036_v42 = vadd.f32 %v3004_v23, %v2968_v54  ;;  %v6981_v51 = vadd.f32 %v4691_v18, %v8362_v20  ;;  %v8365_v34 = vld [vmem:[#allocation35_spill] sm:$0xff]  ;;  %v2631_v4 = vpop.f32.mrf.mxu1  ;;  %v7006_v24 = vld [vmem:[#allocation2 + $0x8f] sm:$0xff]  ;;  %v8370_v33 = vld [vmem:[#allocation38_spill] sm:$0xff] }
 0x221   : > { %v3514_v15 = vadd.f32 %v3482_v44, %v3446_v0  ;;  %v1791_v38 = vadd.f32 %v8364_v2, %v1723_v53  ;;  %v3176_v50 = vmul.f32 %v8365_v34, %v6911_v46  ;;  %v6988_v1 = vld [vmem:[#allocation2 + $0x87] sm:$0xff]  ;;  %v2901_v41 = vadd.f32 %v6563_v11, %v2869_v25  ;;  %v8369_v25 = vld [vmem:[#allocation17_spill] sm:$0xff] }
 0x222   : > { %8363 = vst [vmem:[#allocation6_spill] sm:$0xff] %v6981_v51  ;;  %v3447_v59 = vadd.f32 %v3415_v5, %v3379_v6  ;;  %v3140_v35 = vadd.f32 %v3108_v47, %v3036_v42  ;;  %v2937_v40 = vmul.f32 %v8345_v28, %v6915_v12  ;;  %2795 = vst.msk [vmem:[#allocation2 + $0xb0] sm:$0xff] %vm2785_vm2, %v6981_v51  ;;  %v7019_v0 = vld [vmem:[#allocation2 + $0x88] sm:$0xff]  ;;  %v8371_v53 = vld [vmem:[#allocation45_spill] sm:$0xff]  ;;  %v2288_v6 = vpop.f32.mrf.mxu0 }
 0x223   : > { %v6996_v8 = vadd.f32 %v2631_v4, %v8366_v13  ;;  %3579 = vrot.lane.b32.xlu0 %v3514_v15, %s4838_s16  ;;  %v1895_v10 = vadd.f32 %v8367_v63, %v1791_v38  ;;  %v1931_v55 = vmul.f32 %v5432_v62, %v6896_v14  ;;  %v3005_v36 = vmul.f32 %v8351_v61, %v6988_v1  ;;  %v8372_v18 = vld [vmem:[#allocation29_spill] sm:$0xff] }
 0x224   : > { %v3515_v9 = vadd.f32 %v3483_v31, %v3447_v59  ;;  %v3208_v22 = vadd.f32 %v3176_v50, %v3140_v35  ;;  %v3244_v26 = vmul.f32 %v8356_v39, %v6984_v43  ;;  %v2969_v23 = vadd.f32 %v2937_v40, %v2901_v41  ;;  %v4645_v59 = vpop.f32.mrf.mxu0 }
 0x225   : > { %2794 = vst.msk [vmem:[#allocation2 + $0xa8] sm:$0xff] %vm2785_vm2, %v6996_v8  ;;  %v3109_v7 = vmul.f32 %v6556_v60, %v8368_v57  ;;  %v1963_v16 = vadd.f32 %v1931_v55, %v1895_v10  ;;  %v2870_v62 = vmul.f32 %v6522_v30, %v6876_v21  ;;  %v3348_v3 = vmul.f32 %v8370_v33, %v8369_v25 }
 0x226   : > { %3581 = vrot.lane.b32.xlu1 %v3515_v9, %s4838_s16  ;;  %v3276_v14 = vadd.f32 %v3244_v26, %v3208_v22  ;;  %v3037_v54 = vadd.f32 %v3005_v36, %v2969_v23  ;;  %v2938_v44 = vmul.f32 %v8345_v28, %v6944_v49  ;;  %v2408_v47 = vadd.f32 %v4642_v58, %v8371_v53 }
 0x227   : > { %v2031_v5 = vadd.f32 %v8372_v18, %v1963_v16  ;;  %v2902_v21 = vadd.f32 %v6563_v11, %v2870_v62  ;;  %v3006_v45 = vmul.f32 %v8351_v61, %v7006_v24  ;;  %v3416_v42 = vmul.f32 %v8360_v29, %v6955_v37  ;;  %v2298_v18 = vpop.f32.mrf.mxu0 }
 0x228   : > { %v3380_v31 = vadd.f32 %v3348_v3, %v3276_v14  ;;  %v3141_v20 = vadd.f32 %v3109_v7, %v3037_v54  ;;  %v3177_v15 = vmul.f32 %v8365_v34, %v6924_v19  ;;  %v3484_v38 = vmul.f32 %v6893_v56, %v7015_v32 }
 0x229   : > { %v2063_v2 = vmax.f32 %v2031_v5, 0.0  ;;  %v3245_v50 = vmul.f32 %v8356_v39, %v7019_v0  ;;  %v2970_v4 = vadd.f32 %v2938_v44, %v2902_v21  ;;  %v2871_v40 = vmul.f32 %v6522_v30, %v6915_v12  ;;  %v4694_v55 = vpop.f32.mrf.mxu1  ;;  %v7048_v12 = vld [vmem:[#allocation2 + $0x90] sm:$0xff] }
 0x22a   : > { %v3448_v35 = vadd.f32 %v3416_v42, %v3380_v31  ;;  %v3209_v41 = vadd.f32 %v3177_v15, %v3141_v20  ;;  %v2939_v13 = vmul.f32 %v8345_v28, %v6988_v1  ;;  %v2407_v63 = vadd.f32 %v8371_v53, %v2288_v6  ;;  %v7081_v20 = vld [vmem:[#allocation2 + $0x91] sm:$0xff] }
 0x22b   : > { %v3349_v10 = vmul.f32 %v8370_v33, %v8359_v17  ;;  %4723 = vmatmul.mubr.msk.f32.gmra.mxu1 %vm365_vm0, %v2063_v2  ;;  %v3038_v36 = vadd.f32 %v3006_v45, %v2970_v4  ;;  %v3110_v58 = vmul.f32 %v6556_v60, %v6911_v46  ;;  %v7046_v26 = vadd.f32 %v4694_v55, %v2408_v47  ;;  %v7056_v17 = vld [vmem:[#allocation2 + $0x89] sm:$0xff]  ;;  %v2641_v16 = vpop.f32.mrf.mxu1 }
 0x22c   : > { %v3516_v9 = vadd.f32 %v3484_v38, %v3448_v35  ;;  %v3277_v22 = vadd.f32 %v3245_v50, %v3209_v41  ;;  %v7050_v23 = vld [vmem:[#allocation2 + $0xa7] sm:$0xff]  ;;  %v2903_v57 = vadd.f32 %v6563_v11, %v2871_v40  ;;  %v7054_v7 = vadd.f32 %v4645_v59, %v8371_v53  ;;  %v7069_v47 = vld [vmem:[#allocation2 + $0xaf] sm:$0xff] }
 0x22d   : > { %8373 = vst [vmem:[#allocation23_spill] sm:$0xff] %v7046_v26  ;;  %v3142_v62 = vadd.f32 %v3110_v58, %v3038_v36  ;;  %v3178_v46 = vmul.f32 %v8365_v34, %v6984_v43  ;;  %v3007_v14 = vmul.f32 %v8351_v61, %v7050_v23  ;;  %v3417_v3 = vmul.f32 %v8360_v29, %v6961_v27  ;;  %v7087_v50 = vld [vmem:[#allocation2 + $0xa8] sm:$0xff] }
 0x22e   : > { %3583 = vrot.lane.b32.xlu1 %v3516_v9, %s4838_s16  ;;  %v3381_v25 = vadd.f32 %v3349_v10, %v3277_v22  ;;  %2797 = vst.msk [vmem:[#allocation2 + $0xd0] sm:$0xff] %vm2785_vm2, %v7046_v26  ;;  %v7067_v54 = vadd.f32 %v2641_v16, %v2407_v63  ;;  %v2971_v44 = vadd.f32 %v2939_v13, %v2903_v57  ;;  %v7106_v57 = vld [vmem:[#allocation2 + $0xa9] sm:$0xff] }
 0x22f   : > { %v3210_v5 = vadd.f32 %v3178_v46, %v3142_v62  ;;  %v3246_v21 = vmul.f32 %v8356_v39, %v7048_v12  ;;  %v2872_v45 = vmul.f32 %v6522_v30, %v6944_v49  ;;  %v2940_v6 = vmul.f32 %v8345_v28, %v7006_v24 }
 0x230   : > { %v3449_v31 = vadd.f32 %v3417_v3, %v3381_v25  ;;  %v3485_v42 = vmul.f32 %v6893_v56, %v7056_v17  ;;  %2796 = vst.msk [vmem:[#allocation2 + $0xc8] sm:$0xff] %vm2785_vm2, %v7067_v54  ;;  %v3039_v15 = vadd.f32 %v3007_v14, %v2971_v44  ;;  %v3111_v2 = vmul.f32 %v6556_v60, %v6924_v19  ;;  %v7114_v3 = vld [vmem:[#allocation2 + $0xb0] sm:$0xff] }
 0x231   : > { %v3278_v38 = vadd.f32 %v3246_v21, %v3210_v5  ;;  %v3350_v49 = vmul.f32 %v8370_v33, %v6955_v37  ;;  %v2904_v4 = vadd.f32 %v6563_v11, %v2872_v45  ;;  %v3008_v59 = vmul.f32 %v8351_v61, %v7069_v47 }
 0x232   : > { %v2409_v35 = vadd.f32 %v8371_v53, %v2298_v18  ;;  %v3517_v41 = vadd.f32 %v3485_v42, %v3449_v31  ;;  %v3143_v40 = vadd.f32 %v3111_v2, %v3039_v15  ;;  %v3179_v13 = vmul.f32 %v8365_v34, %v7019_v0 }
 0x233   : > { %v3382_v63 = vadd.f32 %v3350_v49, %v3278_v38  ;;  %v3418_v19 = vmul.f32 %v8360_v29, %v7015_v32  ;;  %v3486_v37 = vmul.f32 %v6893_v56, %v7081_v20  ;;  %v2972_v10 = vadd.f32 %v2940_v6, %v2904_v4 }
 0x234   : > { %3585 = vrot.lane.b32.xlu0 %v3517_v41, %s4838_s16  ;;  %v3211_v55 = vadd.f32 %v3179_v13, %v3143_v40  ;;  %v3247_v36 = vmul.f32 %v8356_v39, %v7087_v50  ;;  %v2873_v58 = vmul.f32 %v6522_v30, %v6988_v1  ;;  %v2941_v9 = vmul.f32 %v8345_v28, %v7050_v23 }
 0x235   : > { %v3450_v22 = vadd.f32 %v3418_v19, %v3382_v63  ;;  %v3351_v16 = vmul.f32 %v8370_v33, %v6961_v27  ;;  %v3040_v62 = vadd.f32 %v3008_v59, %v2972_v10  ;;  %v3112_v46 = vmul.f32 %v6556_v60, %v6984_v43 }
 0x236   : > { %v3279_v14 = vadd.f32 %v3247_v36, %v3211_v55  ;;  %v3419_v25 = vmul.f32 %v8360_v29, %v7056_v17  ;;  %v2905_v1 = vadd.f32 %v6563_v11, %v2873_v58  ;;  %v2874_v44 = vmul.f32 %v6522_v30, %v7006_v24  ;;  %v4697_v31 = vpop.f32.mrf.mxu1 }
 0x237   : > { %v3518_v18 = vadd.f32 %v3486_v37, %v3450_v22  ;;  %v3144_v5 = vadd.f32 %v3112_v46, %v3040_v62  ;;  %v3180_v27 = vmul.f32 %v8365_v34, %v7048_v12  ;;  %v7121_v21 = vld [vmem:[#allocation2 + $0xc7] sm:$0xff]  ;;  %v2942_v43 = vmul.f32 %v8345_v28, %v7069_v47  ;;  %v7129_v24 = vld [vmem:[#allocation2 + $0xcf] sm:$0xff] }
 0x238   : > { %v3383_v45 = vadd.f32 %v3351_v16, %v3279_v14  ;;  %v3487_v6 = vmul.f32 %v6893_v56, %v7106_v57  ;;  %v2973_v42 = vadd.f32 %v2941_v9, %v2905_v1  ;;  %v3009_v15 = vmul.f32 %v8351_v61, %v7121_v21  ;;  %v2651_v41 = vpop.f32.mrf.mxu1  ;;  %v7142_v37 = vld [vmem:[#allocation2 + $0xb1] sm:$0xff]  ;;  %v7150_v55 = vld [vmem:[#allocation2 + $0xc8] sm:$0xff] }
 0x239   : > { %3587 = vrot.lane.b32.xlu0 %v3518_v18, %s4838_s16  ;;  %v3212_v2 = vadd.f32 %v3180_v27, %v3144_v5  ;;  %v3248_v38 = vmul.f32 %v8356_v39, %v7114_v3  ;;  %v7135_v49 = vadd.f32 %v4697_v31, %v7054_v7  ;;  %v2906_v4 = vadd.f32 %v6563_v11, %v2874_v44 }
 0x23a   : > { %v3451_v59 = vadd.f32 %v3419_v25, %v3383_v45  ;;  %v3041_v40 = vadd.f32 %v3009_v15, %v2973_v42  ;;  %v3113_v13 = vmul.f32 %v6556_v60, %v7019_v0  ;;  %v3010_v63 = vmul.f32 %v8351_v61, %v7129_v24  ;;  %v7165_v25 = vld [vmem:[#allocation2 + $0xd0] sm:$0xff] }
 0x23b   : > { %8374 = vst [vmem:[#allocation11_spill] sm:$0xff] %v7135_v49  ;;  %v3280_v19 = vadd.f32 %v3248_v38, %v3212_v2  ;;  %v3352_v10 = vmul.f32 %v8370_v33, %v7015_v32  ;;  %2799 = vst.msk [vmem:[#allocation2 + $0xf0] sm:$0xff] %vm2785_vm2, %v7135_v49  ;;  %v7148_v7 = vadd.f32 %v2651_v41, %v2409_v35  ;;  %v4648_v2 = vpop.f32.mrf.mxu0 }
 0x23c   : > { %v2974_v36 = vadd.f32 %v2942_v43, %v2906_v4  ;;  %v3519_v58 = vadd.f32 %v3487_v6, %v3451_v59  ;;  %v3145_v9 = vadd.f32 %v3113_v13, %v3041_v40  ;;  %v3181_v0 = vmul.f32 %v8365_v34, %v7087_v50  ;;  %v7175_v6 = vld [vmem:[#allocation2 + $0xc9] sm:$0xff] }
 0x23d   : > { %v3384_v22 = vadd.f32 %v3352_v10, %v3280_v19  ;;  %v3420_v16 = vmul.f32 %v8360_v29, %v7081_v20  ;;  %2798 = vst.msk [vmem:[#allocation2 + $0xe8] sm:$0xff] %vm2785_vm2, %v7148_v7  ;;  %v3114_v35 = vmul.f32 %v6556_v60, %v7048_v12  ;;  %v3488_v62 = vmul.f32 %v6893_v56, %v7142_v37  ;;  %v7194_v19 = vld [vmem:[#allocation2 + $0xd1] sm:$0xff] }
 0x23e   : > { %v3042_v32 = vadd.f32 %v3010_v63, %v2974_v36  ;;  %3589 = vrot.lane.b32.xlu1 %v3519_v58, %s4838_s16  ;;  %v3213_v46 = vadd.f32 %v3181_v0, %v3145_v9  ;;  %v3249_v14 = vmul.f32 %v8356_v39, %v7150_v55  ;;  %v3182_v18 = vmul.f32 %v8365_v34, %v7114_v3  ;;  %v2308_v0 = vpop.f32.mrf.mxu0 }
 0x23f   : > { %v3452_v1 = vadd.f32 %v3420_v16, %v3384_v22  ;;  %v2875_v5 = vmul.f32 %v6522_v30, %v7050_v23  ;;  %v3353_v27 = vmul.f32 %v8370_v33, %v7056_v17  ;;  %v2876_v43 = vmul.f32 %v6522_v30, %v7069_v47 }
 0x240   : > { %v3146_v44 = vadd.f32 %v3114_v35, %v3042_v32  ;;  %v3281_v12 = vadd.f32 %v3249_v14, %v3213_v46  ;;  %v3250_v42 = vmul.f32 %v8356_v39, %v7165_v25  ;;  %v2943_v15 = vmul.f32 %v8345_v28, %v7121_v21 }
 0x241   : > { %v3520_v45 = vadd.f32 %v3488_v62, %v3452_v1  ;;  %v3421_v23 = vmul.f32 %v8360_v29, %v7106_v57  ;;  %v2944_v17 = vmul.f32 %v8345_v28, %v7129_v24  ;;  %v3354_v4 = vmul.f32 %v8370_v33, %v7081_v20 }
 0x242   : > { %v3214_v31 = vadd.f32 %v3182_v18, %v3146_v44  ;;  %v3385_v38 = vadd.f32 %v3353_v27, %v3281_v12  ;;  %v2907_v59 = vadd.f32 %v6563_v11, %v2875_v5  ;;  %v3489_v40 = vmul.f32 %v6893_v56, %v7175_v6 }
 0x243   : > { %3591 = vrot.lane.b32.xlu1 %v3520_v45, %s4838_s16  ;;  %v2908_v63 = vadd.f32 %v6563_v11, %v2876_v43  ;;  %v3422_v36 = vmul.f32 %v8360_v29, %v7142_v37  ;;  %v3115_v62 = vmul.f32 %v6556_v60, %v7087_v50  ;;  %v2412_v46 = vadd.f32 %v4648_v2, %v8371_v53  ;;  %v7217_v43 = vld [vmem:[#allocation2 + $0xf0] sm:$0xff] }
 0x244   : > { %v3282_v47 = vadd.f32 %v3250_v42, %v3214_v31  ;;  %v3453_v41 = vadd.f32 %v3421_v23, %v3385_v38  ;;  %v7191_v13 = vld [vmem:[#allocation2 + $0xe7] sm:$0xff]  ;;  %v2975_v58 = vadd.f32 %v2943_v15, %v2907_v59  ;;  %v7200_v9 = vld [vmem:[#allocation2 + $0xef] sm:$0xff]  ;;  %v3490_v14 = vmul.f32 %v6893_v56, %v7194_v19 }
 0x245   : > { %v3011_v20 = vmul.f32 %v8351_v61, %v7191_v13  ;;  %v2976_v16 = vadd.f32 %v2944_v17, %v2908_v63  ;;  %v3012_v32 = vmul.f32 %v8351_v61, %v7200_v9  ;;  %v7210_v1 = vld [vmem:[#allocation2 + $0xe8] sm:$0xff]  ;;  %v3116_v18 = vmul.f32 %v6556_v60, %v7114_v3 }
 0x246   : > { %v3386_v10 = vadd.f32 %v3354_v4, %v3282_v47  ;;  %v3521_v22 = vadd.f32 %v3489_v40, %v3453_v41  ;;  %v2411_v5 = vadd.f32 %v8371_v53, %v2308_v0  ;;  %v4700_v12 = vpop.f32.mrf.mxu1  ;;  %v3183_v50 = vmul.f32 %v8365_v34, %v7150_v55  ;;  %v7236_v41 = vld [vmem:[#allocation2 + $0xe9] sm:$0xff] }
 0x247   : > { %v3043_v11 = vadd.f32 %v3011_v20, %v2975_v58  ;;  %v3044_v44 = vadd.f32 %v3012_v32, %v2976_v16  ;;  %v7219_v31 = vadd.f32 %v4700_v12, %v2412_v46  ;;  %v3184_v15 = vmul.f32 %v8365_v34, %v7165_v25  ;;  %v7250_v32 = vld [vmem:[#allocation2 + $0xf1] sm:$0xff] }
 0x248   : > { %v3454_v35 = vadd.f32 %v3422_v36, %v3386_v10  ;;  %3593 = vrot.lane.b32.xlu0 %v3521_v22, %s4838_s16  ;;  %v2661_v2 = vpop.f32.mrf.mxu1  ;;  %v3251_v3 = vmul.f32 %v8356_v39, %v7210_v1  ;;  %v3252_v47 = vmul.f32 %v8356_v39, %v7217_v43  ;;  %v3355_v59 = vmul.f32 %v8370_v33, %v7106_v57 }
 0x249   : > { %v3147_v27 = vadd.f32 %v3115_v62, %v3043_v11  ;;  %8375 = vst [vmem:[#allocation8_spill] sm:$0xff] %v7219_v31  ;;  %v3148_v42 = vadd.f32 %v3116_v18, %v3044_v44  ;;  %2801 = vst.msk [vmem:[#allocation2 + $0x110] sm:$0xff] %vm2785_vm2, %v7219_v31  ;;  %v7228_v23 = vadd.f32 %v2661_v2, %v2411_v5  ;;  %v7259_v62 = vld [vmem:[%s8149_s8] ss:$0 sm:$0xff]  ;;  %v4651_v18 = vpop.f32.mrf.mxu0 }
 0x24a   : > { %v3522_v45 = vadd.f32 %v3490_v14, %v3454_v35  ;;  %v3356_v63 = vmul.f32 %v8370_v33, %v7142_v37  ;;  %v3423_v36 = vmul.f32 %v8360_v29, %v7175_v6  ;;  %v2877_v20 = vmul.f32 %v6522_v30, %v7121_v21 }
 0x24b   : > { %v3215_v38 = vadd.f32 %v3183_v50, %v3147_v27  ;;  %v3216_v17 = vadd.f32 %v3184_v15, %v3148_v42  ;;  %2800 = vst.msk [vmem:[#allocation2 + $0x108] sm:$0xff] %vm2785_vm2, %v7228_v23  ;;  %v3491_v57 = vmul.f32 %v6893_v56, %v7236_v41  ;;  %v3424_v22 = vmul.f32 %v8360_v29, %v7194_v19 }
 0x24c   : > { %3595 = vrot.lane.b32.xlu0 %v3522_v45, %s4838_s16  ;;  %v2878_v16 = vmul.f32 %v6522_v30, %v7129_v24  ;;  %v2945_v37 = vmul.f32 %v8345_v28, %v7191_v13  ;;  %v2946_v21 = vmul.f32 %v8345_v28, %v7200_v9  ;;  %v2909_v46 = vadd.f32 %v7259_v62, %v2877_v20 }
 0x24d   : > { %v3283_v4 = vadd.f32 %v3251_v3, %v3215_v38  ;;  %v3284_v40 = vadd.f32 %v3252_v47, %v3216_v17  ;;  %v3492_v24 = vmul.f32 %v6893_v56, %v7250_v32  ;;  %v3117_v2 = vmul.f32 %v6556_v60, %v7150_v55  ;;  %v2318_v47 = vpop.f32.mrf.mxu0 }
 0x24e   : > { %v2910_v44 = vadd.f32 %v7259_v62, %v2878_v16  ;;  %v2977_v5 = vadd.f32 %v2945_v37, %v2909_v46  ;;  %v3118_v17 = vmul.f32 %v6556_v60, %v7165_v25  ;;  %v3186_v55 = vmul.f32 %v8365_v34, %v7217_v43 }
 0x24f   : > { %v3387_v10 = vadd.f32 %v3355_v59, %v3283_v4  ;;  %v3388_v58 = vadd.f32 %v3356_v63, %v3284_v40  ;;  %v3185_v59 = vmul.f32 %v8365_v34, %v7210_v1  ;;  %v2414_v63 = vadd.f32 %v4651_v18, %v8371_v53 }
 0x250   : > { %v2978_v45 = vadd.f32 %v2946_v21, %v2910_v44  ;;  %v7283_v40 = vld [vmem:[#allocation2 + $0x110] sm:$0xff]  ;;  %v2413_v25 = vadd.f32 %v8371_v53, %v2318_v47  ;;  %v3358_v53 = vmul.f32 %v8370_v33, %v7194_v19  ;;  %v3425_v44 = vmul.f32 %v8360_v29, %v7236_v41 }
 0x251   : > { %v3455_v0 = vadd.f32 %v3423_v36, %v3387_v10  ;;  %v3456_v11 = vadd.f32 %v3424_v22, %v3388_v58  ;;  %v3254_v22 = vmul.f32 %v8356_v39, %v7283_v40  ;;  %v2879_v19 = vmul.f32 %v6522_v30, %v7191_v13 }
 0x252   : > { %v7265_v14 = vld [vmem:[#allocation2 + $0x107] sm:$0xff]  ;;  %v7270_v27 = vld [vmem:[#allocation2 + $0x10f] sm:$0xff] }
 0x253   : > { %v3523_v35 = vadd.f32 %v3491_v57, %v3455_v0  ;;  %v3013_v12 = vmul.f32 %v8351_v61, %v7265_v14  ;;  %v3524_v50 = vadd.f32 %v3492_v24, %v3456_v11  ;;  %v3014_v42 = vmul.f32 %v8351_v61, %v7270_v27  ;;  %v7277_v38 = vld [vmem:[#allocation2 + $0x108] sm:$0xff] }
 0x254   : > { %v3253_v20 = vmul.f32 %v8356_v39, %v7277_v38  ;;  %v7301_v21 = vld [vmem:[#allocation2 + $0x109] sm:$0xff]  ;;  %v2911_v47 = vadd.f32 %v7259_v62, %v2879_v19 }
 0x255   : > { %3597 = vrot.lane.b32.xlu1 %v3523_v35, %s4838_s16  ;;  %v3045_v15 = vadd.f32 %v3013_v12, %v2977_v5  ;;  %v3046_v3 = vadd.f32 %v3014_v42, %v2978_v45  ;;  %v3357_v35 = vmul.f32 %v8370_v33, %v7175_v6  ;;  %v3493_v5 = vmul.f32 %v6893_v56, %v7301_v21 }
 0x256   : > { %v3426_v12 = vmul.f32 %v8360_v29, %v7250_v32 }
 0x257   : > { %v3149_v4 = vadd.f32 %v3117_v2, %v3045_v15  ;;  %v3150_v10 = vadd.f32 %v3118_v17, %v3046_v3  ;;  %v2880_v15 = vmul.f32 %v6522_v30, %v7200_v9  ;;  %v2947_v2 = vmul.f32 %v8345_v28, %v7265_v14 }
 0x258   : > { %v2948_v17 = vmul.f32 %v8345_v28, %v7270_v27 }
 0x259   : > { %3599 = vrot.lane.b32.xlu1 %v3524_v50, %s4838_s16  ;;  %v4703_v36 = vpop.f32.mrf.mxu1  ;;  %v3217_v58 = vadd.f32 %v3185_v59, %v3149_v4  ;;  %v3218_v57 = vadd.f32 %v3186_v55, %v3150_v10  ;;  %v7313_v50 = vld [vmem:[#allocation2 + $0x111] sm:$0xff]  ;;  %v2912_v59 = vadd.f32 %v7259_v62, %v2880_v15  ;;  %v2979_v9 = vadd.f32 %v2947_v2, %v2911_v47 }
 0x25a   : > { %v7291_v0 = vadd.f32 %v4703_v36, %v2414_v63  ;;  %v3494_v3 = vmul.f32 %v6893_v56, %v7313_v50  ;;  %v4654_v63 = vpop.f32.mrf.mxu0 }
 0x25b   : > { %v2671_v16 = vpop.f32.mrf.mxu1  ;;  %v3285_v37 = vadd.f32 %v3253_v20, %v3217_v58  ;;  %v3286_v46 = vadd.f32 %v3254_v22, %v3218_v57  ;;  %v2980_v36 = vadd.f32 %v2948_v17, %v2912_v59  ;;  %v3360_v59 = vmul.f32 %v8370_v33, %v7250_v32 }
 0x25c   : > { %8376 = vst [vmem:[#allocation24_spill] sm:$0xff] %v7291_v0  ;;  %2803 = vst.msk [vmem:[#allocation2 + $0x130] sm:$0xff] %vm2785_vm2, %v7291_v0  ;;  %v7299_v11 = vadd.f32 %v2671_v16, %v2413_v25  ;;  %v3119_v25 = vmul.f32 %v6556_v60, %v7210_v1  ;;  %v3120_v16 = vmul.f32 %v6556_v60, %v7217_v43 }
 0x25d   : > { %v3389_v24 = vadd.f32 %v3357_v35, %v3285_v37  ;;  %v3390_v18 = vadd.f32 %v3358_v53, %v3286_v46  ;;  %v2328_v37 = vpop.f32.mrf.mxu0  ;;  %v3187_v46 = vmul.f32 %v8365_v34, %v7277_v38  ;;  %v2881_v32 = vmul.f32 %v6522_v30, %v7265_v14 }
 0x25e   : > { %8377 = vst [vmem:[#allocation14_spill] sm:$0xff] %v7299_v11  ;;  %2802 = vst.msk [vmem:[#allocation2 + $0x128] sm:$0xff] %vm2785_vm2, %v7299_v11 }
 0x25f   : > { %v3457_v6 = vadd.f32 %v3425_v44, %v3389_v24  ;;  %v3458_v42 = vadd.f32 %v3426_v12, %v3390_v18  ;;  %v7350_v24 = vld [vmem:[%s8147_s6] ss:$0 sm:$0xff]  ;;  %v3188_v18 = vmul.f32 %v8365_v34, %v7283_v40 }
 0x260   : > { %v2416_v1 = vadd.f32 %v7350_v24, %v4654_v63  ;;  %v2415_v12 = vadd.f32 %v7350_v24, %v2328_v37 }
 0x261   : > { %v3525_v45 = vadd.f32 %v3493_v5, %v3457_v6  ;;  %v3526_v4 = vadd.f32 %v3494_v3, %v3458_v42  ;;  %v3359_v3 = vmul.f32 %v8370_v33, %v7236_v41 }
 0x263   : > { %3601 = vrot.lane.b32.xlu0 %v3525_v45, %s4838_s16  ;;  %v7345_v53 = vld [vmem:[#allocation2 + $0x130] sm:$0xff] }
 0x264   : > { %v3256_v42 = vmul.f32 %v8356_v39, %v7345_v53 }
 0x265   : > { %v7327_v13 = vld [vmem:[#allocation2 + $0x127] sm:$0xff]  ;;  %v7332_v55 = vld [vmem:[#allocation2 + $0x12f] sm:$0xff] }
 0x266   : > { %v3015_v10 = vmul.f32 %v8351_v61, %v7327_v13  ;;  %v3016_v58 = vmul.f32 %v8351_v61, %v7332_v55  ;;  %v7339_v57 = vld [vmem:[#allocation2 + $0x128] sm:$0xff]  ;;  %v2949_v37 = vmul.f32 %v8345_v28, %v7327_v13 }
 0x267   : > { %3603 = vrot.lane.b32.xlu0 %v3526_v4, %s4838_s16  ;;  %v3255_v5 = vmul.f32 %v8356_v39, %v7339_v57  ;;  %v7368_v47 = vld [vmem:[#allocation2 + $0x129] sm:$0xff] }
 0x268   : > { %v3047_v20 = vadd.f32 %v3015_v10, %v2979_v9  ;;  %v3048_v22 = vadd.f32 %v3016_v58, %v2980_v36  ;;  %v3427_v9 = vmul.f32 %v8360_v29, %v7301_v21  ;;  %v3495_v36 = vmul.f32 %v6893_v56, %v7368_v47 }
 0x269   : > { %v3428_v58 = vmul.f32 %v8360_v29, %v7313_v50 }
 0x26a   : > { %v3151_v35 = vadd.f32 %v3119_v25, %v3047_v20  ;;  %v3152_v44 = vadd.f32 %v3120_v16, %v3048_v22  ;;  %v7380_v20 = vld [vmem:[#allocation2 + $0x131] sm:$0xff]  ;;  %v2882_v16 = vmul.f32 %v6522_v30, %v7270_v27 }
 0x26c   : > { %v4706_v6 = vpop.f32.mrf.mxu1  ;;  %v3219_v43 = vadd.f32 %v3187_v46, %v3151_v35  ;;  %v3220_v45 = vadd.f32 %v3188_v18, %v3152_v44  ;;  %v3496_v35 = vmul.f32 %v6893_v56, %v7380_v20  ;;  %v2950_v46 = vmul.f32 %v8345_v28, %v7332_v55 }
 0x26d   : > { %v7358_v19 = vadd.f32 %v4706_v6, %v2416_v1  ;;  %v2913_v1 = vadd.f32 %v7259_v62, %v2881_v32  ;;  %v2914_v18 = vadd.f32 %v7259_v62, %v2882_v16  ;;  %v4657_v6 = vpop.f32.mrf.mxu0 }
 0x26e   : > { %v2681_v15 = vpop.f32.mrf.mxu1  ;;  %v3287_v2 = vadd.f32 %v3255_v5, %v3219_v43  ;;  %v3288_v4 = vadd.f32 %v3256_v42, %v3220_v45 }
 0x26f   : > { %8378 = vst [vmem:[#allocation10_spill] sm:$0xff] %v7358_v19  ;;  %2805 = vst.msk [vmem:[#allocation2 + $0x150] sm:$0xff] %vm2785_vm2, %v7358_v19  ;;  %v7366_v17 = vadd.f32 %v2681_v15, %v2415_v12  ;;  %v2981_v27 = vadd.f32 %v2949_v37, %v2913_v1  ;;  %v2982_v12 = vadd.f32 %v2950_v46, %v2914_v18 }
 0x270   : > { %v3391_v63 = vadd.f32 %v3359_v3, %v3287_v2  ;;  %v3392_v10 = vadd.f32 %v3360_v59, %v3288_v4  ;;  %v3121_v15 = vmul.f32 %v6556_v60, %v7277_v38  ;;  %v3122_v4 = vmul.f32 %v6556_v60, %v7283_v40  ;;  %v2338_v59 = vpop.f32.mrf.mxu0 }
 0x271   : > { %8379 = vst [vmem:[#allocation25_spill] sm:$0xff] %v7366_v17  ;;  %2804 = vst.msk [vmem:[#allocation2 + $0x148] sm:$0xff] %vm2785_vm2, %v7366_v17  ;;  %v2417_v40 = vadd.f32 %v7350_v24, %v2338_v59  ;;  %v3361_v1 = vmul.f32 %v8370_v33, %v7301_v21 }
 0x272   : > { %v3459_v41 = vadd.f32 %v3427_v9, %v3391_v63  ;;  %v3460_v22 = vadd.f32 %v3428_v58, %v3392_v10  ;;  %v3189_v9 = vmul.f32 %v8365_v34, %v7339_v57  ;;  %v3190_v58 = vmul.f32 %v8365_v34, %v7345_v53 }
 0x274   : > { %v3527_v25 = vadd.f32 %v3495_v36, %v3459_v41  ;;  %v3528_v44 = vadd.f32 %v3496_v35, %v3460_v22  ;;  %v2418_v41 = vadd.f32 %v7350_v24, %v4657_v6 }
 0x276   : > { %3605 = vrot.lane.b32.xlu1 %v3527_v25, %s4838_s16  ;;  %v7412_v10 = vld [vmem:[#allocation2 + $0x150] sm:$0xff] }
 0x277   : > { %v3258_v37 = vmul.f32 %v8356_v39, %v7412_v10 }
 0x278   : > { %v7394_v14 = vld [vmem:[#allocation2 + $0x147] sm:$0xff]  ;;  %v7399_v5 = vld [vmem:[#allocation2 + $0x14f] sm:$0xff] }
 0x279   : > { %v3017_v43 = vmul.f32 %v8351_v61, %v7394_v14  ;;  %v3018_v45 = vmul.f32 %v8351_v61, %v7399_v5  ;;  %v7406_v2 = vld [vmem:[#allocation2 + $0x148] sm:$0xff] }
 0x27a   : > { %3607 = vrot.lane.b32.xlu1 %v3528_v44, %s4838_s16  ;;  %v3257_v25 = vmul.f32 %v8356_v39, %v7406_v2  ;;  %v7430_v18 = vld [vmem:[#allocation2 + $0x149] sm:$0xff] }
 0x27b   : > { %v3049_v42 = vadd.f32 %v3017_v43, %v2981_v27  ;;  %v3050_v3 = vadd.f32 %v3018_v45, %v2982_v12  ;;  %v3362_v27 = vmul.f32 %v8370_v33, %v7313_v50  ;;  %v3429_v12 = vmul.f32 %v8360_v29, %v7368_v47 }
 0x27c   : > { %v2883_v50 = vmul.f32 %v6522_v30, %v7327_v13 }
 0x27d   : > { %v3153_v63 = vadd.f32 %v3121_v15, %v3049_v42  ;;  %v3154_v36 = vadd.f32 %v3122_v4, %v3050_v3  ;;  %v3497_v42 = vmul.f32 %v6893_v56, %v7430_v18  ;;  %v3430_v15 = vmul.f32 %v8360_v29, %v7380_v20  ;;  %v7442_v3 = vld [vmem:[#allocation2 + $0x151] sm:$0xff] }
 0x27f   : > { %v4709_v38 = vpop.f32.mrf.mxu1  ;;  %v3221_v32 = vadd.f32 %v3189_v9, %v3153_v63  ;;  %v3222_v16 = vadd.f32 %v3190_v58, %v3154_v36  ;;  %v2884_v63 = vmul.f32 %v6522_v30, %v7332_v55  ;;  %v2951_v9 = vmul.f32 %v8345_v28, %v7394_v14 }
 0x280   : > { %v7420_v22 = vadd.f32 %v4709_v38, %v2418_v41  ;;  %v3498_v41 = vmul.f32 %v6893_v56, %v7442_v3  ;;  %v2952_v36 = vmul.f32 %v8345_v28, %v7399_v5  ;;  %v2915_v58 = vadd.f32 %v7259_v62, %v2883_v50 }
 0x281   : > { %v2691_v35 = vpop.f32.mrf.mxu1  ;;  %v3289_v46 = vadd.f32 %v3257_v25, %v3221_v32  ;;  %v3290_v6 = vadd.f32 %v3258_v37, %v3222_v16  ;;  %v2916_v32 = vadd.f32 %v7259_v62, %v2884_v63  ;;  %v4660_v25 = vpop.f32.mrf.mxu0  ;;  %v3192_v50 = vmul.f32 %v8365_v34, %v7412_v10 }
 0x282   : > { %8380 = vst [vmem:[#allocation16_spill] sm:$0xff] %v7420_v22  ;;  %2807 = vst.msk [vmem:[#allocation2 + $0x170] sm:$0xff] %vm2785_vm2, %v7420_v22  ;;  %v7428_v44 = vadd.f32 %v2691_v35, %v2417_v40  ;;  %v2983_v55 = vadd.f32 %v2951_v9, %v2915_v58 }
 0x283   : > { %v3393_v43 = vadd.f32 %v3361_v1, %v3289_v46  ;;  %v3394_v45 = vadd.f32 %v3362_v27, %v3290_v6  ;;  %v2984_v56 = vadd.f32 %v2952_v36, %v2916_v32  ;;  %v3123_v46 = vmul.f32 %v6556_v60, %v7339_v57 }
 0x284   : > { %8381 = vst [vmem:[#allocation26_spill] sm:$0xff] %v7428_v44  ;;  %2806 = vst.msk [vmem:[#allocation2 + $0x168] sm:$0xff] %vm2785_vm2, %v7428_v44  ;;  %v3124_v27 = vmul.f32 %v6556_v60, %v7345_v53 }
 0x285   : > { %v3461_v21 = vadd.f32 %v3429_v12, %v3393_v43  ;;  %v3462_v59 = vadd.f32 %v3430_v15, %v3394_v45  ;;  %v2348_v43 = vpop.f32.mrf.mxu0  ;;  %v3191_v45 = vmul.f32 %v8365_v34, %v7406_v2 }
 0x286   : > { %v2419_v53 = vadd.f32 %v7350_v24, %v2348_v43  ;;  %v2885_v43 = vmul.f32 %v6522_v30, %v7394_v14 }
 0x287   : > { %v3529_v4 = vadd.f32 %v3497_v42, %v3461_v21  ;;  %v3530_v38 = vadd.f32 %v3498_v41, %v3462_v59  ;;  %v2420_v42 = vadd.f32 %v7350_v24, %v4660_v25 }
 0x289   : > { %3609 = vrot.lane.b32.xlu0 %v3529_v4, %s4838_s16  ;;  %v7474_v21 = vld [vmem:[#allocation2 + $0x170] sm:$0xff] }
 0x28a   : > { %v3260_v41 = vmul.f32 %v8356_v39, %v7474_v21 }
 0x28b   : > { %v7456_v13 = vld [vmem:[#allocation2 + $0x167] sm:$0xff]  ;;  %v7461_v16 = vld [vmem:[#allocation2 + $0x16f] sm:$0xff] }
 0x28c   : > { %v3019_v40 = vmul.f32 %v8351_v61, %v7456_v13  ;;  %v3020_v37 = vmul.f32 %v8351_v61, %v7461_v16  ;;  %v7468_v1 = vld [vmem:[#allocation2 + $0x168] sm:$0xff] }
 0x28d   : > { %3611 = vrot.lane.b32.xlu0 %v3530_v38, %s4838_s16  ;;  %v3259_v59 = vmul.f32 %v8356_v39, %v7468_v1  ;;  %v3363_v38 = vmul.f32 %v8370_v33, %v7368_v47  ;;  %v7492_v25 = vld [vmem:[#allocation2 + $0x169] sm:$0xff] }
 0x28e   : > { %v3051_v35 = vadd.f32 %v3019_v40, %v2983_v55  ;;  %v3052_v6 = vadd.f32 %v3020_v37, %v2984_v56  ;;  %v3364_v40 = vmul.f32 %v8370_v33, %v7380_v20  ;;  %v3431_v37 = vmul.f32 %v8360_v29, %v7430_v18 }
 0x28f   : > { %v3432_v20 = vmul.f32 %v8360_v29, %v7442_v3 }
 0x290   : > { %v3155_v12 = vadd.f32 %v3123_v46, %v3051_v35  ;;  %v3156_v15 = vadd.f32 %v3124_v27, %v3052_v6  ;;  %v7503_v46 = vld [vmem:[%s8148_s7 + $0x8] ss:$0 sm:$0xff]  ;;  %v7509_v27 = vld [vmem:[#allocation2 + $0x171] sm:$0xff] }
 0x291   : > { %v3499_v6 = vmul.f32 %v7503_v46, %v7492_v25 }
 0x292   : > { %v4712_v57 = vpop.f32.mrf.mxu1  ;;  %v3223_v4 = vadd.f32 %v3191_v45, %v3155_v12  ;;  %v3224_v9 = vadd.f32 %v3192_v50, %v3156_v15  ;;  %v2953_v15 = vmul.f32 %v8345_v28, %v7456_v13  ;;  %v3500_v50 = vmul.f32 %v7503_v46, %v7509_v27 }
 0x293   : > { %v7482_v63 = vadd.f32 %v4712_v57, %v2420_v42  ;;  %v2886_v42 = vmul.f32 %v6522_v30, %v7399_v5  ;;  %v2954_v57 = vmul.f32 %v8345_v28, %v7461_v16 }
 0x294   : > { %v2701_v36 = vpop.f32.mrf.mxu1  ;;  %v3291_v58 = vadd.f32 %v3259_v59, %v3223_v4  ;;  %v3292_v55 = vadd.f32 %v3260_v41, %v3224_v9  ;;  %v2917_v4 = vadd.f32 %v7259_v62, %v2885_v43  ;;  %v3194_v43 = vmul.f32 %v8365_v34, %v7474_v21 }
 0x295   : > { %8382 = vst [vmem:[#allocation21_spill] sm:$0xff] %v7482_v63  ;;  %2809 = vst.msk [vmem:[#allocation2 + $0x190] sm:$0xff] %vm2785_vm2, %v7482_v63  ;;  %v7490_v32 = vadd.f32 %v2701_v36, %v2419_v53  ;;  %v2918_v53 = vadd.f32 %v7259_v62, %v2886_v42 }
 0x296   : > { %v3395_v56 = vadd.f32 %v3363_v38, %v3291_v58  ;;  %v3396_v35 = vadd.f32 %v3364_v40, %v3292_v55  ;;  %v2985_v9 = vadd.f32 %v2953_v15, %v2917_v4  ;;  %v3125_v55 = vmul.f32 %v6556_v60, %v7406_v2 }
 0x297   : > { %8383 = vst [vmem:[#allocation13_spill] sm:$0xff] %v7490_v32  ;;  %2808 = vst.msk [vmem:[#allocation2 + $0x188] sm:$0xff] %vm2785_vm2, %v7490_v32  ;;  %v2986_v36 = vadd.f32 %v2954_v57, %v2918_v53  ;;  %v3366_v4 = vmul.f32 %v8370_v33, %v7442_v3  ;;  %v3433_v53 = vmul.f32 %v8360_v29, %v7492_v25 }
 0x298   : > { %v3463_v47 = vadd.f32 %v3431_v37, %v3395_v56  ;;  %v3464_v45 = vadd.f32 %v3432_v20, %v3396_v35  ;;  %v3126_v37 = vmul.f32 %v6556_v60, %v7412_v10  ;;  %v3365_v10 = vmul.f32 %v8370_v33, %v7430_v18  ;;  %v4663_v18 = vpop.f32.mrf.mxu0 }
 0x29a   : > { %v3531_v12 = vadd.f32 %v3499_v6, %v3463_v47  ;;  %v3532_v59 = vadd.f32 %v3500_v50, %v3464_v45  ;;  %v3193_v47 = vmul.f32 %v8365_v34, %v7468_v1 }
 0x29c   : > { %3613 = vrot.lane.b32.xlu1 %v3531_v12, %s4838_s16  ;;  %v7541_v6 = vld [vmem:[#allocation2 + $0x190] sm:$0xff] }
 0x29d   : > { %v3262_v42 = vmul.f32 %v8356_v39, %v7541_v6 }
 0x29e   : > { %v7523_v14 = vld [vmem:[#allocation2 + $0x187] sm:$0xff]  ;;  %v7528_v41 = vld [vmem:[#allocation2 + $0x18f] sm:$0xff] }
 0x29f   : > { %v3021_v5 = vmul.f32 %v8351_v61, %v7523_v14  ;;  %v3022_v58 = vmul.f32 %v8351_v61, %v7528_v41  ;;  %v7535_v40 = vld [vmem:[#allocation2 + $0x188] sm:$0xff] }
 0x2a0   : > { %3615 = vrot.lane.b32.xlu1 %v3532_v59, %s4838_s16  ;;  %v3261_v2 = vmul.f32 %v8356_v39, %v7535_v40  ;;  %v7551_v50 = vld [vmem:[#allocation2 + $0x189] sm:$0xff] }
 0x2a1   : > { %v3053_v38 = vadd.f32 %v3021_v5, %v2985_v9  ;;  %v3054_v56 = vadd.f32 %v3022_v58, %v2986_v36  ;;  %v3501_v36 = vmul.f32 %v7503_v46, %v7551_v50  ;;  %v3434_v58 = vmul.f32 %v8360_v29, %v7509_v27 }
 0x2a3   : > { %v3157_v35 = vadd.f32 %v3125_v55, %v3053_v38  ;;  %v3158_v20 = vadd.f32 %v3126_v37, %v3054_v56  ;;  %v7561_v38 = vld [vmem:[#allocation2 + $0x191] sm:$0xff]  ;;  %v2358_v37 = vpop.f32.mrf.mxu0 }
 0x2a4   : > { %v3502_v3 = vmul.f32 %v7503_v46, %v7561_v38 }
 0x2a5   : > { %v3225_v12 = vadd.f32 %v3193_v47, %v3157_v35  ;;  %v3226_v45 = vadd.f32 %v3194_v43, %v3158_v20  ;;  %v2422_v47 = vadd.f32 %v7350_v24, %v4663_v18  ;;  %v2421_v43 = vadd.f32 %v7350_v24, %v2358_v37  ;;  %v4666_v37 = vpop.f32.mrf.mxu0 }
 0x2a6   : > { %v3127_v18 = vmul.f32 %v6556_v60, %v7468_v1 }
 0x2a7   : > { %v3293_v15 = vadd.f32 %v3261_v2, %v3225_v12  ;;  %v3294_v57 = vadd.f32 %v3262_v42, %v3226_v45  ;;  %v2887_v42 = vmul.f32 %v6522_v30, %v7456_v13 }
 0x2a9   : > { %v3397_v59 = vadd.f32 %v3365_v10, %v3293_v15  ;;  %v3398_v9 = vadd.f32 %v3366_v4, %v3294_v57  ;;  %v2888_v15 = vmul.f32 %v6522_v30, %v7461_v16  ;;  %v2955_v10 = vmul.f32 %v8345_v28, %v7523_v14 }
 0x2aa   : > { %v2956_v57 = vmul.f32 %v8345_v28, %v7528_v41  ;;  %v2919_v4 = vadd.f32 %v7259_v62, %v2887_v42 }
 0x2ab   : > { %v3465_v5 = vadd.f32 %v3433_v53, %v3397_v59  ;;  %v3466_v56 = vadd.f32 %v3434_v58, %v3398_v9  ;;  %v2920_v53 = vadd.f32 %v7259_v62, %v2888_v15 }
 0x2ac   : > { %v2987_v9 = vadd.f32 %v2955_v10, %v2919_v4  ;;  %v3367_v4 = vmul.f32 %v8370_v33, %v7492_v25 }
 0x2ad   : > { %v3533_v55 = vadd.f32 %v3501_v36, %v3465_v5  ;;  %v3534_v35 = vadd.f32 %v3502_v3, %v3466_v56  ;;  %v2988_v36 = vadd.f32 %v2956_v57, %v2920_v53  ;;  %v3128_v3 = vmul.f32 %v6556_v60, %v7474_v21  ;;  %v2368_v21 = vpop.f32.mrf.mxu0  ;;  %v7613_v53 = vpop.permute.xlu0 %3577 }
 0x2af   : > { %3617 = vrot.lane.b32.xlu0 %v3533_v55, %s4838_s16 }
 0x2b3   : > { %3619 = vrot.lane.b32.xlu0 %v3534_v35, %s4838_s16 }
 0x2b4   : > { %v4715_v20 = vpop.f32.mrf.mxu1 }
 0x2b5   : > { %v7569_v12 = vadd.f32 %v4715_v20, %v2422_v47  ;;  %v3195_v47 = vmul.f32 %v8365_v34, %v7535_v40 }
 0x2b6   : > { %v2711_v2 = vpop.f32.mrf.mxu1 }
 0x2b7   : > { %8384 = vst [vmem:[#allocation27_spill] sm:$0xff] %v7569_v12  ;;  %2811 = vst.msk [vmem:[#allocation2 + $0x1b0] sm:$0xff] %vm2785_vm2, %v7569_v12  ;;  %v7573_v45 = vadd.f32 %v2711_v2, %v2421_v43  ;;  %v3196_v2 = vmul.f32 %v8365_v34, %v7541_v6 }
 0x2b9   : > { %8385 = vst [vmem:[#allocation28_spill] sm:$0xff] %v7573_v45  ;;  %2810 = vst.msk [vmem:[#allocation2 + $0x1a8] sm:$0xff] %vm2785_vm2, %v7573_v45 }
 0x2be   : > { %v7603_v20 = vld [vmem:[#allocation2 + $0x1b0] sm:$0xff] }
 0x2bf   : > { %v3264_v10 = vmul.f32 %v8356_v39, %v7603_v20 }
 0x2c0   : > { %v7586_v59 = vld [vmem:[#allocation2 + $0x1a7] sm:$0xff]  ;;  %v7591_v13 = vld [vmem:[#allocation2 + $0x1af] sm:$0xff] }
 0x2c1   : > { %v3023_v5 = vmul.f32 %v8351_v61, %v7586_v59  ;;  %v3024_v16 = vmul.f32 %v8351_v61, %v7591_v13  ;;  %v7597_v55 = vld [vmem:[#allocation2 + $0x1a8] sm:$0xff] }
 0x2c2   : > { %v3263_v1 = vmul.f32 %v8356_v39, %v7597_v55 }
 0x2c3   : > { %v3055_v58 = vadd.f32 %v3023_v5, %v2987_v9  ;;  %v3056_v56 = vadd.f32 %v3024_v16, %v2988_v36  ;;  %v7615_v9 = vld [vmem:[#allocation2 + $0x1a9] sm:$0xff]  ;;  %v3368_v36 = vmul.f32 %v8370_v33, %v7509_v27  ;;  %v2424_v16 = vadd.f32 %v7350_v24, %v4666_v37 }
 0x2c5   : > { %v3159_v35 = vadd.f32 %v3127_v18, %v3055_v58  ;;  %v3160_v43 = vadd.f32 %v3128_v3, %v3056_v56  ;;  %v3435_v18 = vmul.f32 %v8360_v29, %v7551_v50  ;;  %v2423_v56 = vadd.f32 %v7350_v24, %v2368_v21 }
 0x2c7   : > { %v3227_v42 = vadd.f32 %v3195_v47, %v3159_v35  ;;  %v3228_v15 = vadd.f32 %v3196_v2, %v3160_v43  ;;  %v3503_v43 = vmul.f32 %v7503_v46, %v7615_v9  ;;  %v3436_v2 = vmul.f32 %v8360_v29, %v7561_v38 }
 0x2c9   : > { %v3295_v57 = vadd.f32 %v3263_v1, %v3227_v42  ;;  %v3296_v5 = vadd.f32 %v3264_v10, %v3228_v15  ;;  %v7629_v42 = vld [vmem:[#allocation2 + $0x1b1] sm:$0xff]  ;;  %v7635_v10 = vpop.permute.xlu0 %3579 }
 0x2ca   : > { %8388 = vst [vmem:[#allocation20_spill] sm:$0xff] %v7635_v10  ;;  %v3504_v21 = vmul.f32 %v7503_v46, %v7629_v42 }
 0x2cb   : > { %v3399_v58 = vadd.f32 %v3367_v4, %v3295_v57  ;;  %v3400_v35 = vadd.f32 %v3368_v36, %v3296_v5  ;;  %v3582_v57 = vpop.permute.xlu1 %3581  ;;  %v2889_v5 = vmul.f32 %v6522_v30, %v7523_v14  ;;  %v2957_v36 = vmul.f32 %v8345_v28, %v7586_v59 }
 0x2cd   : > { %v4718_v3 = vpop.f32.mrf.mxu1  ;;  %v3467_v25 = vadd.f32 %v3435_v18, %v3399_v58  ;;  %v3468_v15 = vadd.f32 %v3436_v2, %v3400_v35  ;;  %v4669_v58 = vpop.f32.mrf.mxu0  ;;  %v2921_v18 = vadd.f32 %v7259_v62, %v2889_v5  ;;  %v4839_v2 = vmov 1983009808  }
 0x2ce   : > { %v7623_v47 = vadd.f32 %v4718_v3, %v2424_v16  ;;  %v3586_v16 = vpop.permute.xlu0 %3585 }
 0x2cf   : > { %v2721_v27 = vpop.f32.mrf.mxu1  ;;  %v3535_v1 = vadd.f32 %v3503_v43, %v3467_v25  ;;  %v3536_v4 = vadd.f32 %v3504_v21, %v3468_v15  ;;  %v7650_v3 = vpop.permute.xlu1 %3583  ;;  %v2989_v25 = vadd.f32 %v2957_v36, %v2921_v18  ;;  %v2958_v43 = vmul.f32 %v8345_v28, %v7591_v13 }
 0x2d0   : > { %8386 = vst [vmem:[#allocation15_spill] sm:$0xff] %v7623_v47  ;;  %2813 = vst.msk [vmem:[#allocation2 + $0x1d0] sm:$0xff] %vm2785_vm2, %v7623_v47  ;;  %v7633_v37 = vadd.f32 %v2721_v27, %v2423_v56  ;;  %v2890_v56 = vmul.f32 %v6522_v30, %v7528_v41  ;;  %v3708_v27 = vunpack.c.l.s4 %v4839_v2  ;;  %v2378_v15 = vpop.f32.mrf.mxu0  ;;  %v3129_v41 = vmul.f32 %v6556_v60, %v7535_v40 }
 0x2d1   : > { %3621 = vrot.lane.b32.xlu1 %v3535_v1, %s4838_s16  ;;  %8389 = vst [vmem:[#allocation18_spill] sm:$0xff] %v7650_v3  ;;  %v2426_v18 = vadd.f32 %v7350_v24, %v4669_v58  ;;  %v3197_v2 = vmul.f32 %v8365_v34, %v7597_v55  ;;  %v2425_v40 = vadd.f32 %v7350_v24, %v2378_v15 }
 0x2d2   : > { %8387 = vst [vmem:[#allocation19_spill] sm:$0xff] %v7633_v37  ;;  %2812 = vst.msk [vmem:[#allocation2 + $0x1c8] sm:$0xff] %vm2785_vm2, %v7633_v37  ;;  %v7663_v5 = vpop.permute.xlu0 %3587 }
 0x2d3   : > { %8390 = vst [vmem:[#allocation33_spill] sm:$0xff] %v7663_v5  ;;  %v3590_v36 = vpop.permute.xlu1 %3589 }
 0x2d5   : > { %3623 = vrot.lane.b32.xlu1 %v3536_v4, %s4838_s16  ;;  %v2922_v4 = vadd.f32 %v7259_v62, %v2890_v56 }
 0x2d7   : > { %v2990_v19 = vadd.f32 %v2958_v43, %v2922_v4  ;;  %v8393_v4 = vld [vmem:[#allocation42_spill] sm:$0xff] }
 0x2d9   : > { %v7652_v35 = vld [vmem:[#allocation2 + $0x1c7] sm:$0xff]  ;;  %v7658_v1 = vld [vmem:[#allocation2 + $0x1cf] sm:$0xff] }
 0x2da   : > { %v3025_v14 = vmul.f32 %v8351_v61, %v7652_v35  ;;  %v7666_v0 = vld [vmem:[#allocation2 + $0x1c8] sm:$0xff]  ;;  %v2894_v51 = vmul.f32 %v6522_v30, %v7658_v1 }
 0x2db   : > { %v3265_v58 = vmul.f32 %v8356_v39, %v7666_v0  ;;  %v3133_v3 = vmul.f32 %v6556_v60, %v7666_v0 }
 0x2dc   : > { %v3057_v21 = vadd.f32 %v3025_v14, %v2989_v25  ;;  %v3026_v25 = vmul.f32 %v8351_v61, %v7658_v1  ;;  %v3709_v14 = vunpack.c.0.s8 %v3708_v27  ;;  %v7687_v27 = vld [vmem:[#allocation2 + $0x1d0] sm:$0xff] }
 0x2de   : > { %v4721_v12 = vpop.f32.mrf.mxu1  ;;  %v3161_v22 = vadd.f32 %v3129_v41, %v3057_v21  ;;  %v3058_v37 = vadd.f32 %v3026_v25, %v2990_v19  ;;  %v3130_v21 = vmul.f32 %v6556_v60, %v7541_v6  ;;  %v7679_v41 = vpop.permute.xlu0 %3593  ;;  %v3198_v6 = vmul.f32 %v8365_v34, %v7603_v20  ;;  %v8395_v25 = vld [vmem:[#allocation43_spill] sm:$0xff] }
 0x2df   : > { %v7673_v56 = vadd.f32 %v4721_v12, %v2426_v18  ;;  %v3369_v12 = vmul.f32 %v8370_v33, %v7551_v50  ;;  %v7697_v18 = vsel %vm2785_vm2, %v8393_v4, %v3582_v57  ;;  %v7704_v50 = vsel %vm2785_vm2, %v8395_v25, %v3586_v16  ;;  %v8397_v16 = vld [vmem:[#allocation40_spill] sm:$0xff] }
 0x2e0   : > { %v2731_v47 = vpop.f32.mrf.mxu1  ;;  %v3229_v63 = vadd.f32 %v3197_v2, %v3161_v22  ;;  %v7691_v22 = vsel %vm2785_vm2, %v6936_v52, %v3590_v36  ;;  %v3162_v15 = vadd.f32 %v3130_v21, %v3058_v37  ;;  %v7706_v52 = vpop.permute.xlu1 %3591  ;;  %v3437_v57 = vmul.f32 %v8360_v29, %v7615_v9 }
 0x2e1   : > { %8391 = vst [vmem:[#allocation3_spill] sm:$0xff] %v7673_v56  ;;  %2815 = vst.msk [vmem:[#allocation2 + $0x1f0] sm:$0xff] %vm2785_vm2, %v7673_v56  ;;  %v7683_v43 = vadd.f32 %v2731_v47, %v2425_v40  ;;  %v8394_v47 = vld [vmem:[#allocation12_spill] sm:$0xff]  ;;  %v4840_v40 = vmov 1934713408   ;;  %v4672_v37 = vpop.f32.mrf.mxu0  ;;  %v7719_v21 = vsel %vm2785_vm2, %v8397_v16, %v7613_v53  ;;  %v3721_v4 = vcombine.low %v7697_v18, %v7691_v22 }
 0x2e2   : > { %v3297_v19 = vadd.f32 %v3265_v58, %v3229_v63  ;;  %v7700_v2 = vsub.s32 %v3709_v14, %v8394_v47  ;;  %v3772_v56 = vunpack.c.l.s4 %v4840_v40  ;;  %8396 = vst [vmem:[#allocation37_spill] sm:$0xff] %v7706_v52  ;;  %v7710_v63 = vld [vmem:[#allocation2 + $0x1c9] sm:$0xff]  ;;  %v3230_v14 = vadd.f32 %v3198_v6, %v3162_v15  ;;  %v7731_v45 = vpop.permute.xlu0 %3595 }
 0x2e3   : > { %8392 = vst [vmem:[#allocation32_spill] sm:$0xff] %v7683_v43  ;;  %2814 = vst.msk [vmem:[#allocation2 + $0x1e8] sm:$0xff] %vm2785_vm2, %v7683_v43  ;;  %v3266_v58 = vmul.f32 %v8356_v39, %v7687_v27  ;;  %v2891_v25 = vmul.f32 %v6522_v30, %v7586_v59  ;;  %v3505_v6 = vmul.f32 %v7503_v46, %v7710_v63  ;;  %v2388_v11 = vpop.f32.mrf.mxu0 }
 0x2e4   : > { %v3401_v36 = vadd.f32 %v3369_v12, %v3297_v19  ;;  %v3370_v12 = vmul.f32 %v8370_v33, %v7561_v38  ;;  %v3705_v19 = vcombine.low %v7719_v21, %v7704_v50  ;;  %8398 = vst [vmem:[#allocation36_spill] sm:$0xff] %v7731_v45  ;;  %v3598_v53 = vpop.permute.xlu1 %3597  ;;  %v2959_v16 = vmul.f32 %v8345_v28, %v7652_v35 }
 0x2e5   : > { %v3298_v40 = vadd.f32 %v3266_v58, %v3230_v14  ;;  %v3773_v43 = vunpack.c.0.s8 %v3772_v56  ;;  %v7738_v38 = vrot.slane %v3721_v4, %v7700_v2  ;;  %v2427_v56 = vadd.f32 %v7350_v24, %v2388_v11 }
 0x2e6   : > { %v3469_v15 = vadd.f32 %v3437_v57, %v3401_v36  ;;  %v2428_v36 = vadd.f32 %v7350_v24, %v4672_v37  ;;  %v2923_v57 = vadd.f32 %v7259_v62, %v2891_v25  ;;  %v7743_v14 = vrot.slane %v3705_v19, %v7700_v2  ;;  %v3602_v32 = vpop.permute.xlu0 %3601  ;;  %v3339_v19 = vld [vmem:[#allocation2 + $0x229] sm:$0xff] }
 0x2e7   : > { %v7735_v44 = vadd.f32 %v3370_v12, %v3298_v40  ;;  %v7751_v37 = vsub.s32 %v3773_v43, %v8394_v47  ;;  %v3099_v40 = vld [vmem:[#allocation2 + $0x228] sm:$0xff]  ;;  %v3100_v43 = vld [vmem:[#allocation2 + $0x230] sm:$0xff]  ;;  %v7765_v47 = vsel %vm2785_vm2, %v7148_v7, %v3602_v32  ;;  %v7782_v7 = vmul.f32 %v7503_v46, %v3339_v19 }
 0x2e8   : > { %v3537_v59 = vadd.f32 %v3505_v6, %v3469_v15  ;;  %v2991_v12 = vadd.f32 %v2959_v16, %v2923_v57  ;;  %v2859_v6 = vld [vmem:[#allocation2 + $0x227] sm:$0xff]  ;;  %v3769_v10 = vcombine.low %v7743_v14, %v7738_v38  ;;  %v3131_v16 = vmul.f32 %v6556_v60, %v7597_v55 }
 0x2e9   : > { %v3199_v55 = vmul.f32 %v8365_v34, %v7666_v0  ;;  %v7787_v32 = vsel %vm2785_vm2, %v6996_v8, %v7679_v41 }
 0x2ea   : > { %3625 = vrot.lane.b32.xlu0 %v3537_v59, %s4838_s16  ;;  %v2855_v17 = vld [vmem:[#allocation2 + $0x1e7] sm:$0xff]  ;;  %v7755_v59 = vpop.permute.xlu1 %3599  ;;  %v2856_v41 = vld [vmem:[#allocation2 + $0x1ef] sm:$0xff] }
 0x2eb   : > { %v4724_v58 = vpop.f32.mrf.mxu1  ;;  %v3027_v4 = vmul.f32 %v8351_v61, %v2855_v17  ;;  %8400 = vst [vmem:[#allocation5_spill] sm:$0xff] %v7755_v59  ;;  %v7767_v57 = vld [vmem:[#allocation2 + $0x1e8] sm:$0xff]  ;;  %v2962_v5 = vmul.f32 %v8345_v28, %v2856_v41  ;;  %v2896_v26 = vmul.f32 %v6522_v30, %v2856_v41 }
 0x2ec   : > { %v7747_v15 = vadd.f32 %v4724_v58, %v2428_v36  ;;  %v2860_v36 = vld [vmem:[#allocation2 + $0x22f] sm:$0xff]  ;;  %v7770_v58 = vmul.f32 %v8351_v61, %v2859_v6  ;;  %v7795_v6 = vmul.f32 %v8356_v39, %v3100_v43  ;;  %v3267_v8 = vmul.f32 %v8356_v39, %v7767_v57 }
 0x2ed   : > { %v2741_v25 = vpop.f32.mrf.mxu1  ;;  %v3059_v24 = vadd.f32 %v3027_v4, %v2991_v12  ;;  %v7779_v12 = vmul.f32 %v8356_v39, %v3099_v40  ;;  %v7792_v4 = vmul.f32 %v8351_v61, %v2860_v36  ;;  %v3737_v40 = vcombine.low %v7787_v32, %v7765_v47 }
 0x2ee   : > { %8399 = vst [vmem:[#allocation44_spill] sm:$0xff] %v7747_v15  ;;  %2817 = vst.msk [vmem:[#allocation2 + $0x210] sm:$0xff] %vm2785_vm2, %v7747_v15  ;;  %v7759_v11 = vadd.f32 %v2741_v25, %v2427_v56  ;;  %v2892_v15 = vmul.f32 %v6522_v30, %v7591_v13  ;;  %v2960_v13 = vmul.f32 %v8345_v28, %v7658_v1  ;;  %v3606_v19 = vpop.permute.xlu1 %3605 }
 0x2ef   : > { %v3163_v56 = vadd.f32 %v3131_v16, %v3059_v24  ;;  %v7798_v25 = vrot.slane %v3769_v10, %v7751_v37  ;;  %v3371_v16 = vmul.f32 %v8370_v33, %v7615_v9  ;;  %v2893_v36 = vmul.f32 %v6522_v30, %v7652_v35 }
 0x2f0   : > { %8401 = vst [vmem:[#allocation41_spill] sm:$0xff] %v7759_v11  ;;  %2816 = vst.msk [vmem:[#allocation2 + $0x208] sm:$0xff] %vm2785_vm2, %v7759_v11  ;;  %v2924_v43 = vadd.f32 %v7259_v62, %v2892_v15  ;;  %v3132_v10 = vmul.f32 %v6556_v60, %v7603_v20  ;;  %v7813_v11 = vsel %vm2785_vm2, %v7067_v54, %v3598_v53  ;;  %v7828_v54 = vld [vmem:[#allocation2 + $0x1e9] sm:$0xff] }
 0x2f1   : > { %v3231_v24 = vadd.f32 %v3199_v55, %v3163_v56  ;;  %v3200_v55 = vmul.f32 %v8365_v34, %v7687_v27  ;;  %v7821_v9 = vsel %vm2785_vm2, %v7228_v23, %v3606_v19  ;;  %v2961_v35 = vmul.f32 %v8345_v28, %v2855_v17 }
 0x2f2   : > { %v2992_v15 = vadd.f32 %v2960_v13, %v2924_v43  ;;  %v3028_v20 = vmul.f32 %v8351_v61, %v2856_v41  ;;  %v7826_v45 = vrot.slane %v3737_v40, %v7700_v2  ;;  %v3439_v53 = vmul.f32 %v8360_v29, %v7710_v63  ;;  %v3096_v43 = vld [vmem:[#allocation2 + $0x1f0] sm:$0xff] }
 0x2f3   : > { %v3299_v56 = vadd.f32 %v3267_v8, %v3231_v24  ;;  %v2895_v24 = vmul.f32 %v6522_v30, %v2855_v17  ;;  %v3134_v1 = vmul.f32 %v6556_v60, %v7687_v27  ;;  %v2925_v8 = vadd.f32 %v7259_v62, %v2893_v36 }
 0x2f4   : > { %v3060_v13 = vadd.f32 %v3028_v20, %v2992_v15  ;;  %v3753_v40 = vcombine.low %v7813_v11, %v7821_v9  ;;  %v2926_v17 = vadd.f32 %v7259_v62, %v2894_v51  ;;  %v3268_v48 = vmul.f32 %v8356_v39, %v3096_v43 }
 0x2f5   : > { %v3403_v23 = vadd.f32 %v3371_v16, %v3299_v56  ;;  %v3507_v16 = vmul.f32 %v7503_v46, %v7828_v54  ;;  %v2993_v36 = vadd.f32 %v2961_v35, %v2925_v8  ;;  %v2927_v15 = vadd.f32 %v7259_v62, %v2895_v24 }
 0x2f6   : > { %v3164_v59 = vadd.f32 %v3132_v10, %v3060_v13  ;;  %v2994_v31 = vadd.f32 %v2962_v5, %v2926_v17  ;;  %v7851_v30 = vrot.slane %v3753_v40, %v7700_v2  ;;  %v2928_v35 = vadd.f32 %v7259_v62, %v2896_v26  ;;  %v3098_v40 = vld [vmem:[#allocation2 + $0x210] sm:$0xff] }
 0x2f7   : > { %v2857_v19 = vld [vmem:[#allocation2 + $0x207] sm:$0xff]  ;;  %v2858_v49 = vld [vmem:[#allocation2 + $0x20f] sm:$0xff]  ;;  %v3471_v27 = vadd.f32 %v3439_v53, %v3403_v23  ;;  %v3201_v10 = vmul.f32 %v8365_v34, %v7767_v57  ;;  %v3202_v5 = vmul.f32 %v8365_v34, %v3096_v43  ;;  %v3135_v8 = vmul.f32 %v6556_v60, %v7767_v57 }
 0x2f8   : > { %v3029_v56 = vmul.f32 %v8351_v61, %v2857_v19  ;;  %v2963_v20 = vmul.f32 %v8345_v28, %v2857_v19  ;;  %v3030_v51 = vmul.f32 %v8351_v61, %v2858_v49  ;;  %v3097_v41 = vld [vmem:[#allocation2 + $0x208] sm:$0xff]  ;;  %v2964_v23 = vmul.f32 %v8345_v28, %v2858_v49 }
 0x2f9   : > { %v3539_v0 = vadd.f32 %v3507_v16, %v3471_v27  ;;  %v3232_v13 = vadd.f32 %v3200_v55, %v3164_v59  ;;  %v3269_v28 = vmul.f32 %v8356_v39, %v3097_v41  ;;  %v3136_v62 = vmul.f32 %v6556_v60, %v3096_v43  ;;  %v3337_v16 = vld [vmem:[#allocation2 + $0x209] sm:$0xff] }
 0x2fa   : > { %v3061_v52 = vadd.f32 %v3029_v56, %v2993_v36  ;;  %v2995_v53 = vadd.f32 %v2963_v20, %v2927_v15  ;;  %v3062_v19 = vadd.f32 %v3030_v51, %v2994_v31  ;;  %v2996_v17 = vadd.f32 %v2964_v23, %v2928_v35  ;;  %v3336_v35 = vld [vmem:[#allocation2 + $0x1f1] sm:$0xff] }
 0x2fb   : > { %3629 = vrot.lane.b32.xlu1 %v3539_v0, %s4838_s16  ;;  %v3373_v59 = vmul.f32 %v8370_v33, %v7710_v63  ;;  %v3270_v55 = vmul.f32 %v8356_v39, %v3098_v40  ;;  %v3300_v56 = vadd.f32 %v3268_v48, %v3232_v13  ;;  %v3204_v43 = vmul.f32 %v8365_v34, %v3098_v40 }
 0x2fc   : > { %v3165_v24 = vadd.f32 %v3133_v3, %v3061_v52  ;;  %v3063_v61 = vadd.f32 %v7770_v58, %v2995_v53  ;;  %v3166_v49 = vadd.f32 %v3134_v1, %v3062_v19  ;;  %v3801_v3 = vcombine.low %v7826_v45, %v7851_v30  ;;  %v3334_v1 = vld [vmem:[#allocation2 + $0x1d1] sm:$0xff] }
 0x2fd   : > { %v3203_v52 = vmul.f32 %v8365_v34, %v3097_v41  ;;  %v3064_v58 = vadd.f32 %v7792_v4, %v2996_v17  ;;  %v3441_v20 = vmul.f32 %v8360_v29, %v7828_v54  ;;  %v3372_v4 = vmul.f32 %v8370_v33, %v7629_v42 }
 0x2fe   : > { %v3233_v26 = vadd.f32 %v3201_v10, %v3165_v24  ;;  %v3167_v31 = vadd.f32 %v3135_v8, %v3063_v61  ;;  %v3234_v57 = vadd.f32 %v3202_v5, %v3166_v49  ;;  %v7877_v63 = vrot.slane %v3801_v3, %v7751_v37 }
 0x2ff   : > { %v3168_v60 = vadd.f32 %v3136_v62, %v3064_v58  ;;  %v3375_v51 = vmul.f32 %v8370_v33, %v7828_v54  ;;  %v3509_v34 = vmul.f32 %v7503_v46, %v3337_v16  ;;  %v3438_v53 = vmul.f32 %v8360_v29, %v7629_v42 }
 0x300   : > { %v3301_v27 = vadd.f32 %v3269_v28, %v3233_v26  ;;  %v3235_v36 = vadd.f32 %v3203_v52, %v3167_v31  ;;  %v3302_v0 = vadd.f32 %v3270_v55, %v3234_v57  ;;  %v3374_v23 = vmul.f32 %v8370_v33, %v3334_v1  ;;  %v3338_v26 = vld [vmem:[#allocation2 + $0x211] sm:$0xff] }
 0x301   : > { %v3236_v48 = vadd.f32 %v3204_v43, %v3168_v60  ;;  %v3443_v10 = vmul.f32 %v8360_v29, %v3337_v16  ;;  %v3404_v19 = vadd.f32 %v3372_v4, %v3300_v56  ;;  %v3470_v61 = vadd.f32 %v3438_v53, %v7735_v44  ;;  %v3340_v31 = vld [vmem:[#allocation2 + $0x231] sm:$0xff]  ;;  %v3604_v56 = vpop.permute.xlu0 %3603  ;;  %v8407_v53 = vld [vmem:[#allocation11_spill] sm:$0xff] }
 0x302   : > { %v3405_v15 = vadd.f32 %v3373_v59, %v3301_v27  ;;  %v3303_v39 = vadd.f32 %v7779_v12, %v3235_v36  ;;  %v3406_v54 = vadd.f32 %v3374_v23, %v3302_v0  ;;  %v3440_v13 = vmul.f32 %v8360_v29, %v3334_v1  ;;  %v8403_v0 = vld [vmem:[#allocation37_spill] sm:$0xff] }
 0x303   : > { %v3304_v5 = vadd.f32 %v7795_v6, %v3236_v48  ;;  %v3376_v40 = vmul.f32 %v8370_v33, %v3336_v35  ;;  %v3833_v42 = vcombine.low %v7798_v25, %v7877_v63  ;;  %v3506_v17 = vmul.f32 %v7503_v46, %v3334_v1  ;;  %v8405_v48 = vld [vmem:[#allocation5_spill] sm:$0xff] }
 0x304   : > { %v3473_v41 = vadd.f32 %v3441_v20, %v3405_v15  ;;  %v3407_v24 = vadd.f32 %v3375_v51, %v3303_v39  ;;  %v3442_v28 = vmul.f32 %v8360_v29, %v3336_v35  ;;  %v3472_v49 = vadd.f32 %v3440_v13, %v3404_v19  ;;  %v8402_v15 = vld [vmem:[#allocation8_spill] sm:$0xff]  ;;  %v8404_v39 = vld [vmem:[#allocation9_spill] sm:$0xff]  ;;  %v8408_v19 = vld [vmem:[#allocation18_spill] sm:$0xff] }
 0x305   : > { %v3408_v44 = vadd.f32 %v3376_v40, %v3304_v5  ;;  %v3538_v62 = vadd.f32 %v3506_v17, %v3470_v61  ;;  %v3508_v33 = vmul.f32 %v7503_v46, %v3336_v35  ;;  %v3444_v52 = vmul.f32 %v8360_v29, %v3338_v26  ;;  %v8409_v5 = vld [vmem:[#allocation46_spill] sm:$0xff]  ;;  %v8410_v61 = vld [vmem:[#allocation33_spill] sm:$0xff]  ;;  %v8412_v13 = vld [vmem:[#allocation36_spill] sm:$0xff] }
 0x306   : > { %v3541_v12 = vadd.f32 %v3509_v34, %v3473_v41  ;;  %v3475_v8 = vadd.f32 %v3443_v10, %v3407_v24  ;;  %v3474_v3 = vadd.f32 %v3442_v28, %v3406_v54  ;;  %v3510_v58 = vmul.f32 %v7503_v46, %v3338_v26  ;;  %v8406_v41 = vld [vmem:[#allocation23_spill] sm:$0xff]  ;;  %v8411_v54 = vld [vmem:[#allocation4_spill] sm:$0xff]  ;;  %v8413_v40 = vld [vmem:[#allocation6_spill] sm:$0xff] }
 0x307   : > { %v3540_v27 = vadd.f32 %v3508_v33, %v3472_v49  ;;  %v3476_v59 = vadd.f32 %v3444_v52, %v3408_v44  ;;  %v3512_v57 = vmul.f32 %v7503_v46, %v3340_v31  ;;  %v3802_v55 = vcombine.high %v7826_v45, %v7851_v30  ;;  %v8414_v49 = vld [vmem:[#allocation20_spill] sm:$0xff]  ;;  %v8415_v44 = vld [vmem:[#allocation31_spill] sm:$0xff] }
 0x308   : > { %3633 = vrot.lane.b32.xlu0 %v3541_v12, %s4838_s16  ;;  %v3543_v6 = vadd.f32 %v7782_v7, %v3475_v8  ;;  %v3754_v7 = vcombine.high %v7813_v11, %v7821_v9  ;;  %v3542_v16 = vadd.f32 %v3510_v58, %v3474_v3  ;;  %v3722_v29 = vcombine.high %v7697_v18, %v7691_v22 }
 0x309   : > { %v3770_v36 = vcombine.high %v7743_v14, %v7738_v38  ;;  %v3738_v1 = vcombine.high %v7787_v32, %v7765_v47  ;;  %v3544_v46 = vadd.f32 %v3512_v57, %v3476_v59  ;;  %v3706_v11 = vcombine.high %v7719_v21, %v7704_v50  ;;  %v3608_v32 = vpop.permute.xlu1 %3607 }
 0x30a   : > { %3637 = vrot.lane.b32.xlu1 %v3543_v6, %s4838_s16  ;;  %v3768_v45 = vrot.slane %v3754_v7, %v7700_v2  ;;  %v3816_v9 = vrot.slane %v3802_v55, %v7751_v37  ;;  %v3834_v30 = vcombine.high %v7798_v25, %v7877_v63  ;;  %v3736_v22 = vrot.slane %v3722_v29, %v7700_v2 }
 0x30b   : > { %v3784_v18 = vrot.slane %v3770_v36, %v7751_v37  ;;  %v3752_v38 = vrot.slane %v3738_v1, %v7700_v2  ;;  %v3720_v50 = vrot.slane %v3706_v11, %v7700_v2  ;;  %v3688_v20 = vsel %vm2785_vm2, %v8402_v15, %v3608_v32 }
 0x30c   : > { %3627 = vrot.lane.b32.xlu0 %v3538_v62, %s4838_s16  ;;  %v3680_v51 = vsel %vm2785_vm2, %v8404_v39, %v8403_v0  ;;  %v3684_v34 = vsel %vm2785_vm2, %v8406_v41, %v8405_v48  ;;  %v3686_v35 = vsel %vm2785_vm2, %v8407_v53, %v3604_v56  ;;  %v3676_v12 = vsel %vm2785_vm2, %v8409_v5, %v8408_v19 }
 0x30d   : > { %v3817_v21 = vcombine.low %v3752_v38, %v3768_v45  ;;  %v3835_v14 = vcombine.low %v3784_v18, %v3816_v9  ;;  %v3785_v47 = vcombine.low %v3720_v50, %v3736_v22  ;;  %v3836_v43 = vcombine.high %v3784_v18, %v3816_v9 }
 0x30e   : > { %3631 = vrot.lane.b32.xlu1 %v3540_v27, %s4838_s16  ;;  %v3818_v23 = vcombine.high %v3752_v38, %v3768_v45  ;;  %v4025_v24 = vcombine.low %v3684_v34, %v3688_v20  ;;  %v3678_v8 = vsel %vm2785_vm2, %v8411_v54, %v8410_v61  ;;  %v3682_v17 = vsel %vm2785_vm2, %v8413_v40, %v8412_v13  ;;  %v8416_v13 = vld [vmem:[#allocation13_spill] sm:$0xff] }
 0x30f   : > { %v3825_v60 = vrot.slane %v3817_v21, %v7751_v37  ;;  %v3793_v4 = vrot.slane %v3785_v47, %v7751_v37  ;;  %v3786_v26 = vcombine.high %v3720_v50, %v3736_v22  ;;  %v3993_v28 = vcombine.low %v3676_v12, %v3680_v51 }
 0x310   : > { %3635 = vrot.lane.b32.xlu0 %v3542_v16, %s4838_s16  ;;  %v4009_v6 = vcombine.low %v3682_v17, %v3686_v35  ;;  %v3674_v62 = vsel %vm2785_vm2, %v8415_v44, %v8414_v49  ;;  %v3832_v31 = vrot.slane %v3818_v23, %v7751_v37  ;;  %v4033_v33 = vrot.slane %v4025_v24, %v7700_v2  ;;  %v3610_v24 = vpop.permute.xlu0 %3609 }
 0x311   : > { %v3837_v10 = vcombine.low %v3793_v4, %v3825_v60  ;;  %v3977_v3 = vcombine.low %v3674_v62, %v3678_v8  ;;  %v3838_v52 = vcombine.high %v3793_v4, %v3825_v60  ;;  %v3800_v58 = vrot.slane %v3786_v26, %v7751_v37  ;;  %v8417_v26 = vld [vmem:[#allocation25_spill] sm:$0xff] }
 0x312   : > { %3639 = vrot.lane.b32.xlu1 %v3544_v46, %s4838_s16  ;;  %v4001_v27 = vrot.slane %v3993_v28, %v7700_v2  ;;  %v4017_v59 = vrot.slane %v4009_v6, %v7700_v2  ;;  %v4026_v46 = vcombine.high %v3684_v34, %v3688_v20  ;;  %v3994_v9 = vcombine.high %v3676_v12, %v3680_v51  ;;  %s4853_s16 = smov 104   ;;  %v8418_v6 = vld [vmem:[#allocation26_spill] sm:$0xff] }
 0x313   : > { %v3985_v57 = vrot.slane %v3977_v3, %v7700_v2  ;;  %v3839_v55 = vcombine.low %v3800_v58, %v3832_v31  ;;  %v3840_v36 = vcombine.high %v3800_v58, %v3832_v31  ;;  %v4010_v22 = vcombine.high %v3682_v17, %v3686_v35  ;;  %v8419_v3 = vld [vmem:[#allocation14_spill] sm:$0xff]  ;;  %v8420_v58 = vld [vmem:[#allocation32_spill] sm:$0xff] }
 0x314   : > { %4251 = vrot.lane.b32.xlu0 %v3834_v30, %s4841_s22  ;;  %v4073_v7 = vcombine.low %v4017_v59, %v4033_v33  ;;  %v4074_v11 = vcombine.high %v4017_v59, %v4033_v33  ;;  %v3978_v18 = vcombine.high %v3674_v62, %v3678_v8  ;;  %v4040_v38 = vrot.slane %v4026_v46, %v7700_v2  ;;  %v7983_v19 = vpop.permute.xlu0 %3611  ;;  %v8421_v59 = vld [vmem:[#allocation28_spill] sm:$0xff] }
 0x315   : > { %v4041_v16 = vcombine.low %v3985_v57, %v4001_v27  ;;  %v4042_v30 = vcombine.high %v3985_v57, %v4001_v27  ;;  %v4024_v32 = vrot.slane %v4010_v22, %v7700_v2  ;;  %v3689_v31 = vsel %vm2785_vm2, %v8419_v3, %v3610_v24 }
 0x316   : > { %v4081_v29 = vrot.slane %v4073_v7, %v7751_v37  ;;  %v4088_v50 = vrot.slane %v4074_v11, %v7751_v37  ;;  %v3992_v56 = vrot.slane %v3978_v18, %v7700_v2 }
 0x317   : > { %v4049_v1 = vrot.slane %v4041_v16, %v7751_v37  ;;  %v4056_v47 = vrot.slane %v4042_v30, %v7751_v37  ;;  %v4089_v60 = vcombine.low %v4024_v32, %v4040_v38  ;;  %v4090_v39 = vcombine.high %v4024_v32, %v4040_v38 }
 0x318   : > { %4259 = vrot.lane.b32.xlu0 %v3835_v14, %s4842_s23  ;;  %v4008_v14 = vrot.slane %v3994_v9, %v7700_v2 }
 0x319   : > { %v4105_v45 = vcombine.low %v4049_v1, %v4081_v29  ;;  %v4106_v21 = vcombine.high %v4049_v1, %v4081_v29  ;;  %v4097_v20 = vrot.slane %v4089_v60, %v7751_v37  ;;  %v4108_v4 = vcombine.high %v4056_v47, %v4088_v50  ;;  %v8422_v29 = vld [vmem:[#allocation19_spill] sm:$0xff]  ;;  %v8423_v1 = vld [vmem:[#allocation41_spill] sm:$0xff] }
 0x31a   : > { %v4057_v15 = vcombine.low %v3992_v56, %v4008_v14  ;;  %v4058_v48 = vcombine.high %v3992_v56, %v4008_v14  ;;  %v4104_v41 = vrot.slane %v4090_v39, %v7751_v37 }
 0x31c   : > { %4267 = vrot.lane.b32.xlu0 %v3836_v43, %s4843_s24  ;;  %v4107_v43 = vcombine.low %v4056_v47, %v4088_v50  ;;  %v4065_v0 = vrot.slane %v4057_v15, %v7751_v37  ;;  %v4072_v53 = vrot.slane %v4058_v48, %v7751_v37 }
 0x31e   : > { %v4109_v51 = vcombine.low %v4065_v0, %v4097_v20  ;;  %v4110_v34 = vcombine.high %v4065_v0, %v4097_v20  ;;  %v4111_v35 = vcombine.low %v4072_v53, %v4104_v41  ;;  %v4112_v23 = vcombine.high %v4072_v53, %v4104_v41 }
 0x320   : > { %4275 = vrot.lane.b32.xlu0 %v3837_v10, %s4844_s25  ;;  %v3614_v10 = vpop.permute.xlu1 %3613 }
 0x321   : > { %v3618_v12 = vpop.permute.xlu0 %3617  ;;  %v3691_v28 = vsel %vm2785_vm2, %v8417_v26, %v3614_v10  ;;  %v8424_v26 = vld [vmem:[#allocation44_spill] sm:$0xff] }
 0x322   : > { %v3693_v49 = vsel %vm2785_vm2, %v8418_v6, %v3618_v12 }
 0x323   : > { %v3842_v20 = vcombine.high %v3689_v31, %v3693_v49 }
 0x324   : > { %4283 = vrot.lane.b32.xlu0 %v3838_v52, %s4845_s26  ;;  %v7985_v5 = vpop.permute.xlu1 %3615  ;;  %v3841_v52 = vcombine.low %v3689_v31, %v3693_v49  ;;  %v8425_v49 = vld [vmem:[#allocation21_spill] sm:$0xff]  ;;  %v8427_v31 = vld [vmem:[#allocation3_spill] sm:$0xff] }
 0x325   : > { %v7987_v54 = vpop.permute.xlu0 %3619 }
 0x328   : > { %4291 = vrot.lane.b32.xlu0 %v3839_v55, %s4846_s27 }
 0x32c   : > { %4299 = vrot.lane.b32.xlu0 %v3840_v36, %s4847_s28 }
 0x330   : > { %4307 = vrot.lane.b32.xlu0 %v4105_v45, %s4848_s29  ;;  %v3849_v45 = vrot.slane %v3841_v52, %v7700_v2 }
 0x334   : > { %4315 = vrot.lane.b32.xlu0 %v4106_v21, %s4849_s11 }
 0x338   : > { %4323 = vrot.lane.b32.xlu0 %v4107_v43, %s4850_s12 }
 0x33c   : > { %4331 = vrot.lane.b32.xlu0 %v4108_v4, %s4851_s13 }
 0x340   : > { %4339 = vrot.lane.b32.xlu0 %v4109_v51, %s4852_s15 }
 0x343   : > { %v3622_v61 = vpop.permute.xlu1 %3621 }
 0x344   : > { %4347 = vrot.lane.b32.xlu0 %v4110_v34, %s4853_s16  ;;  %v3695_v40 = vsel %vm2785_vm2, %v8416_v13, %v3622_v61 }
 0x345   : > { %v3857_v44 = vcombine.low %v3691_v28, %v3695_v40  ;;  %v3858_v47 = vcombine.high %v3691_v28, %v3695_v40 }
 0x347   : > { %v3624_v8 = vpop.permute.xlu1 %3623  ;;  %v3865_v7 = vrot.slane %v3857_v44, %v7700_v2  ;;  %v3872_v48 = vrot.slane %v3858_v47, %v7700_v2 }
 0x348   : > { %4355 = vrot.lane.b32.xlu0 %v4111_v35, %s4854_s14  ;;  %v3696_v44 = vsel %vm2785_vm2, %v8425_v49, %v3624_v8  ;;  %v8430_v8 = vld [vmem:[#allocation27_spill] sm:$0xff] }
 0x349   : > { %v3905_v30 = vcombine.low %v3849_v45, %v3865_v7  ;;  %v3906_v32 = vcombine.high %v3849_v45, %v3865_v7  ;;  %v8431_v45 = vld [vmem:[#allocation24_spill] sm:$0xff] }
 0x34b   : > { %v8010_v56 = vrot.slane %v3905_v30, %v7751_v37  ;;  %v3920_v41 = vrot.slane %v3906_v32, %v7751_v37 }
 0x34c   : > { %4363 = vrot.lane.b32.xlu0 %v4112_v23, %s4855_s17  ;;  %v3856_v23 = vrot.slane %v3842_v20, %v7700_v2 }
 0x34e   : > { %v3921_v12 = vcombine.low %v3856_v23, %v3872_v48 }
 0x350   : > { %v3929_v6 = vrot.slane %v3921_v12, %v7751_v37 }
 0x35c   : > { %v3626_v17 = vpop.permute.xlu0 %3625 }
 0x35d   : > { %v3697_v57 = vsel %vm2785_vm2, %v8421_v59, %v3626_v17 }
 0x36d   : > { %v3630_v62 = vpop.permute.xlu1 %3629 }
 0x36e   : > { %v3699_v36 = vsel %vm2785_vm2, %v8422_v29, %v3630_v62  ;;  %v8426_v62 = vld [vmem:[#allocation15_spill] sm:$0xff] }
 0x37a   : > { %v3634_v33 = vpop.permute.xlu0 %3633 }
 0x37b   : > { %v3701_v27 = vsel %vm2785_vm2, %v8420_v58, %v3634_v33 }
 0x37c   : > { %v3873_v55 = vcombine.low %v3697_v57, %v3701_v27  ;;  %v3638_v16 = vpop.permute.xlu1 %3637  ;;  %v3874_v60 = vcombine.high %v3697_v57, %v3701_v27  ;;  %v8428_v57 = vld [vmem:[#allocation10_spill] sm:$0xff] }
 0x37d   : > { %v3703_v46 = vsel %vm2785_vm2, %v8423_v1, %v3638_v16  ;;  %v3692_v7 = vsel %vm2785_vm2, %v8428_v57, %v7985_v5 }
 0x37e   : > { %v3628_v11 = vpop.permute.xlu0 %3627  ;;  %v3889_v9 = vcombine.low %v3699_v36, %v3703_v46  ;;  %v3881_v22 = vrot.slane %v3873_v55, %v7700_v2  ;;  %v3890_v50 = vcombine.high %v3699_v36, %v3703_v46  ;;  %v3888_v34 = vrot.slane %v3874_v60, %v7700_v2  ;;  %v8429_v55 = vld [vmem:[#allocation16_spill] sm:$0xff] }
 0x37f   : > { %v3694_v16 = vsel %vm2785_vm2, %v8429_v55, %v7987_v54  ;;  %v3698_v29 = vsel %vm2785_vm2, %v8430_v8, %v3628_v11  ;;  %v3922_v36 = vcombine.high %v3856_v23, %v3872_v48  ;;  %v4129_v1 = vcombine.low %v3692_v7, %v3696_v44 }
 0x380   : > { %v3897_v18 = vrot.slane %v3889_v9, %v7700_v2  ;;  %v3904_v4 = vrot.slane %v3890_v50, %v7700_v2  ;;  %v3632_v39 = vpop.permute.xlu1 %3631  ;;  %v3690_v9 = vsel %vm2785_vm2, %v8431_v45, %v7983_v19 }
 0x381   : > { %v3700_v3 = vsel %vm2785_vm2, %v8426_v62, %v3632_v39  ;;  %v4137_v11 = vrot.slane %v4129_v1, %v7700_v2  ;;  %v4114_v12 = vcombine.high %v3690_v9, %v3694_v16 }
 0x382   : > { %v3636_v38 = vpop.permute.xlu0 %3635  ;;  %v3937_v21 = vcombine.low %v3881_v22, %v3897_v18  ;;  %v3938_v14 = vcombine.high %v3881_v22, %v3897_v18  ;;  %v3953_v24 = vcombine.low %v3888_v34, %v3904_v4  ;;  %v3954_v58 = vcombine.high %v3888_v34, %v3904_v4 }
 0x383   : > { %v3702_v33 = vsel %vm2785_vm2, %v8427_v31, %v3636_v38  ;;  %v4113_v22 = vcombine.low %v3690_v9, %v3694_v16  ;;  %v3936_v38 = vrot.slane %v3922_v36, %v7751_v37  ;;  %v4130_v34 = vcombine.high %v3692_v7, %v3696_v44 }
 0x384   : > { %v8013_v43 = vrot.slane %v3937_v21, %v7751_v37  ;;  %v3952_v0 = vrot.slane %v3938_v14, %v7751_v37  ;;  %v3640_v61 = vpop.permute.xlu1 %3639  ;;  %v3961_v40 = vrot.slane %v3953_v24, %v7751_v37  ;;  %v4145_v46 = vcombine.low %v3698_v29, %v3702_v33 }
 0x385   : > { %v3704_v28 = vsel %vm2785_vm2, %v8424_v26, %v3640_v61  ;;  %v3968_v5 = vrot.slane %v3954_v58, %v7751_v37  ;;  %v4121_v14 = vrot.slane %v4113_v22, %v7700_v2  ;;  %v4146_v24 = vcombine.high %v3698_v29, %v3702_v33 }
 0x386   : > { %v8015_v15 = vpop.permute.xlu0 %4251  ;;  %v3970_v51 = vcombine.high %v8010_v56, %v8013_v43  ;;  %v3969_v35 = vcombine.low %v8010_v56, %v8013_v43  ;;  %v3971_v10 = vcombine.low %v3920_v41, %v3952_v0  ;;  %v3972_v17 = vcombine.high %v3920_v41, %v3952_v0 }
 0x387   : > { %v4161_v27 = vcombine.low %v3700_v3, %v3704_v28  ;;  %v3973_v59 = vcombine.low %v3929_v6, %v3961_v40  ;;  %v3974_v54 = vcombine.high %v3929_v6, %v3961_v40  ;;  %v4153_v50 = vrot.slane %v4145_v46, %v7700_v2 }
 0x388   : > { %4253 = vrot.lane.b32.xlu1 %v3970_v51, %s4841_s22  ;;  %v3975_v47 = vcombine.low %v3936_v38, %v3968_v5  ;;  %v4177_v32 = vcombine.low %v4121_v14, %v4137_v11  ;;  %v3976_v4 = vcombine.high %v3936_v38, %v3968_v5  ;;  %v4162_v51 = vcombine.high %v3700_v3, %v3704_v28 }
 0x389   : > { %v4169_v18 = vrot.slane %v4161_v27, %v7700_v2  ;;  %v4178_v23 = vcombine.high %v4121_v14, %v4137_v11  ;;  %v4144_v26 = vrot.slane %v4130_v34, %v7700_v2  ;;  %v4160_v28 = vrot.slane %v4146_v24, %v7700_v2 }
 0x38a   : > { %v8025_v53 = vpop.permute.xlu0 %4259  ;;  %v4185_v0 = vrot.slane %v4177_v32, %v7751_v37  ;;  %v4176_v61 = vrot.slane %v4162_v51, %v7700_v2  ;;  %v4128_v44 = vrot.slane %v4114_v12, %v7700_v2  ;;  %v4370_v57 = vsel %vm4369_vm3, %v3833_v42, %v8015_v15 }
 0x38b   : > { %v4209_v19 = vcombine.low %v4153_v50, %v4169_v18  ;;  %v4210_v48 = vcombine.high %v4153_v50, %v4169_v18  ;;  %v4192_v6 = vrot.slane %v4178_v23, %v7751_v37  ;;  %v4372_v2 = vsel %vm365_vm0, %v4370_v57, %v8025_v53 }
 0x38c   : > { %4261 = vrot.lane.b32.xlu1 %v3971_v10, %s4842_s23  ;;  %v4225_v62 = vcombine.low %v4160_v28, %v4176_v61  ;;  %v4193_v31 = vcombine.low %v4128_v44, %v4144_v26  ;;  %v4226_v55 = vcombine.high %v4160_v28, %v4176_v61  ;;  %v4194_v25 = vcombine.high %v4128_v44, %v4144_v26 }
 0x38d   : > { %v4217_v20 = vrot.slane %v4209_v19, %v7751_v37  ;;  %v4224_v40 = vrot.slane %v4210_v48, %v7751_v37 }
 0x38e   : > { %v8031_v13 = vpop.permute.xlu0 %4267  ;;  %v4233_v58 = vrot.slane %v4225_v62, %v7751_v37  ;;  %v4240_v53 = vrot.slane %v4226_v55, %v7751_v37  ;;  %v4208_v1 = vrot.slane %v4194_v25, %v7751_v37 }
 0x38f   : > { %v4241_v41 = vcombine.low %v4185_v0, %v4217_v20  ;;  %v4243_v3 = vcombine.low %v4192_v6, %v4224_v40  ;;  %v4244_v27 = vcombine.high %v4192_v6, %v4224_v40  ;;  %v4375_v16 = vsel %vm4374_vm4, %v4372_v2, %v8031_v13 }
 0x390   : > { %4269 = vrot.lane.b32.xlu1 %v3972_v17, %s4843_s24  ;;  %v4242_v17 = vcombine.high %v4185_v0, %v4217_v20  ;;  %v4247_v22 = vcombine.low %v4208_v1, %v4240_v53  ;;  %v4248_v11 = vcombine.high %v4208_v1, %v4240_v53 }
 0x392   : > { %v8044_v52 = vpop.permute.xlu0 %4275 }
 0x393   : > { %v4378_v29 = vsel %vm4377_vm5, %v4375_v16, %v8044_v52 }
 0x394   : > { %4277 = vrot.lane.b32.xlu1 %v3973_v59, %s4844_s25  ;;  %v4201_v59 = vrot.slane %v4193_v31, %v7751_v37 }
 0x396   : > { %v8058_v30 = vpop.permute.xlu0 %4283  ;;  %v4245_v8 = vcombine.low %v4201_v59, %v4233_v58  ;;  %v4246_v36 = vcombine.high %v4201_v59, %v4233_v58 }
 0x397   : > { %v4381_v63 = vsel %vm4380_vm6, %v4378_v29, %v8058_v30 }
 0x398   : > { %4285 = vrot.lane.b32.xlu1 %v3974_v54, %s4845_s26 }
 0x39a   : > { %v4292_v21 = vpop.permute.xlu0 %4291 }
 0x39b   : > { %v4384_v42 = vsel %vm4383_vm7, %v4381_v63, %v4292_v21 }
 0x39c   : > { %4293 = vrot.lane.b32.xlu1 %v3975_v47, %s4846_s27 }
 0x39e   : > { %v4300_v60 = vpop.permute.xlu0 %4299 }
 0x39f   : > { %v4387_v13 = vsel %vm4386_vm8, %v4384_v42, %v4300_v60 }
 0x3a0   : > { %4301 = vrot.lane.b32.xlu1 %v3976_v4, %s4847_s28 }
 0x3a2   : > { %v4308_v39 = vpop.permute.xlu0 %4307 }
 0x3a3   : > { %v4390_v52 = vsel %vm4389_vm9, %v4387_v13, %v4308_v39 }
 0x3a4   : > { %4309 = vrot.lane.b32.xlu1 %v4241_v41, %s4848_s29 }
 0x3a6   : > { %v4316_v10 = vpop.permute.xlu0 %4315 }
 0x3a7   : > { %v4393_v46 = vsel %vm4392_vm10, %v4390_v52, %v4316_v10 }
 0x3a8   : > { %4317 = vrot.lane.b32.xlu1 %v4242_v17, %s4849_s11 }
 0x3aa   : > { %v4324_v49 = vpop.permute.xlu0 %4323 }
 0x3ab   : > { %v4396_v45 = vsel %vm4395_vm11, %v4393_v46, %v4324_v49 }
 0x3ac   : > { %4325 = vrot.lane.b32.xlu1 %v4243_v3, %s4850_s12 }
 0x3ae   : > { %v4332_v33 = vpop.permute.xlu0 %4331 }
 0x3af   : > { %v4399_v30 = vsel %vm4398_vm12, %v4396_v45, %v4332_v33 }
 0x3b0   : > { %4333 = vrot.lane.b32.xlu1 %v4244_v27, %s4851_s13 }
 0x3b2   : > { %v4340_v7 = vpop.permute.xlu0 %4339 }
 0x3b3   : > { %v4402_v5 = vsel %vm4401_vm13, %v4399_v30, %v4340_v7 }
 0x3b4   : > { %4341 = vrot.lane.b32.xlu1 %v4245_v8, %s4852_s15 }
 0x3b6   : > { %v4348_v15 = vpop.permute.xlu0 %4347 }
 0x3b7   : > { %v4405_v18 = vsel %vm4404_vm14, %v4402_v5, %v4348_v15 }
 0x3b8   : > { %4349 = vrot.lane.b32.xlu1 %v4246_v36, %s4853_s16 }
 0x3ba   : > { %v4356_v9 = vpop.permute.xlu0 %4355 }
 0x3bb   : > { %v4408_v37 = vsel %vm4407_vm15, %v4405_v18, %v4356_v9 }
 0x3bc   : > { %4357 = vrot.lane.b32.xlu1 %v4247_v22, %s4854_s14 }
 0x3be   : > { %v4364_v54 = vpop.permute.xlu0 %4363 }
 0x3bf   : > { %v4411_v38 = vsel %vm4410_vm1, %v4408_v37, %v4364_v54 }
 0x3c0   : > { %4413 = vst [vmem:[%s8113_s21] sm:$0xff] %v4411_v38  ;;  %4365 = vrot.lane.b32.xlu1 %v4248_v11, %s4855_s17 }
 0x3fa   : > { %v4254_v50 = vpop.permute.xlu1 %4253 }
 0x3fb   : > { %v4371_v51 = vsel %vm4369_vm3, %v3969_v35, %v4254_v50 }
 0x3fe   : > { %v4262_v21 = vpop.permute.xlu1 %4261 }
 0x3ff   : > { %v4373_v48 = vsel %vm365_vm0, %v4371_v51, %v4262_v21 }
 0x402   : > { %v4270_v14 = vpop.permute.xlu1 %4269 }
 0x403   : > { %v4376_v34 = vsel %vm4374_vm4, %v4373_v48, %v4270_v14 }
 0x406   : > { %v4278_v19 = vpop.permute.xlu1 %4277 }
 0x407   : > { %v4379_v23 = vsel %vm4377_vm5, %v4376_v34, %v4278_v19 }
 0x40a   : > { %v4286_v47 = vpop.permute.xlu1 %4285 }
 0x40b   : > { %v4382_v24 = vsel %vm4380_vm6, %v4379_v23, %v4286_v47 }
 0x40e   : > { %v4294_v32 = vpop.permute.xlu1 %4293 }
 0x40f   : > { %v4385_v10 = vsel %vm4383_vm7, %v4382_v24, %v4294_v32 }
 0x412   : > { %v4302_v60 = vpop.permute.xlu1 %4301 }
 0x413   : > { %v4388_v61 = vsel %vm4386_vm8, %v4385_v10, %v4302_v60 }
 0x416   : > { %v4310_v20 = vpop.permute.xlu1 %4309 }
 0x417   : > { %v4391_v40 = vsel %vm4389_vm9, %v4388_v61, %v4310_v20 }
 0x41a   : > { %v4318_v4 = vpop.permute.xlu1 %4317 }
 0x41b   : > { %v4394_v56 = vsel %vm4392_vm10, %v4391_v40, %v4318_v4 }
 0x41e   : > { %v4326_v0 = vpop.permute.xlu1 %4325 }
 0x41f   : > { %v4397_v43 = vsel %vm4395_vm11, %v4394_v56, %v4326_v0 }
 0x422   : > { %v4334_v39 = vpop.permute.xlu1 %4333 }
 0x423   : > { %v4400_v17 = vsel %vm4398_vm12, %v4397_v43, %v4334_v39 }
 0x426   : > { %v4342_v41 = vpop.permute.xlu1 %4341 }
 0x427   : > { %v4403_v26 = vsel %vm4401_vm13, %v4400_v17, %v4342_v41 }
 0x42a   : > { %v4350_v12 = vpop.permute.xlu1 %4349 }
 0x42b   : > { %v4406_v6 = vsel %vm4404_vm14, %v4403_v26, %v4350_v12 }
 0x42e   : > { %v4358_v35 = vpop.permute.xlu1 %4357 }
 0x42f   : > { %v4409_v28 = vsel %vm4407_vm15, %v4406_v6, %v4358_v35 }
 0x432   : > { %v4366_v49 = vpop.permute.xlu1 %4365 }
 0x433   : > { %v4412_v44 = vsel %vm4410_vm1, %v4409_v28, %v4366_v49 }
 0x434   : > { %4414 = vst [vmem:[%s8113_s21 + $0x8] sm:$0xff] %v4412_v44 }
 0x435 PF: > { %s19_s30 = sadd.s32 1, %s4831_s30  }
 0x436   : > { %p16_p4 = scmp.ge.s32.totalorder %s19_s30, 4  }
 0x438   :  { %18 = sbr.rel (!%p16_p4) target bundleno = 1 (0x1), region = 88 }

</bundles_post_ra>
